<compile_context>
chip_gen: v7x
topology: tpu7x:2x2x1
jax: 0.10.0
libtpu: 0.0.40
codegen_flags: <defaults>
</compile_context>

<pallas_src>
import jax
import jax.numpy as jnp
from jax import lax
from jax.experimental import pallas as pl
from jax.experimental.pallas import tpu as pltpu

# ----------------------------- model dims -----------------------------------
V_SRC = 37        # source vocab
V_TGT = 41        # target vocab
V_PAD = 128       # lane-dense padded vocab for the output head
EMB = 32          # embedding size
ENC_H = 32        # encoder GRU hidden (per direction)
DEC_H = 32        # decoder GRU hidden
CTX = 2 * ENC_H   # encoder context feature size (bidirectional)
LANE = 128        # vreg lane width; one 128-lane chunk per GRU gate
G3 = 3 * LANE     # packed gate width [r | z | n], each a 128-lane chunk


# ----------------------------- GRU step (shared) ------------------------------
def _gru_step(xg, m, h, wh_bf16, bh):
    """One GRU step on a lane-padded hidden.

    h:   (B, 128)  fwd payload lanes [0:32), (encoder also) bwd in [32:64), rest 0
    xg:  (B, 384)  precomputed x@W_i+b_i, gate g in lanes [g*128, g*128+128)
    m:   (B, 128)  validity mask (1=valid, 0=pad), per-lane (per-direction)
    wh:  (128,384) bf16 packed hidden-gate weights (block structured, zero pads)
    """
    hg = jnp.dot(h.astype(jnp.bfloat16), wh_bf16,
                 preferred_element_type=jnp.float32) + bh
    r = jax.nn.sigmoid(xg[:, 0:LANE] + hg[:, 0:LANE])
    z = jax.nn.sigmoid(xg[:, LANE:2 * LANE] + hg[:, LANE:2 * LANE])
    n = jnp.tanh(xg[:, 2 * LANE:3 * LANE] + r * hg[:, 2 * LANE:3 * LANE])
    h_cand = (1.0 - z) * n + z * h
    h_new = m * h_cand + (1.0 - m) * h      # carry hidden over padded steps
    return h_new, m * h_cand                # pack_padded output = 0 at pads


# ----------------------------- fused forward kernel ---------------------------
def seq2seq_kernel(xg_ref, xm_ref, ewh_ref, ebh_ref, fcw_ref, fcb_ref,
                   yg_ref, ym_ref, valid_ref, dwh_ref, dbh_ref,
                   win_ref, woc_ref, wod_ref, bo_ref, wp_ref, bp_ref,
                   logp_ref, attn_ref, ctx_buf, dec_buf):
    Tx, B, _ = xg_ref.shape
    Ty = yg_ref.shape[0]

    # ---------------- encoder: fwd+bwd GRU fused into ONE time loop -----------
    # Backward direction is pre-flipped in the wrapper (lanes [32:64) of every
    # gate chunk), so both directions walk t ascending -> static vld/vst only.
    ewh = ewh_ref[...]                                   # (128, 384) bf16
    ebh = ebh_ref[...]                                   # (1, 384)   f32
    h = jnp.zeros((B, LANE), jnp.float32)
    enc_steps = []
    for s in range(Tx):                                  # static unroll
        h, out = _gru_step(xg_ref[s], xm_ref[s], h, ewh, ebh)
        enc_steps.append(out)                            # stays in registers

    # context[t] = [fwd hidden @ t | bwd hidden @ t]; the bwd hidden for time t
    # was produced at loop step Tx-1-t (it processed flipped time).  One cheap
    # lane-select per row, then lane-dense rows into VMEM scratch.
    lane_idx = lax.broadcasted_iota(jnp.int32, (B, LANE), 1)
    is_fwd_lane = lane_idx < ENC_H
    for t in range(Tx):
        ctx_buf[:, t, :] = jnp.where(is_fwd_lane, enc_steps[t],
                                     enc_steps[Tx - 1 - t])

    # hid = tanh(Linear(cat(h_fwd_final, h_bwd_final)))  -> decoder initial h
    h = jnp.tanh(jnp.dot(h, fcw_ref[...],
                         preferred_element_type=jnp.float32) + fcb_ref[...])

    # ---------------- decoder GRU (init = hid) --------------------------------
    dwh = dwh_ref[...]                                   # (128, 384) bf16
    dbh = dbh_ref[...]
    for t in range(Ty):                                  # static unroll
        h, out = _gru_step(yg_ref[t], ym_ref[t], h, dwh, dbh)
        dec_buf[:, t, :] = out                           # lane-dense row store

    dec = dec_buf[...]                                   # (B, Ty, 128)
    ctx = ctx_buf[...]                                   # (B, Tx, 128)

    # ---------------- attention ----------------------------------------------
    # Batch-independent matmul flattened over B*Tx; scores / ctx_att batched.
    ctx_in = jnp.dot(ctx.reshape(B * Tx, LANE), win_ref[...],
                     preferred_element_type=jnp.float32).reshape(B, Tx, LANE)
    scores = jnp.einsum('byh,bxh->byx', dec, ctx_in,
                        preferred_element_type=jnp.float32)          # (B,Ty,Tx)
    scores = jnp.where(valid_ref[...] > 0.5, scores, jnp.float32(-1e6))
    smax = jnp.max(scores, axis=-1, keepdims=True)
    e = jnp.exp(scores - smax)
    attn = e / jnp.sum(e, axis=-1, keepdims=True)
    attn_ref[...] = attn                                 # one tiny store (Tx lanes)
    ctx_att = jnp.einsum('byx,bxh->byh', attn, ctx,
                         preferred_element_type=jnp.float32)          # (B,Ty,128)

    # ---------------- output head, flattened over B*Ty, 128-lane vocab --------
    hcat = jnp.tanh(
        jnp.dot(ctx_att.reshape(B * Ty, LANE), woc_ref[...],
                preferred_element_type=jnp.float32)
        + jnp.dot(dec.reshape(B * Ty, LANE), wod_ref[...],
                  preferred_element_type=jnp.float32)
        + bo_ref[...])                                   # == Linear(cat(ctx,dec))
    logits = jnp.dot(hcat, wp_ref[...],
                     preferred_element_type=jnp.float32) + bp_ref[...]
    lmax = jnp.max(logits, axis=-1, keepdims=True)
    lse = jnp.log(jnp.sum(jnp.exp(logits - lmax), axis=-1,
                          keepdims=True)) + lmax
    logp_ref[...] = (logits - lse).reshape(B, Ty, V_PAD)  # lane-dense slab


def seq2seq_pallas(xg, xm, yg, ym, valid, p):
    Tx, B, _ = xg.shape
    Ty = yg.shape[0]
    return pl.pallas_call(
        seq2seq_kernel,
        out_shape=(jax.ShapeDtypeStruct((B, Ty, V_PAD), jnp.float32),
                   jax.ShapeDtypeStruct((B, Ty, Tx), jnp.float32)),
        scratch_shapes=[pltpu.VMEM((B, Tx, LANE), jnp.float32),   # context
                        pltpu.VMEM((B, Ty, LANE), jnp.float32)],  # dec outputs
    )(xg, xm, p["enc_wh"], p["enc_bh"], p["enc_fc_w"], p["enc_fc_b"],
      yg, ym, valid, p["dec_wh"], p["dec_bh"],
      p["attn_in_w"], p["attn_out_wc"], p["attn_out_wd"], p["attn_out_b"],
      p["out_w"], p["out_b"])


# ----------------------------- forward (glue in plain JAX) --------------------
def seq2seq_forward(params, x, x_lengths, y, y_lengths):
    B, Tx = x.shape
    Ty = y.shape[1]
    lane = jnp.arange(LANE)[None, None, :]

    # ----- encoder inputs: hoisted input-gate slab x@W_i+b_i, gate chunks of
    # 128 lanes with fwd in [0:32) and (time-flipped) bwd in [32:64) -----------
    xe = jnp.take(params["emb_src"], x, axis=0)            # (B,Tx,E); dropout=id
    xg = (jnp.einsum('bte,eg->btg', xe, params["enc_wi_f"])
          + jnp.einsum('bte,eg->btg', jnp.flip(xe, axis=1), params["enc_wi_b"])
          + params["enc_bi"])                              # (B,Tx,384)
    xg = jnp.transpose(xg, (1, 0, 2))                      # time-major (Tx,B,384)

    xmask = (jnp.arange(Tx)[None, :] < x_lengths[:, None]).astype(jnp.float32)
    mf = xmask.T[:, :, None]                               # (Tx,B,1) fwd mask
    mb = jnp.flip(xmask, axis=1).T[:, :, None]             # flipped (bwd) mask
    xm = jnp.where(lane < ENC_H, mf, mb)                   # (Tx,B,128) lane-dense

    # ----- decoder inputs ------------------------------------------------------
    ye = jnp.take(params["emb_tgt"], y, axis=0)            # (B,Ty,E); dropout=id
    yg = jnp.einsum('bte,eg->btg', ye, params["dec_wi"]) + params["dec_bi"]
    yg = jnp.transpose(yg, (1, 0, 2))                      # (Ty,B,384)
    ymask = (jnp.arange(Ty)[None, :] < y_lengths[:, None]).astype(jnp.float32)
    ym = jnp.broadcast_to(ymask.T[:, :, None], (Ty, B, LANE))
    valid = xmask[:, None, :] * ymask[:, :, None]          # (B,Ty,Tx)

    logp_pad, attn = seq2seq_pallas(xg, xm, yg, ym, valid, params)
    return logp_pad[:, :, :V_TGT], attn


# ----------------------------- parameter packing ------------------------------
def _pack_gate_cols(w, h, col_off, rows=None, row_off=0):
    """(in, 3h) -> (rows, 3*128): gate g payload at cols [g*128+col_off, +h)."""
    in_dim = w.shape[0]
    rows = in_dim if rows is None else rows
    out = jnp.zeros((rows, G3), jnp.float32)
    for g in range(3):
        out = out.at[row_off:row_off + in_dim,
                     g * LANE + col_off:g * LANE + col_off + h].set(
                         w[:, g * h:(g + 1) * h])
    return out


def _pad2(w, rows=LANE, cols=LANE):
    return jnp.pad(w, ((0, rows - w.shape[0]), (0, cols - w.shape[1])))


def init_params(key):
    ks = jax.random.split(key, 20)
    s = 0.1

    def rnd(k, shape):
        return jax.random.normal(k, shape, jnp.float32) * s

    H = ENC_H
    # ---- raw (PyTorch-layout) weights ----
    emb_src = rnd(ks[0], (V_SRC, EMB))
    emb_tgt = rnd(ks[1], (V_TGT, EMB))
    enc_wi = [rnd(ks[2], (EMB, 3 * H)), rnd(ks[3], (EMB, 3 * H))]   # fwd, bwd
    enc_wh = [rnd(ks[4], (H, 3 * H)), rnd(ks[5], (H, 3 * H))]
    enc_bi = [rnd(ks[6], (1, 3 * H)), rnd(ks[7], (1, 3 * H))]
    enc_bh = [rnd(ks[8], (1, 3 * H)), rnd(ks[9], (1, 3 * H))]
    enc_fc_w = rnd(ks[10], (CTX, DEC_H))
    enc_fc_b = rnd(ks[11], (1, DEC_H))
    dec_wi = rnd(ks[12], (EMB, 3 * DEC_H))
    dec_wh = rnd(ks[13], (DEC_H, 3 * DEC_H))
    dec_bi = rnd(ks[14], (1, 3 * DEC_H))
    dec_bh = rnd(ks[15], (1, 3 * DEC_H))
    attn_in_w = rnd(ks[16], (CTX, DEC_H))
    attn_out_wc = rnd(ks[17], (CTX, DEC_H))
    attn_out_wd = rnd(ks[18], (DEC_H, DEC_H))
    attn_out_b = jnp.zeros((1, DEC_H), jnp.float32)
    out_w = rnd(ks[19], (DEC_H, V_TGT))
    out_b = jnp.zeros((1, V_TGT), jnp.float32)

    # ---- kernel layout: 128-lane gate chunks, fwd lanes [0:32), bwd [32:64) --
    enc_wh_p = (_pack_gate_cols(enc_wh[0], H, 0, rows=LANE, row_off=0)
                + _pack_gate_cols(enc_wh[1], H, H, rows=LANE, row_off=H))
    dec_wh_p = _pack_gate_cols(dec_wh, DEC_H, 0, rows=LANE, row_off=0)

    # -1e30 pad-lane bias keeps padded vocab logits out of the log-softmax
    # (fp32 only; do not move the output head to bf16).
    out_b_pad = jnp.concatenate(
        [out_b, jnp.full((1, V_PAD - V_TGT), -1e30, jnp.float32)], axis=-1)

    return {
        "emb_src": emb_src, "emb_tgt": emb_tgt,
        "enc_wi_f": _pack_gate_cols(enc_wi[0], H, 0),
        "enc_wi_b": _pack_gate_cols(enc_wi[1], H, H),
        "enc_bi": _pack_gate_cols(enc_bi[0], H, 0) + _pack_gate_cols(enc_bi[1], H, H),
        "enc_wh": enc_wh_p.astype(jnp.bfloat16),          # bf16 recurrent matmul
        "enc_bh": _pack_gate_cols(enc_bh[0], H, 0) + _pack_gate_cols(enc_bh[1], H, H),
        "enc_fc_w": _pad2(enc_fc_w), "enc_fc_b": _pad2(enc_fc_b, rows=1),
        "dec_wi": _pack_gate_cols(dec_wi, DEC_H, 0),
        "dec_bi": _pack_gate_cols(dec_bi, DEC_H, 0),
        "dec_wh": dec_wh_p.astype(jnp.bfloat16),
        "dec_bh": _pack_gate_cols(dec_bh, DEC_H, 0),
        "attn_in_w": _pad2(attn_in_w),
        "attn_out_wc": _pad2(attn_out_wc),
        "attn_out_wd": _pad2(attn_out_wd),
        "attn_out_b": _pad2(attn_out_b, rows=1),
        "out_w": _pad2(out_w),
        "out_b": out_b_pad,
    }


# ----------------------------- main --------------------------------------------
if __name__ == "__main__":
    key = jax.random.PRNGKey(0)
    pkey, xkey, ykey = jax.random.split(key, 3)
    params = init_params(pkey)

    B, Tx, Ty = 2, 8, 8
    x = jax.random.randint(xkey, (B, Tx), 0, V_SRC, dtype=jnp.int32)
    y = jax.random.randint(ykey, (B, Ty), 0, V_TGT, dtype=jnp.int32)
    x_lengths = jnp.array([8, 5], dtype=jnp.int32)
    y_lengths = jnp.array([8, 6], dtype=jnp.int32)

    fwd = jax.jit(seq2seq_forward)
    output, atten = fwd(params, x, x_lengths, y, y_lengths)
    jax.block_until_ready((output, atten))

    assert output.shape == (B, Ty, V_TGT)
    assert atten.shape == (B, Ty, Tx)
    # log-softmax rows sum to 1 in prob space; attention rows sum to 1.
    assert jnp.allclose(jnp.exp(output).sum(-1), 1.0, atol=1e-4)
    assert jnp.allclose(atten.sum(-1), 1.0, atol=1e-4)
    print("KERNEL_OK")
</pallas_src>

<mosaic_0001>
module attributes {stable_mosaic.version = 11 : i64} {
  func.func @seq2seq_kernel(%arg0: memref<8x2x384xf32, #tpu.memory_space<vmem>>, %arg1: memref<8x2x128xf32, #tpu.memory_space<vmem>>, %arg2: memref<128x384xbf16, #tpu.memory_space<vmem>>, %arg3: memref<1x384xf32, #tpu.memory_space<vmem>>, %arg4: memref<128x128xf32, #tpu.memory_space<vmem>>, %arg5: memref<1x128xf32, #tpu.memory_space<vmem>>, %arg6: memref<8x2x384xf32, #tpu.memory_space<vmem>>, %arg7: memref<8x2x128xf32, #tpu.memory_space<vmem>>, %arg8: memref<2x8x8xf32, #tpu.memory_space<vmem>>, %arg9: memref<128x384xbf16, #tpu.memory_space<vmem>>, %arg10: memref<1x384xf32, #tpu.memory_space<vmem>>, %arg11: memref<128x128xf32, #tpu.memory_space<vmem>>, %arg12: memref<128x128xf32, #tpu.memory_space<vmem>>, %arg13: memref<128x128xf32, #tpu.memory_space<vmem>>, %arg14: memref<1x128xf32, #tpu.memory_space<vmem>>, %arg15: memref<128x128xf32, #tpu.memory_space<vmem>>, %arg16: memref<1x128xf32, #tpu.memory_space<vmem>>, %arg17: memref<2x8x128xf32, #tpu.memory_space<vmem>>, %arg18: memref<2x8x8xf32, #tpu.memory_space<vmem>>, %arg19: memref<2x8x128xf32, #tpu.memory_space<vmem>>, %arg20: memref<2x8x128xf32, #tpu.memory_space<vmem>>) attributes {dimension_semantics = [], scalar_prefetch = 0 : i64, scratch_operands = 2 : i64, tpu.core_type = #tpu.core_type<tc>} {
    %c0 = arith.constant 0 : index
    %c0_0 = arith.constant 0 : index
    %0 = vector.load %arg2[%c0, %c0_0] : memref<128x384xbf16, #tpu.memory_space<vmem>>, vector<128x384xbf16>
    %c0_1 = arith.constant 0 : index
    %c0_2 = arith.constant 0 : index
    %1 = vector.load %arg3[%c0_1, %c0_2] : memref<1x384xf32, #tpu.memory_space<vmem>>, vector<1x384xf32>
    %cst = arith.constant 0.000000e+00 : f32
    %2 = vector.broadcast %cst : f32 to vector<2x128xf32>
    %c0_3 = arith.constant 0 : index
    %c0_4 = arith.constant 0 : index
    %c0_5 = arith.constant 0 : index
    %3 = vector.load %arg0[%c0_3, %c0_4, %c0_5] : memref<8x2x384xf32, #tpu.memory_space<vmem>>, vector<1x2x384xf32>
    %4 = vector.shape_cast %3 : vector<1x2x384xf32> to vector<2x384xf32>
    %c0_6 = arith.constant 0 : index
    %c0_7 = arith.constant 0 : index
    %c0_8 = arith.constant 0 : index
    %5 = vector.load %arg1[%c0_6, %c0_7, %c0_8] : memref<8x2x128xf32, #tpu.memory_space<vmem>>, vector<1x2x128xf32>
    %6 = vector.shape_cast %5 : vector<1x2x128xf32> to vector<2x128xf32>
    %7 = arith.truncf %2 : vector<2x128xf32> to vector<2x128xbf16>
    %cst_9 = arith.constant dense<0.000000e+00> : vector<2x384xf32>
    %8 = tpu.matmul %7, %0, %cst_9 {dimension_numbers = #tpu.dot_dimension_numbers<[1], [0], [0], [1], [0, 0, 1, 1], [], []>} : vector<2x128xbf16>, vector<128x384xbf16>, vector<2x384xf32> -> vector<2x384xf32>
    %9 = vector.broadcast %1 : vector<1x384xf32> to vector<2x384xf32>
    %10 = arith.addf %8, %9 : vector<2x384xf32>
    %11 = vector.extract_strided_slice %4 {offsets = [0, 0], sizes = [2, 128], strides = [1, 1]} : vector<2x384xf32> to vector<2x128xf32>
    %12 = vector.extract_strided_slice %10 {offsets = [0, 0], sizes = [2, 128], strides = [1, 1]} : vector<2x384xf32> to vector<2x128xf32>
    %13 = arith.addf %11, %12 : vector<2x128xf32>
    %14 = arith.negf %13 : vector<2x128xf32>
    %15 = math.exp %14 : vector<2x128xf32>
    %cst_10 = arith.constant 1.000000e+00 : f32
    %16 = vector.broadcast %cst_10 : f32 to vector<2x128xf32>
    %17 = arith.addf %16, %15 : vector<2x128xf32>
    %18 = arith.divf %16, %17 : vector<2x128xf32>
    %19 = vector.extract_strided_slice %4 {offsets = [0, 128], sizes = [2, 128], strides = [1, 1]} : vector<2x384xf32> to vector<2x128xf32>
    %20 = vector.extract_strided_slice %10 {offsets = [0, 128], sizes = [2, 128], strides = [1, 1]} : vector<2x384xf32> to vector<2x128xf32>
    %21 = arith.addf %19, %20 : vector<2x128xf32>
    %22 = arith.negf %21 : vector<2x128xf32>
    %23 = math.exp %22 : vector<2x128xf32>
    %cst_11 = arith.constant 1.000000e+00 : f32
    %24 = vector.broadcast %cst_11 : f32 to vector<2x128xf32>
    %25 = arith.addf %24, %23 : vector<2x128xf32>
    %26 = arith.divf %24, %25 : vector<2x128xf32>
    %27 = vector.extract_strided_slice %4 {offsets = [0, 256], sizes = [2, 128], strides = [1, 1]} : vector<2x384xf32> to vector<2x128xf32>
    %28 = vector.extract_strided_slice %10 {offsets = [0, 256], sizes = [2, 128], strides = [1, 1]} : vector<2x384xf32> to vector<2x128xf32>
    %29 = arith.mulf %18, %28 : vector<2x128xf32>
    %30 = arith.addf %27, %29 : vector<2x128xf32>
    %31 = math.tanh %30 : vector<2x128xf32>
    %cst_12 = arith.constant 1.000000e+00 : f32
    %32 = vector.broadcast %cst_12 : f32 to vector<2x128xf32>
    %33 = arith.subf %32, %26 : vector<2x128xf32>
    %34 = arith.mulf %33, %31 : vector<2x128xf32>
    %35 = arith.mulf %26, %2 : vector<2x128xf32>
    %36 = arith.addf %34, %35 : vector<2x128xf32>
    %37 = arith.mulf %6, %36 : vector<2x128xf32>
    %cst_13 = arith.constant 1.000000e+00 : f32
    %38 = vector.broadcast %cst_13 : f32 to vector<2x128xf32>
    %39 = arith.subf %38, %6 : vector<2x128xf32>
    %40 = arith.mulf %39, %2 : vector<2x128xf32>
    %41 = arith.addf %37, %40 : vector<2x128xf32>
    %42 = arith.mulf %6, %36 : vector<2x128xf32>
    %c1 = arith.constant 1 : index
    %c0_14 = arith.constant 0 : index
    %c0_15 = arith.constant 0 : index
    %43 = vector.load %arg0[%c1, %c0_14, %c0_15] : memref<8x2x384xf32, #tpu.memory_space<vmem>>, vector<1x2x384xf32>
    %44 = vector.shape_cast %43 : vector<1x2x384xf32> to vector<2x384xf32>
    %c1_16 = arith.constant 1 : index
    %c0_17 = arith.constant 0 : index
    %c0_18 = arith.constant 0 : index
    %45 = vector.load %arg1[%c1_16, %c0_17, %c0_18] : memref<8x2x128xf32, #tpu.memory_space<vmem>>, vector<1x2x128xf32>
    %46 = vector.shape_cast %45 : vector<1x2x128xf32> to vector<2x128xf32>
    %47 = arith.truncf %41 : vector<2x128xf32> to vector<2x128xbf16>
    %cst_19 = arith.constant dense<0.000000e+00> : vector<2x384xf32>
    %48 = tpu.matmul %47, %0, %cst_19 {dimension_numbers = #tpu.dot_dimension_numbers<[1], [0], [0], [1], [0, 0, 1, 1], [], []>} : vector<2x128xbf16>, vector<128x384xbf16>, vector<2x384xf32> -> vector<2x384xf32>
    %49 = vector.broadcast %1 : vector<1x384xf32> to vector<2x384xf32>
    %50 = arith.addf %48, %49 : vector<2x384xf32>
    %51 = vector.extract_strided_slice %44 {offsets = [0, 0], sizes = [2, 128], strides = [1, 1]} : vector<2x384xf32> to vector<2x128xf32>
    %52 = vector.extract_strided_slice %50 {offsets = [0, 0], sizes = [2, 128], strides = [1, 1]} : vector<2x384xf32> to vector<2x128xf32>
    %53 = arith.addf %51, %52 : vector<2x128xf32>
    %54 = arith.negf %53 : vector<2x128xf32>
    %55 = math.exp %54 : vector<2x128xf32>
    %cst_20 = arith.constant 1.000000e+00 : f32
    %56 = vector.broadcast %cst_20 : f32 to vector<2x128xf32>
    %57 = arith.addf %56, %55 : vector<2x128xf32>
    %58 = arith.divf %56, %57 : vector<2x128xf32>
    %59 = vector.extract_strided_slice %44 {offsets = [0, 128], sizes = [2, 128], strides = [1, 1]} : vector<2x384xf32> to vector<2x128xf32>
    %60 = vector.extract_strided_slice %50 {offsets = [0, 128], sizes = [2, 128], strides = [1, 1]} : vector<2x384xf32> to vector<2x128xf32>
    %61 = arith.addf %59, %60 : vector<2x128xf32>
    %62 = arith.negf %61 : vector<2x128xf32>
    %63 = math.exp %62 : vector<2x128xf32>
    %cst_21 = arith.constant 1.000000e+00 : f32
    %64 = vector.broadcast %cst_21 : f32 to vector<2x128xf32>
    %65 = arith.addf %64, %63 : vector<2x128xf32>
    %66 = arith.divf %64, %65 : vector<2x128xf32>
    %67 = vector.extract_strided_slice %44 {offsets = [0, 256], sizes = [2, 128], strides = [1, 1]} : vector<2x384xf32> to vector<2x128xf32>
    %68 = vector.extract_strided_slice %50 {offsets = [0, 256], sizes = [2, 128], strides = [1, 1]} : vector<2x384xf32> to vector<2x128xf32>
    %69 = arith.mulf %58, %68 : vector<2x128xf32>
    %70 = arith.addf %67, %69 : vector<2x128xf32>
    %71 = math.tanh %70 : vector<2x128xf32>
    %cst_22 = arith.constant 1.000000e+00 : f32
    %72 = vector.broadcast %cst_22 : f32 to vector<2x128xf32>
    %73 = arith.subf %72, %66 : vector<2x128xf32>
    %74 = arith.mulf %73, %71 : vector<2x128xf32>
    %75 = arith.mulf %66, %41 : vector<2x128xf32>
    %76 = arith.addf %74, %75 : vector<2x128xf32>
    %77 = arith.mulf %46, %76 : vector<2x128xf32>
    %cst_23 = arith.constant 1.000000e+00 : f32
    %78 = vector.broadcast %cst_23 : f32 to vector<2x128xf32>
    %79 = arith.subf %78, %46 : vector<2x128xf32>
    %80 = arith.mulf %79, %41 : vector<2x128xf32>
    %81 = arith.addf %77, %80 : vector<2x128xf32>
    %82 = arith.mulf %46, %76 : vector<2x128xf32>
    %c2 = arith.constant 2 : index
    %c0_24 = arith.constant 0 : index
    %c0_25 = arith.constant 0 : index
    %83 = vector.load %arg0[%c2, %c0_24, %c0_25] : memref<8x2x384xf32, #tpu.memory_space<vmem>>, vector<1x2x384xf32>
    %84 = vector.shape_cast %83 : vector<1x2x384xf32> to vector<2x384xf32>
    %c2_26 = arith.constant 2 : index
    %c0_27 = arith.constant 0 : index
    %c0_28 = arith.constant 0 : index
    %85 = vector.load %arg1[%c2_26, %c0_27, %c0_28] : memref<8x2x128xf32, #tpu.memory_space<vmem>>, vector<1x2x128xf32>
    %86 = vector.shape_cast %85 : vector<1x2x128xf32> to vector<2x128xf32>
    %87 = arith.truncf %81 : vector<2x128xf32> to vector<2x128xbf16>
    %cst_29 = arith.constant dense<0.000000e+00> : vector<2x384xf32>
    %88 = tpu.matmul %87, %0, %cst_29 {dimension_numbers = #tpu.dot_dimension_numbers<[1], [0], [0], [1], [0, 0, 1, 1], [], []>} : vector<2x128xbf16>, vector<128x384xbf16>, vector<2x384xf32> -> vector<2x384xf32>
    %89 = vector.broadcast %1 : vector<1x384xf32> to vector<2x384xf32>
    %90 = arith.addf %88, %89 : vector<2x384xf32>
    %91 = vector.extract_strided_slice %84 {offsets = [0, 0], sizes = [2, 128], strides = [1, 1]} : vector<2x384xf32> to vector<2x128xf32>
    %92 = vector.extract_strided_slice %90 {offsets = [0, 0], sizes = [2, 128], strides = [1, 1]} : vector<2x384xf32> to vector<2x128xf32>
    %93 = arith.addf %91, %92 : vector<2x128xf32>
    %94 = arith.negf %93 : vector<2x128xf32>
    %95 = math.exp %94 : vector<2x128xf32>
    %cst_30 = arith.constant 1.000000e+00 : f32
    %96 = vector.broadcast %cst_30 : f32 to vector<2x128xf32>
    %97 = arith.addf %96, %95 : vector<2x128xf32>
    %98 = arith.divf %96, %97 : vector<2x128xf32>
    %99 = vector.extract_strided_slice %84 {offsets = [0, 128], sizes = [2, 128], strides = [1, 1]} : vector<2x384xf32> to vector<2x128xf32>
    %100 = vector.extract_strided_slice %90 {offsets = [0, 128], sizes = [2, 128], strides = [1, 1]} : vector<2x384xf32> to vector<2x128xf32>
    %101 = arith.addf %99, %100 : vector<2x128xf32>
    %102 = arith.negf %101 : vector<2x128xf32>
    %103 = math.exp %102 : vector<2x128xf32>
    %cst_31 = arith.constant 1.000000e+00 : f32
    %104 = vector.broadcast %cst_31 : f32 to vector<2x128xf32>
    %105 = arith.addf %104, %103 : vector<2x128xf32>
    %106 = arith.divf %104, %105 : vector<2x128xf32>
    %107 = vector.extract_strided_slice %84 {offsets = [0, 256], sizes = [2, 128], strides = [1, 1]} : vector<2x384xf32> to vector<2x128xf32>
    %108 = vector.extract_strided_slice %90 {offsets = [0, 256], sizes = [2, 128], strides = [1, 1]} : vector<2x384xf32> to vector<2x128xf32>
    %109 = arith.mulf %98, %108 : vector<2x128xf32>
    %110 = arith.addf %107, %109 : vector<2x128xf32>
    %111 = math.tanh %110 : vector<2x128xf32>
    %cst_32 = arith.constant 1.000000e+00 : f32
    %112 = vector.broadcast %cst_32 : f32 to vector<2x128xf32>
    %113 = arith.subf %112, %106 : vector<2x128xf32>
    %114 = arith.mulf %113, %111 : vector<2x128xf32>
    %115 = arith.mulf %106, %81 : vector<2x128xf32>
    %116 = arith.addf %114, %115 : vector<2x128xf32>
    %117 = arith.mulf %86, %116 : vector<2x128xf32>
    %cst_33 = arith.constant 1.000000e+00 : f32
    %118 = vector.broadcast %cst_33 : f32 to vector<2x128xf32>
    %119 = arith.subf %118, %86 : vector<2x128xf32>
    %120 = arith.mulf %119, %81 : vector<2x128xf32>
    %121 = arith.addf %117, %120 : vector<2x128xf32>
    %122 = arith.mulf %86, %116 : vector<2x128xf32>
    %c3 = arith.constant 3 : index
    %c0_34 = arith.constant 0 : index
    %c0_35 = arith.constant 0 : index
    %123 = vector.load %arg0[%c3, %c0_34, %c0_35] : memref<8x2x384xf32, #tpu.memory_space<vmem>>, vector<1x2x384xf32>
    %124 = vector.shape_cast %123 : vector<1x2x384xf32> to vector<2x384xf32>
    %c3_36 = arith.constant 3 : index
    %c0_37 = arith.constant 0 : index
    %c0_38 = arith.constant 0 : index
    %125 = vector.load %arg1[%c3_36, %c0_37, %c0_38] : memref<8x2x128xf32, #tpu.memory_space<vmem>>, vector<1x2x128xf32>
    %126 = vector.shape_cast %125 : vector<1x2x128xf32> to vector<2x128xf32>
    %127 = arith.truncf %121 : vector<2x128xf32> to vector<2x128xbf16>
    %cst_39 = arith.constant dense<0.000000e+00> : vector<2x384xf32>
    %128 = tpu.matmul %127, %0, %cst_39 {dimension_numbers = #tpu.dot_dimension_numbers<[1], [0], [0], [1], [0, 0, 1, 1], [], []>} : vector<2x128xbf16>, vector<128x384xbf16>, vector<2x384xf32> -> vector<2x384xf32>
    %129 = vector.broadcast %1 : vector<1x384xf32> to vector<2x384xf32>
    %130 = arith.addf %128, %129 : vector<2x384xf32>
    %131 = vector.extract_strided_slice %124 {offsets = [0, 0], sizes = [2, 128], strides = [1, 1]} : vector<2x384xf32> to vector<2x128xf32>
    %132 = vector.extract_strided_slice %130 {offsets = [0, 0], sizes = [2, 128], strides = [1, 1]} : vector<2x384xf32> to vector<2x128xf32>
    %133 = arith.addf %131, %132 : vector<2x128xf32>
    %134 = arith.negf %133 : vector<2x128xf32>
    %135 = math.exp %134 : vector<2x128xf32>
    %cst_40 = arith.constant 1.000000e+00 : f32
    %136 = vector.broadcast %cst_40 : f32 to vector<2x128xf32>
    %137 = arith.addf %136, %135 : vector<2x128xf32>
    %138 = arith.divf %136, %137 : vector<2x128xf32>
    %139 = vector.extract_strided_slice %124 {offsets = [0, 128], sizes = [2, 128], strides = [1, 1]} : vector<2x384xf32> to vector<2x128xf32>
    %140 = vector.extract_strided_slice %130 {offsets = [0, 128], sizes = [2, 128], strides = [1, 1]} : vector<2x384xf32> to vector<2x128xf32>
    %141 = arith.addf %139, %140 : vector<2x128xf32>
    %142 = arith.negf %141 : vector<2x128xf32>
    %143 = math.exp %142 : vector<2x128xf32>
    %cst_41 = arith.constant 1.000000e+00 : f32
    %144 = vector.broadcast %cst_41 : f32 to vector<2x128xf32>
    %145 = arith.addf %144, %143 : vector<2x128xf32>
    %146 = arith.divf %144, %145 : vector<2x128xf32>
    %147 = vector.extract_strided_slice %124 {offsets = [0, 256], sizes = [2, 128], strides = [1, 1]} : vector<2x384xf32> to vector<2x128xf32>
    %148 = vector.extract_strided_slice %130 {offsets = [0, 256], sizes = [2, 128], strides = [1, 1]} : vector<2x384xf32> to vector<2x128xf32>
    %149 = arith.mulf %138, %148 : vector<2x128xf32>
    %150 = arith.addf %147, %149 : vector<2x128xf32>
    %151 = math.tanh %150 : vector<2x128xf32>
    %cst_42 = arith.constant 1.000000e+00 : f32
    %152 = vector.broadcast %cst_42 : f32 to vector<2x128xf32>
    %153 = arith.subf %152, %146 : vector<2x128xf32>
    %154 = arith.mulf %153, %151 : vector<2x128xf32>
    %155 = arith.mulf %146, %121 : vector<2x128xf32>
    %156 = arith.addf %154, %155 : vector<2x128xf32>
    %157 = arith.mulf %126, %156 : vector<2x128xf32>
    %cst_43 = arith.constant 1.000000e+00 : f32
    %158 = vector.broadcast %cst_43 : f32 to vector<2x128xf32>
    %159 = arith.subf %158, %126 : vector<2x128xf32>
    %160 = arith.mulf %159, %121 : vector<2x128xf32>
    %161 = arith.addf %157, %160 : vector<2x128xf32>
    %162 = arith.mulf %126, %156 : vector<2x128xf32>
    %c4 = arith.constant 4 : index
    %c0_44 = arith.constant 0 : index
    %c0_45 = arith.constant 0 : index
    %163 = vector.load %arg0[%c4, %c0_44, %c0_45] : memref<8x2x384xf32, #tpu.memory_space<vmem>>, vector<1x2x384xf32>
    %164 = vector.shape_cast %163 : vector<1x2x384xf32> to vector<2x384xf32>
    %c4_46 = arith.constant 4 : index
    %c0_47 = arith.constant 0 : index
    %c0_48 = arith.constant 0 : index
    %165 = vector.load %arg1[%c4_46, %c0_47, %c0_48] : memref<8x2x128xf32, #tpu.memory_space<vmem>>, vector<1x2x128xf32>
    %166 = vector.shape_cast %165 : vector<1x2x128xf32> to vector<2x128xf32>
    %167 = arith.truncf %161 : vector<2x128xf32> to vector<2x128xbf16>
    %cst_49 = arith.constant dense<0.000000e+00> : vector<2x384xf32>
    %168 = tpu.matmul %167, %0, %cst_49 {dimension_numbers = #tpu.dot_dimension_numbers<[1], [0], [0], [1], [0, 0, 1, 1], [], []>} : vector<2x128xbf16>, vector<128x384xbf16>, vector<2x384xf32> -> vector<2x384xf32>
    %169 = vector.broadcast %1 : vector<1x384xf32> to vector<2x384xf32>
    %170 = arith.addf %168, %169 : vector<2x384xf32>
    %171 = vector.extract_strided_slice %164 {offsets = [0, 0], sizes = [2, 128], strides = [1, 1]} : vector<2x384xf32> to vector<2x128xf32>
    %172 = vector.extract_strided_slice %170 {offsets = [0, 0], sizes = [2, 128], strides = [1, 1]} : vector<2x384xf32> to vector<2x128xf32>
    %173 = arith.addf %171, %172 : vector<2x128xf32>
    %174 = arith.negf %173 : vector<2x128xf32>
    %175 = math.exp %174 : vector<2x128xf32>
    %cst_50 = arith.constant 1.000000e+00 : f32
    %176 = vector.broadcast %cst_50 : f32 to vector<2x128xf32>
    %177 = arith.addf %176, %175 : vector<2x128xf32>
    %178 = arith.divf %176, %177 : vector<2x128xf32>
    %179 = vector.extract_strided_slice %164 {offsets = [0, 128], sizes = [2, 128], strides = [1, 1]} : vector<2x384xf32> to vector<2x128xf32>
    %180 = vector.extract_strided_slice %170 {offsets = [0, 128], sizes = [2, 128], strides = [1, 1]} : vector<2x384xf32> to vector<2x128xf32>
    %181 = arith.addf %179, %180 : vector<2x128xf32>
    %182 = arith.negf %181 : vector<2x128xf32>
    %183 = math.exp %182 : vector<2x128xf32>
    %cst_51 = arith.constant 1.000000e+00 : f32
    %184 = vector.broadcast %cst_51 : f32 to vector<2x128xf32>
    %185 = arith.addf %184, %183 : vector<2x128xf32>
    %186 = arith.divf %184, %185 : vector<2x128xf32>
    %187 = vector.extract_strided_slice %164 {offsets = [0, 256], sizes = [2, 128], strides = [1, 1]} : vector<2x384xf32> to vector<2x128xf32>
    %188 = vector.extract_strided_slice %170 {offsets = [0, 256], sizes = [2, 128], strides = [1, 1]} : vector<2x384xf32> to vector<2x128xf32>
    %189 = arith.mulf %178, %188 : vector<2x128xf32>
    %190 = arith.addf %187, %189 : vector<2x128xf32>
    %191 = math.tanh %190 : vector<2x128xf32>
    %cst_52 = arith.constant 1.000000e+00 : f32
    %192 = vector.broadcast %cst_52 : f32 to vector<2x128xf32>
    %193 = arith.subf %192, %186 : vector<2x128xf32>
    %194 = arith.mulf %193, %191 : vector<2x128xf32>
    %195 = arith.mulf %186, %161 : vector<2x128xf32>
    %196 = arith.addf %194, %195 : vector<2x128xf32>
    %197 = arith.mulf %166, %196 : vector<2x128xf32>
    %cst_53 = arith.constant 1.000000e+00 : f32
    %198 = vector.broadcast %cst_53 : f32 to vector<2x128xf32>
    %199 = arith.subf %198, %166 : vector<2x128xf32>
    %200 = arith.mulf %199, %161 : vector<2x128xf32>
    %201 = arith.addf %197, %200 : vector<2x128xf32>
    %202 = arith.mulf %166, %196 : vector<2x128xf32>
    %c5 = arith.constant 5 : index
    %c0_54 = arith.constant 0 : index
    %c0_55 = arith.constant 0 : index
    %203 = vector.load %arg0[%c5, %c0_54, %c0_55] : memref<8x2x384xf32, #tpu.memory_space<vmem>>, vector<1x2x384xf32>
    %204 = vector.shape_cast %203 : vector<1x2x384xf32> to vector<2x384xf32>
    %c5_56 = arith.constant 5 : index
    %c0_57 = arith.constant 0 : index
    %c0_58 = arith.constant 0 : index
    %205 = vector.load %arg1[%c5_56, %c0_57, %c0_58] : memref<8x2x128xf32, #tpu.memory_space<vmem>>, vector<1x2x128xf32>
    %206 = vector.shape_cast %205 : vector<1x2x128xf32> to vector<2x128xf32>
    %207 = arith.truncf %201 : vector<2x128xf32> to vector<2x128xbf16>
    %cst_59 = arith.constant dense<0.000000e+00> : vector<2x384xf32>
    %208 = tpu.matmul %207, %0, %cst_59 {dimension_numbers = #tpu.dot_dimension_numbers<[1], [0], [0], [1], [0, 0, 1, 1], [], []>} : vector<2x128xbf16>, vector<128x384xbf16>, vector<2x384xf32> -> vector<2x384xf32>
    %209 = vector.broadcast %1 : vector<1x384xf32> to vector<2x384xf32>
    %210 = arith.addf %208, %209 : vector<2x384xf32>
    %211 = vector.extract_strided_slice %204 {offsets = [0, 0], sizes = [2, 128], strides = [1, 1]} : vector<2x384xf32> to vector<2x128xf32>
    %212 = vector.extract_strided_slice %210 {offsets = [0, 0], sizes = [2, 128], strides = [1, 1]} : vector<2x384xf32> to vector<2x128xf32>
    %213 = arith.addf %211, %212 : vector<2x128xf32>
    %214 = arith.negf %213 : vector<2x128xf32>
    %215 = math.exp %214 : vector<2x128xf32>
    %cst_60 = arith.constant 1.000000e+00 : f32
    %216 = vector.broadcast %cst_60 : f32 to vector<2x128xf32>
    %217 = arith.addf %216, %215 : vector<2x128xf32>
    %218 = arith.divf %216, %217 : vector<2x128xf32>
    %219 = vector.extract_strided_slice %204 {offsets = [0, 128], sizes = [2, 128], strides = [1, 1]} : vector<2x384xf32> to vector<2x128xf32>
    %220 = vector.extract_strided_slice %210 {offsets = [0, 128], sizes = [2, 128], strides = [1, 1]} : vector<2x384xf32> to vector<2x128xf32>
    %221 = arith.addf %219, %220 : vector<2x128xf32>
    %222 = arith.negf %221 : vector<2x128xf32>
    %223 = math.exp %222 : vector<2x128xf32>
    %cst_61 = arith.constant 1.000000e+00 : f32
    %224 = vector.broadcast %cst_61 : f32 to vector<2x128xf32>
    %225 = arith.addf %224, %223 : vector<2x128xf32>
    %226 = arith.divf %224, %225 : vector<2x128xf32>
    %227 = vector.extract_strided_slice %204 {offsets = [0, 256], sizes = [2, 128], strides = [1, 1]} : vector<2x384xf32> to vector<2x128xf32>
    %228 = vector.extract_strided_slice %210 {offsets = [0, 256], sizes = [2, 128], strides = [1, 1]} : vector<2x384xf32> to vector<2x128xf32>
    %229 = arith.mulf %218, %228 : vector<2x128xf32>
    %230 = arith.addf %227, %229 : vector<2x128xf32>
    %231 = math.tanh %230 : vector<2x128xf32>
    %cst_62 = arith.constant 1.000000e+00 : f32
    %232 = vector.broadcast %cst_62 : f32 to vector<2x128xf32>
    %233 = arith.subf %232, %226 : vector<2x128xf32>
    %234 = arith.mulf %233, %231 : vector<2x128xf32>
    %235 = arith.mulf %226, %201 : vector<2x128xf32>
    %236 = arith.addf %234, %235 : vector<2x128xf32>
    %237 = arith.mulf %206, %236 : vector<2x128xf32>
    %cst_63 = arith.constant 1.000000e+00 : f32
    %238 = vector.broadcast %cst_63 : f32 to vector<2x128xf32>
    %239 = arith.subf %238, %206 : vector<2x128xf32>
    %240 = arith.mulf %239, %201 : vector<2x128xf32>
    %241 = arith.addf %237, %240 : vector<2x128xf32>
    %242 = arith.mulf %206, %236 : vector<2x128xf32>
    %c6 = arith.constant 6 : index
    %c0_64 = arith.constant 0 : index
    %c0_65 = arith.constant 0 : index
    %243 = vector.load %arg0[%c6, %c0_64, %c0_65] : memref<8x2x384xf32, #tpu.memory_space<vmem>>, vector<1x2x384xf32>
    %244 = vector.shape_cast %243 : vector<1x2x384xf32> to vector<2x384xf32>
    %c6_66 = arith.constant 6 : index
    %c0_67 = arith.constant 0 : index
    %c0_68 = arith.constant 0 : index
    %245 = vector.load %arg1[%c6_66, %c0_67, %c0_68] : memref<8x2x128xf32, #tpu.memory_space<vmem>>, vector<1x2x128xf32>
    %246 = vector.shape_cast %245 : vector<1x2x128xf32> to vector<2x128xf32>
    %247 = arith.truncf %241 : vector<2x128xf32> to vector<2x128xbf16>
    %cst_69 = arith.constant dense<0.000000e+00> : vector<2x384xf32>
    %248 = tpu.matmul %247, %0, %cst_69 {dimension_numbers = #tpu.dot_dimension_numbers<[1], [0], [0], [1], [0, 0, 1, 1], [], []>} : vector<2x128xbf16>, vector<128x384xbf16>, vector<2x384xf32> -> vector<2x384xf32>
    %249 = vector.broadcast %1 : vector<1x384xf32> to vector<2x384xf32>
    %250 = arith.addf %248, %249 : vector<2x384xf32>
    %251 = vector.extract_strided_slice %244 {offsets = [0, 0], sizes = [2, 128], strides = [1, 1]} : vector<2x384xf32> to vector<2x128xf32>
    %252 = vector.extract_strided_slice %250 {offsets = [0, 0], sizes = [2, 128], strides = [1, 1]} : vector<2x384xf32> to vector<2x128xf32>
    %253 = arith.addf %251, %252 : vector<2x128xf32>
    %254 = arith.negf %253 : vector<2x128xf32>
    %255 = math.exp %254 : vector<2x128xf32>
    %cst_70 = arith.constant 1.000000e+00 : f32
    %256 = vector.broadcast %cst_70 : f32 to vector<2x128xf32>
    %257 = arith.addf %256, %255 : vector<2x128xf32>
    %258 = arith.divf %256, %257 : vector<2x128xf32>
    %259 = vector.extract_strided_slice %244 {offsets = [0, 128], sizes = [2, 128], strides = [1, 1]} : vector<2x384xf32> to vector<2x128xf32>
    %260 = vector.extract_strided_slice %250 {offsets = [0, 128], sizes = [2, 128], strides = [1, 1]} : vector<2x384xf32> to vector<2x128xf32>
    %261 = arith.addf %259, %260 : vector<2x128xf32>
    %262 = arith.negf %261 : vector<2x128xf32>
    %263 = math.exp %262 : vector<2x128xf32>
    %cst_71 = arith.constant 1.000000e+00 : f32
    %264 = vector.broadcast %cst_71 : f32 to vector<2x128xf32>
    %265 = arith.addf %264, %263 : vector<2x128xf32>
    %266 = arith.divf %264, %265 : vector<2x128xf32>
    %267 = vector.extract_strided_slice %244 {offsets = [0, 256], sizes = [2, 128], strides = [1, 1]} : vector<2x384xf32> to vector<2x128xf32>
    %268 = vector.extract_strided_slice %250 {offsets = [0, 256], sizes = [2, 128], strides = [1, 1]} : vector<2x384xf32> to vector<2x128xf32>
    %269 = arith.mulf %258, %268 : vector<2x128xf32>
    %270 = arith.addf %267, %269 : vector<2x128xf32>
    %271 = math.tanh %270 : vector<2x128xf32>
    %cst_72 = arith.constant 1.000000e+00 : f32
    %272 = vector.broadcast %cst_72 : f32 to vector<2x128xf32>
    %273 = arith.subf %272, %266 : vector<2x128xf32>
    %274 = arith.mulf %273, %271 : vector<2x128xf32>
    %275 = arith.mulf %266, %241 : vector<2x128xf32>
    %276 = arith.addf %274, %275 : vector<2x128xf32>
    %277 = arith.mulf %246, %276 : vector<2x128xf32>
    %cst_73 = arith.constant 1.000000e+00 : f32
    %278 = vector.broadcast %cst_73 : f32 to vector<2x128xf32>
    %279 = arith.subf %278, %246 : vector<2x128xf32>
    %280 = arith.mulf %279, %241 : vector<2x128xf32>
    %281 = arith.addf %277, %280 : vector<2x128xf32>
    %282 = arith.mulf %246, %276 : vector<2x128xf32>
    %c7 = arith.constant 7 : index
    %c0_74 = arith.constant 0 : index
    %c0_75 = arith.constant 0 : index
    %283 = vector.load %arg0[%c7, %c0_74, %c0_75] : memref<8x2x384xf32, #tpu.memory_space<vmem>>, vector<1x2x384xf32>
    %284 = vector.shape_cast %283 : vector<1x2x384xf32> to vector<2x384xf32>
    %c7_76 = arith.constant 7 : index
    %c0_77 = arith.constant 0 : index
    %c0_78 = arith.constant 0 : index
    %285 = vector.load %arg1[%c7_76, %c0_77, %c0_78] : memref<8x2x128xf32, #tpu.memory_space<vmem>>, vector<1x2x128xf32>
    %286 = vector.shape_cast %285 : vector<1x2x128xf32> to vector<2x128xf32>
    %287 = arith.truncf %281 : vector<2x128xf32> to vector<2x128xbf16>
    %cst_79 = arith.constant dense<0.000000e+00> : vector<2x384xf32>
    %288 = tpu.matmul %287, %0, %cst_79 {dimension_numbers = #tpu.dot_dimension_numbers<[1], [0], [0], [1], [0, 0, 1, 1], [], []>} : vector<2x128xbf16>, vector<128x384xbf16>, vector<2x384xf32> -> vector<2x384xf32>
    %289 = vector.broadcast %1 : vector<1x384xf32> to vector<2x384xf32>
    %290 = arith.addf %288, %289 : vector<2x384xf32>
    %291 = vector.extract_strided_slice %284 {offsets = [0, 0], sizes = [2, 128], strides = [1, 1]} : vector<2x384xf32> to vector<2x128xf32>
    %292 = vector.extract_strided_slice %290 {offsets = [0, 0], sizes = [2, 128], strides = [1, 1]} : vector<2x384xf32> to vector<2x128xf32>
    %293 = arith.addf %291, %292 : vector<2x128xf32>
    %294 = arith.negf %293 : vector<2x128xf32>
    %295 = math.exp %294 : vector<2x128xf32>
    %cst_80 = arith.constant 1.000000e+00 : f32
    %296 = vector.broadcast %cst_80 : f32 to vector<2x128xf32>
    %297 = arith.addf %296, %295 : vector<2x128xf32>
    %298 = arith.divf %296, %297 : vector<2x128xf32>
    %299 = vector.extract_strided_slice %284 {offsets = [0, 128], sizes = [2, 128], strides = [1, 1]} : vector<2x384xf32> to vector<2x128xf32>
    %300 = vector.extract_strided_slice %290 {offsets = [0, 128], sizes = [2, 128], strides = [1, 1]} : vector<2x384xf32> to vector<2x128xf32>
    %301 = arith.addf %299, %300 : vector<2x128xf32>
    %302 = arith.negf %301 : vector<2x128xf32>
    %303 = math.exp %302 : vector<2x128xf32>
    %cst_81 = arith.constant 1.000000e+00 : f32
    %304 = vector.broadcast %cst_81 : f32 to vector<2x128xf32>
    %305 = arith.addf %304, %303 : vector<2x128xf32>
    %306 = arith.divf %304, %305 : vector<2x128xf32>
    %307 = vector.extract_strided_slice %284 {offsets = [0, 256], sizes = [2, 128], strides = [1, 1]} : vector<2x384xf32> to vector<2x128xf32>
    %308 = vector.extract_strided_slice %290 {offsets = [0, 256], sizes = [2, 128], strides = [1, 1]} : vector<2x384xf32> to vector<2x128xf32>
    %309 = arith.mulf %298, %308 : vector<2x128xf32>
    %310 = arith.addf %307, %309 : vector<2x128xf32>
    %311 = math.tanh %310 : vector<2x128xf32>
    %cst_82 = arith.constant 1.000000e+00 : f32
    %312 = vector.broadcast %cst_82 : f32 to vector<2x128xf32>
    %313 = arith.subf %312, %306 : vector<2x128xf32>
    %314 = arith.mulf %313, %311 : vector<2x128xf32>
    %315 = arith.mulf %306, %281 : vector<2x128xf32>
    %316 = arith.addf %314, %315 : vector<2x128xf32>
    %317 = arith.mulf %286, %316 : vector<2x128xf32>
    %cst_83 = arith.constant 1.000000e+00 : f32
    %318 = vector.broadcast %cst_83 : f32 to vector<2x128xf32>
    %319 = arith.subf %318, %286 : vector<2x128xf32>
    %320 = arith.mulf %319, %281 : vector<2x128xf32>
    %321 = arith.addf %317, %320 : vector<2x128xf32>
    %322 = arith.mulf %286, %316 : vector<2x128xf32>
    %323 = tpu.iota {dimensions = array<i32: 1>} : vector<2x128xi32>
    %c32_i32 = arith.constant 32 : i32
    %324 = vector.broadcast %c32_i32 : i32 to vector<2x128xi32>
    %325 = arith.cmpi slt, %323, %324 : vector<2x128xi32>
    %326 = arith.select %325, %42, %322 : vector<2x128xi1>, vector<2x128xf32>
    %c0_84 = arith.constant 0 : index
    %c0_85 = arith.constant 0 : index
    %c0_86 = arith.constant 0 : index
    %327 = vector.load %arg19[%c0_84, %c0_85, %c0_86] : memref<2x8x128xf32, #tpu.memory_space<vmem>>, vector<2x1x128xf32>
    %328 = vector.shape_cast %327 : vector<2x1x128xf32> to vector<2x128xf32>
    %329 = vector.shape_cast %326 : vector<2x128xf32> to vector<2x1x128xf32>
    tpu.vector_store %arg19[%c0_84, %c0_85, %c0_86], %329 {strides = array<i32>} : memref<2x8x128xf32, #tpu.memory_space<vmem>>, vector<2x1x128xf32>,
    %330 = arith.select %325, %82, %282 : vector<2x128xi1>, vector<2x128xf32>
    %c0_87 = arith.constant 0 : index
    %c1_88 = arith.constant 1 : index
    %c0_89 = arith.constant 0 : index
    %331 = vector.load %arg19[%c0_87, %c1_88, %c0_89] : memref<2x8x128xf32, #tpu.memory_space<vmem>>, vector<2x1x128xf32>
    %332 = vector.shape_cast %331 : vector<2x1x128xf32> to vector<2x128xf32>
    %333 = vector.shape_cast %330 : vector<2x128xf32> to vector<2x1x128xf32>
    tpu.vector_store %arg19[%c0_87, %c1_88, %c0_89], %333 {strides = array<i32>} : memref<2x8x128xf32, #tpu.memory_space<vmem>>, vector<2x1x128xf32>,
    %334 = arith.select %325, %122, %242 : vector<2x128xi1>, vector<2x128xf32>
    %c0_90 = arith.constant 0 : index
    %c2_91 = arith.constant 2 : index
    %c0_92 = arith.constant 0 : index
    %335 = vector.load %arg19[%c0_90, %c2_91, %c0_92] : memref<2x8x128xf32, #tpu.memory_space<vmem>>, vector<2x1x128xf32>
    %336 = vector.shape_cast %335 : vector<2x1x128xf32> to vector<2x128xf32>
    %337 = vector.shape_cast %334 : vector<2x128xf32> to vector<2x1x128xf32>
    tpu.vector_store %arg19[%c0_90, %c2_91, %c0_92], %337 {strides = array<i32>} : memref<2x8x128xf32, #tpu.memory_space<vmem>>, vector<2x1x128xf32>,
    %338 = arith.select %325, %162, %202 : vector<2x128xi1>, vector<2x128xf32>
    %c0_93 = arith.constant 0 : index
    %c3_94 = arith.constant 3 : index
    %c0_95 = arith.constant 0 : index
    %339 = vector.load %arg19[%c0_93, %c3_94, %c0_95] : memref<2x8x128xf32, #tpu.memory_space<vmem>>, vector<2x1x128xf32>
    %340 = vector.shape_cast %339 : vector<2x1x128xf32> to vector<2x128xf32>
    %341 = vector.shape_cast %338 : vector<2x128xf32> to vector<2x1x128xf32>
    tpu.vector_store %arg19[%c0_93, %c3_94, %c0_95], %341 {strides = array<i32>} : memref<2x8x128xf32, #tpu.memory_space<vmem>>, vector<2x1x128xf32>,
    %342 = arith.select %325, %202, %162 : vector<2x128xi1>, vector<2x128xf32>
    %c0_96 = arith.constant 0 : index
    %c4_97 = arith.constant 4 : index
    %c0_98 = arith.constant 0 : index
    %343 = vector.load %arg19[%c0_96, %c4_97, %c0_98] : memref<2x8x128xf32, #tpu.memory_space<vmem>>, vector<2x1x128xf32>
    %344 = vector.shape_cast %343 : vector<2x1x128xf32> to vector<2x128xf32>
    %345 = vector.shape_cast %342 : vector<2x128xf32> to vector<2x1x128xf32>
    tpu.vector_store %arg19[%c0_96, %c4_97, %c0_98], %345 {strides = array<i32>} : memref<2x8x128xf32, #tpu.memory_space<vmem>>, vector<2x1x128xf32>,
    %346 = arith.select %325, %242, %122 : vector<2x128xi1>, vector<2x128xf32>
    %c0_99 = arith.constant 0 : index
    %c5_100 = arith.constant 5 : index
    %c0_101 = arith.constant 0 : index
    %347 = vector.load %arg19[%c0_99, %c5_100, %c0_101] : memref<2x8x128xf32, #tpu.memory_space<vmem>>, vector<2x1x128xf32>
    %348 = vector.shape_cast %347 : vector<2x1x128xf32> to vector<2x128xf32>
    %349 = vector.shape_cast %346 : vector<2x128xf32> to vector<2x1x128xf32>
    tpu.vector_store %arg19[%c0_99, %c5_100, %c0_101], %349 {strides = array<i32>} : memref<2x8x128xf32, #tpu.memory_space<vmem>>, vector<2x1x128xf32>,
    %350 = arith.select %325, %282, %82 : vector<2x128xi1>, vector<2x128xf32>
    %c0_102 = arith.constant 0 : index
    %c6_103 = arith.constant 6 : index
    %c0_104 = arith.constant 0 : index
    %351 = vector.load %arg19[%c0_102, %c6_103, %c0_104] : memref<2x8x128xf32, #tpu.memory_space<vmem>>, vector<2x1x128xf32>
    %352 = vector.shape_cast %351 : vector<2x1x128xf32> to vector<2x128xf32>
    %353 = vector.shape_cast %350 : vector<2x128xf32> to vector<2x1x128xf32>
    tpu.vector_store %arg19[%c0_102, %c6_103, %c0_104], %353 {strides = array<i32>} : memref<2x8x128xf32, #tpu.memory_space<vmem>>, vector<2x1x128xf32>,
    %354 = arith.select %325, %322, %42 : vector<2x128xi1>, vector<2x128xf32>
    %c0_105 = arith.constant 0 : index
    %c7_106 = arith.constant 7 : index
    %c0_107 = arith.constant 0 : index
    %355 = vector.load %arg19[%c0_105, %c7_106, %c0_107] : memref<2x8x128xf32, #tpu.memory_space<vmem>>, vector<2x1x128xf32>
    %356 = vector.shape_cast %355 : vector<2x1x128xf32> to vector<2x128xf32>
    %357 = vector.shape_cast %354 : vector<2x128xf32> to vector<2x1x128xf32>
    tpu.vector_store %arg19[%c0_105, %c7_106, %c0_107], %357 {strides = array<i32>} : memref<2x8x128xf32, #tpu.memory_space<vmem>>, vector<2x1x128xf32>,
    %c0_108 = arith.constant 0 : index
    %c0_109 = arith.constant 0 : index
    %358 = vector.load %arg4[%c0_108, %c0_109] : memref<128x128xf32, #tpu.memory_space<vmem>>, vector<128x128xf32>
    %cst_110 = arith.constant dense<0.000000e+00> : vector<2x128xf32>
    %359 = tpu.matmul %321, %358, %cst_110 {dimension_numbers = #tpu.dot_dimension_numbers<[1], [0], [0], [1], [0, 0, 1, 1], [], []>} : vector<2x128xf32>, vector<128x128xf32>, vector<2x128xf32> -> vector<2x128xf32>
    %c0_111 = arith.constant 0 : index
    %c0_112 = arith.constant 0 : index
    %360 = vector.load %arg5[%c0_111, %c0_112] : memref<1x128xf32, #tpu.memory_space<vmem>>, vector<1x128xf32>
    %361 = vector.broadcast %360 : vector<1x128xf32> to vector<2x128xf32>
    %362 = arith.addf %359, %361 : vector<2x128xf32>
    %363 = math.tanh %362 : vector<2x128xf32>
    %c0_113 = arith.constant 0 : index
    %c0_114 = arith.constant 0 : index
    %364 = vector.load %arg9[%c0_113, %c0_114] : memref<128x384xbf16, #tpu.memory_space<vmem>>, vector<128x384xbf16>
    %c0_115 = arith.constant 0 : index
    %c0_116 = arith.constant 0 : index
    %365 = vector.load %arg10[%c0_115, %c0_116] : memref<1x384xf32, #tpu.memory_space<vmem>>, vector<1x384xf32>
    %c0_117 = arith.constant 0 : index
    %c0_118 = arith.constant 0 : index
    %c0_119 = arith.constant 0 : index
    %366 = vector.load %arg6[%c0_117, %c0_118, %c0_119] : memref<8x2x384xf32, #tpu.memory_space<vmem>>, vector<1x2x384xf32>
    %367 = vector.shape_cast %366 : vector<1x2x384xf32> to vector<2x384xf32>
    %c0_120 = arith.constant 0 : index
    %c0_121 = arith.constant 0 : index
    %c0_122 = arith.constant 0 : index
    %368 = vector.load %arg7[%c0_120, %c0_121, %c0_122] : memref<8x2x128xf32, #tpu.memory_space<vmem>>, vector<1x2x128xf32>
    %369 = vector.shape_cast %368 : vector<1x2x128xf32> to vector<2x128xf32>
    %370 = arith.truncf %363 : vector<2x128xf32> to vector<2x128xbf16>
    %cst_123 = arith.constant dense<0.000000e+00> : vector<2x384xf32>
    %371 = tpu.matmul %370, %364, %cst_123 {dimension_numbers = #tpu.dot_dimension_numbers<[1], [0], [0], [1], [0, 0, 1, 1], [], []>} : vector<2x128xbf16>, vector<128x384xbf16>, vector<2x384xf32> -> vector<2x384xf32>
    %372 = vector.broadcast %365 : vector<1x384xf32> to vector<2x384xf32>
    %373 = arith.addf %371, %372 : vector<2x384xf32>
    %374 = vector.extract_strided_slice %367 {offsets = [0, 0], sizes = [2, 128], strides = [1, 1]} : vector<2x384xf32> to vector<2x128xf32>
    %375 = vector.extract_strided_slice %373 {offsets = [0, 0], sizes = [2, 128], strides = [1, 1]} : vector<2x384xf32> to vector<2x128xf32>
    %376 = arith.addf %374, %375 : vector<2x128xf32>
    %377 = arith.negf %376 : vector<2x128xf32>
    %378 = math.exp %377 : vector<2x128xf32>
    %cst_124 = arith.constant 1.000000e+00 : f32
    %379 = vector.broadcast %cst_124 : f32 to vector<2x128xf32>
    %380 = arith.addf %379, %378 : vector<2x128xf32>
    %381 = arith.divf %379, %380 : vector<2x128xf32>
    %382 = vector.extract_strided_slice %367 {offsets = [0, 128], sizes = [2, 128], strides = [1, 1]} : vector<2x384xf32> to vector<2x128xf32>
    %383 = vector.extract_strided_slice %373 {offsets = [0, 128], sizes = [2, 128], strides = [1, 1]} : vector<2x384xf32> to vector<2x128xf32>
    %384 = arith.addf %382, %383 : vector<2x128xf32>
    %385 = arith.negf %384 : vector<2x128xf32>
    %386 = math.exp %385 : vector<2x128xf32>
    %cst_125 = arith.constant 1.000000e+00 : f32
    %387 = vector.broadcast %cst_125 : f32 to vector<2x128xf32>
    %388 = arith.addf %387, %386 : vector<2x128xf32>
    %389 = arith.divf %387, %388 : vector<2x128xf32>
    %390 = vector.extract_strided_slice %367 {offsets = [0, 256], sizes = [2, 128], strides = [1, 1]} : vector<2x384xf32> to vector<2x128xf32>
    %391 = vector.extract_strided_slice %373 {offsets = [0, 256], sizes = [2, 128], strides = [1, 1]} : vector<2x384xf32> to vector<2x128xf32>
    %392 = arith.mulf %381, %391 : vector<2x128xf32>
    %393 = arith.addf %390, %392 : vector<2x128xf32>
    %394 = math.tanh %393 : vector<2x128xf32>
    %cst_126 = arith.constant 1.000000e+00 : f32
    %395 = vector.broadcast %cst_126 : f32 to vector<2x128xf32>
    %396 = arith.subf %395, %389 : vector<2x128xf32>
    %397 = arith.mulf %396, %394 : vector<2x128xf32>
    %398 = arith.mulf %389, %363 : vector<2x128xf32>
    %399 = arith.addf %397, %398 : vector<2x128xf32>
    %400 = arith.mulf %369, %399 : vector<2x128xf32>
    %cst_127 = arith.constant 1.000000e+00 : f32
    %401 = vector.broadcast %cst_127 : f32 to vector<2x128xf32>
    %402 = arith.subf %401, %369 : vector<2x128xf32>
    %403 = arith.mulf %402, %363 : vector<2x128xf32>
    %404 = arith.addf %400, %403 : vector<2x128xf32>
    %405 = arith.mulf %369, %399 : vector<2x128xf32>
    %c0_128 = arith.constant 0 : index
    %c0_129 = arith.constant 0 : index
    %c0_130 = arith.constant 0 : index
    %406 = vector.load %arg20[%c0_128, %c0_129, %c0_130] : memref<2x8x128xf32, #tpu.memory_space<vmem>>, vector<2x1x128xf32>
    %407 = vector.shape_cast %406 : vector<2x1x128xf32> to vector<2x128xf32>
    %408 = vector.shape_cast %405 : vector<2x128xf32> to vector<2x1x128xf32>
    tpu.vector_store %arg20[%c0_128, %c0_129, %c0_130], %408 {strides = array<i32>} : memref<2x8x128xf32, #tpu.memory_space<vmem>>, vector<2x1x128xf32>,
    %c1_131 = arith.constant 1 : index
    %c0_132 = arith.constant 0 : index
    %c0_133 = arith.constant 0 : index
    %409 = vector.load %arg6[%c1_131, %c0_132, %c0_133] : memref<8x2x384xf32, #tpu.memory_space<vmem>>, vector<1x2x384xf32>
    %410 = vector.shape_cast %409 : vector<1x2x384xf32> to vector<2x384xf32>
    %c1_134 = arith.constant 1 : index
    %c0_135 = arith.constant 0 : index
    %c0_136 = arith.constant 0 : index
    %411 = vector.load %arg7[%c1_134, %c0_135, %c0_136] : memref<8x2x128xf32, #tpu.memory_space<vmem>>, vector<1x2x128xf32>
    %412 = vector.shape_cast %411 : vector<1x2x128xf32> to vector<2x128xf32>
    %413 = arith.truncf %404 : vector<2x128xf32> to vector<2x128xbf16>
    %cst_137 = arith.constant dense<0.000000e+00> : vector<2x384xf32>
    %414 = tpu.matmul %413, %364, %cst_137 {dimension_numbers = #tpu.dot_dimension_numbers<[1], [0], [0], [1], [0, 0, 1, 1], [], []>} : vector<2x128xbf16>, vector<128x384xbf16>, vector<2x384xf32> -> vector<2x384xf32>
    %415 = vector.broadcast %365 : vector<1x384xf32> to vector<2x384xf32>
    %416 = arith.addf %414, %415 : vector<2x384xf32>
    %417 = vector.extract_strided_slice %410 {offsets = [0, 0], sizes = [2, 128], strides = [1, 1]} : vector<2x384xf32> to vector<2x128xf32>
    %418 = vector.extract_strided_slice %416 {offsets = [0, 0], sizes = [2, 128], strides = [1, 1]} : vector<2x384xf32> to vector<2x128xf32>
    %419 = arith.addf %417, %418 : vector<2x128xf32>
    %420 = arith.negf %419 : vector<2x128xf32>
    %421 = math.exp %420 : vector<2x128xf32>
    %cst_138 = arith.constant 1.000000e+00 : f32
    %422 = vector.broadcast %cst_138 : f32 to vector<2x128xf32>
    %423 = arith.addf %422, %421 : vector<2x128xf32>
    %424 = arith.divf %422, %423 : vector<2x128xf32>
    %425 = vector.extract_strided_slice %410 {offsets = [0, 128], sizes = [2, 128], strides = [1, 1]} : vector<2x384xf32> to vector<2x128xf32>
    %426 = vector.extract_strided_slice %416 {offsets = [0, 128], sizes = [2, 128], strides = [1, 1]} : vector<2x384xf32> to vector<2x128xf32>
    %427 = arith.addf %425, %426 : vector<2x128xf32>
    %428 = arith.negf %427 : vector<2x128xf32>
    %429 = math.exp %428 : vector<2x128xf32>
    %cst_139 = arith.constant 1.000000e+00 : f32
    %430 = vector.broadcast %cst_139 : f32 to vector<2x128xf32>
    %431 = arith.addf %430, %429 : vector<2x128xf32>
    %432 = arith.divf %430, %431 : vector<2x128xf32>
    %433 = vector.extract_strided_slice %410 {offsets = [0, 256], sizes = [2, 128], strides = [1, 1]} : vector<2x384xf32> to vector<2x128xf32>
    %434 = vector.extract_strided_slice %416 {offsets = [0, 256], sizes = [2, 128], strides = [1, 1]} : vector<2x384xf32> to vector<2x128xf32>
    %435 = arith.mulf %424, %434 : vector<2x128xf32>
    %436 = arith.addf %433, %435 : vector<2x128xf32>
    %437 = math.tanh %436 : vector<2x128xf32>
    %cst_140 = arith.constant 1.000000e+00 : f32
    %438 = vector.broadcast %cst_140 : f32 to vector<2x128xf32>
    %439 = arith.subf %438, %432 : vector<2x128xf32>
    %440 = arith.mulf %439, %437 : vector<2x128xf32>
    %441 = arith.mulf %432, %404 : vector<2x128xf32>
    %442 = arith.addf %440, %441 : vector<2x128xf32>
    %443 = arith.mulf %412, %442 : vector<2x128xf32>
    %cst_141 = arith.constant 1.000000e+00 : f32
    %444 = vector.broadcast %cst_141 : f32 to vector<2x128xf32>
    %445 = arith.subf %444, %412 : vector<2x128xf32>
    %446 = arith.mulf %445, %404 : vector<2x128xf32>
    %447 = arith.addf %443, %446 : vector<2x128xf32>
    %448 = arith.mulf %412, %442 : vector<2x128xf32>
    %c0_142 = arith.constant 0 : index
    %c1_143 = arith.constant 1 : index
    %c0_144 = arith.constant 0 : index
    %449 = vector.load %arg20[%c0_142, %c1_143, %c0_144] : memref<2x8x128xf32, #tpu.memory_space<vmem>>, vector<2x1x128xf32>
    %450 = vector.shape_cast %449 : vector<2x1x128xf32> to vector<2x128xf32>
    %451 = vector.shape_cast %448 : vector<2x128xf32> to vector<2x1x128xf32>
    tpu.vector_store %arg20[%c0_142, %c1_143, %c0_144], %451 {strides = array<i32>} : memref<2x8x128xf32, #tpu.memory_space<vmem>>, vector<2x1x128xf32>,
    %c2_145 = arith.constant 2 : index
    %c0_146 = arith.constant 0 : index
    %c0_147 = arith.constant 0 : index
    %452 = vector.load %arg6[%c2_145, %c0_146, %c0_147] : memref<8x2x384xf32, #tpu.memory_space<vmem>>, vector<1x2x384xf32>
    %453 = vector.shape_cast %452 : vector<1x2x384xf32> to vector<2x384xf32>
    %c2_148 = arith.constant 2 : index
    %c0_149 = arith.constant 0 : index
    %c0_150 = arith.constant 0 : index
    %454 = vector.load %arg7[%c2_148, %c0_149, %c0_150] : memref<8x2x128xf32, #tpu.memory_space<vmem>>, vector<1x2x128xf32>
    %455 = vector.shape_cast %454 : vector<1x2x128xf32> to vector<2x128xf32>
    %456 = arith.truncf %447 : vector<2x128xf32> to vector<2x128xbf16>
    %cst_151 = arith.constant dense<0.000000e+00> : vector<2x384xf32>
    %457 = tpu.matmul %456, %364, %cst_151 {dimension_numbers = #tpu.dot_dimension_numbers<[1], [0], [0], [1], [0, 0, 1, 1], [], []>} : vector<2x128xbf16>, vector<128x384xbf16>, vector<2x384xf32> -> vector<2x384xf32>
    %458 = vector.broadcast %365 : vector<1x384xf32> to vector<2x384xf32>
    %459 = arith.addf %457, %458 : vector<2x384xf32>
    %460 = vector.extract_strided_slice %453 {offsets = [0, 0], sizes = [2, 128], strides = [1, 1]} : vector<2x384xf32> to vector<2x128xf32>
    %461 = vector.extract_strided_slice %459 {offsets = [0, 0], sizes = [2, 128], strides = [1, 1]} : vector<2x384xf32> to vector<2x128xf32>
    %462 = arith.addf %460, %461 : vector<2x128xf32>
    %463 = arith.negf %462 : vector<2x128xf32>
    %464 = math.exp %463 : vector<2x128xf32>
    %cst_152 = arith.constant 1.000000e+00 : f32
    %465 = vector.broadcast %cst_152 : f32 to vector<2x128xf32>
    %466 = arith.addf %465, %464 : vector<2x128xf32>
    %467 = arith.divf %465, %466 : vector<2x128xf32>
    %468 = vector.extract_strided_slice %453 {offsets = [0, 128], sizes = [2, 128], strides = [1, 1]} : vector<2x384xf32> to vector<2x128xf32>
    %469 = vector.extract_strided_slice %459 {offsets = [0, 128], sizes = [2, 128], strides = [1, 1]} : vector<2x384xf32> to vector<2x128xf32>
    %470 = arith.addf %468, %469 : vector<2x128xf32>
    %471 = arith.negf %470 : vector<2x128xf32>
    %472 = math.exp %471 : vector<2x128xf32>
    %cst_153 = arith.constant 1.000000e+00 : f32
    %473 = vector.broadcast %cst_153 : f32 to vector<2x128xf32>
    %474 = arith.addf %473, %472 : vector<2x128xf32>
    %475 = arith.divf %473, %474 : vector<2x128xf32>
    %476 = vector.extract_strided_slice %453 {offsets = [0, 256], sizes = [2, 128], strides = [1, 1]} : vector<2x384xf32> to vector<2x128xf32>
    %477 = vector.extract_strided_slice %459 {offsets = [0, 256], sizes = [2, 128], strides = [1, 1]} : vector<2x384xf32> to vector<2x128xf32>
    %478 = arith.mulf %467, %477 : vector<2x128xf32>
    %479 = arith.addf %476, %478 : vector<2x128xf32>
    %480 = math.tanh %479 : vector<2x128xf32>
    %cst_154 = arith.constant 1.000000e+00 : f32
    %481 = vector.broadcast %cst_154 : f32 to vector<2x128xf32>
    %482 = arith.subf %481, %475 : vector<2x128xf32>
    %483 = arith.mulf %482, %480 : vector<2x128xf32>
    %484 = arith.mulf %475, %447 : vector<2x128xf32>
    %485 = arith.addf %483, %484 : vector<2x128xf32>
    %486 = arith.mulf %455, %485 : vector<2x128xf32>
    %cst_155 = arith.constant 1.000000e+00 : f32
    %487 = vector.broadcast %cst_155 : f32 to vector<2x128xf32>
    %488 = arith.subf %487, %455 : vector<2x128xf32>
    %489 = arith.mulf %488, %447 : vector<2x128xf32>
    %490 = arith.addf %486, %489 : vector<2x128xf32>
    %491 = arith.mulf %455, %485 : vector<2x128xf32>
    %c0_156 = arith.constant 0 : index
    %c2_157 = arith.constant 2 : index
    %c0_158 = arith.constant 0 : index
    %492 = vector.load %arg20[%c0_156, %c2_157, %c0_158] : memref<2x8x128xf32, #tpu.memory_space<vmem>>, vector<2x1x128xf32>
    %493 = vector.shape_cast %492 : vector<2x1x128xf32> to vector<2x128xf32>
    %494 = vector.shape_cast %491 : vector<2x128xf32> to vector<2x1x128xf32>
    tpu.vector_store %arg20[%c0_156, %c2_157, %c0_158], %494 {strides = array<i32>} : memref<2x8x128xf32, #tpu.memory_space<vmem>>, vector<2x1x128xf32>,
    %c3_159 = arith.constant 3 : index
    %c0_160 = arith.constant 0 : index
    %c0_161 = arith.constant 0 : index
    %495 = vector.load %arg6[%c3_159, %c0_160, %c0_161] : memref<8x2x384xf32, #tpu.memory_space<vmem>>, vector<1x2x384xf32>
    %496 = vector.shape_cast %495 : vector<1x2x384xf32> to vector<2x384xf32>
    %c3_162 = arith.constant 3 : index
    %c0_163 = arith.constant 0 : index
    %c0_164 = arith.constant 0 : index
    %497 = vector.load %arg7[%c3_162, %c0_163, %c0_164] : memref<8x2x128xf32, #tpu.memory_space<vmem>>, vector<1x2x128xf32>
    %498 = vector.shape_cast %497 : vector<1x2x128xf32> to vector<2x128xf32>
    %499 = arith.truncf %490 : vector<2x128xf32> to vector<2x128xbf16>
    %cst_165 = arith.constant dense<0.000000e+00> : vector<2x384xf32>
    %500 = tpu.matmul %499, %364, %cst_165 {dimension_numbers = #tpu.dot_dimension_numbers<[1], [0], [0], [1], [0, 0, 1, 1], [], []>} : vector<2x128xbf16>, vector<128x384xbf16>, vector<2x384xf32> -> vector<2x384xf32>
    %501 = vector.broadcast %365 : vector<1x384xf32> to vector<2x384xf32>
    %502 = arith.addf %500, %501 : vector<2x384xf32>
    %503 = vector.extract_strided_slice %496 {offsets = [0, 0], sizes = [2, 128], strides = [1, 1]} : vector<2x384xf32> to vector<2x128xf32>
    %504 = vector.extract_strided_slice %502 {offsets = [0, 0], sizes = [2, 128], strides = [1, 1]} : vector<2x384xf32> to vector<2x128xf32>
    %505 = arith.addf %503, %504 : vector<2x128xf32>
    %506 = arith.negf %505 : vector<2x128xf32>
    %507 = math.exp %506 : vector<2x128xf32>
    %cst_166 = arith.constant 1.000000e+00 : f32
    %508 = vector.broadcast %cst_166 : f32 to vector<2x128xf32>
    %509 = arith.addf %508, %507 : vector<2x128xf32>
    %510 = arith.divf %508, %509 : vector<2x128xf32>
    %511 = vector.extract_strided_slice %496 {offsets = [0, 128], sizes = [2, 128], strides = [1, 1]} : vector<2x384xf32> to vector<2x128xf32>
    %512 = vector.extract_strided_slice %502 {offsets = [0, 128], sizes = [2, 128], strides = [1, 1]} : vector<2x384xf32> to vector<2x128xf32>
    %513 = arith.addf %511, %512 : vector<2x128xf32>
    %514 = arith.negf %513 : vector<2x128xf32>
    %515 = math.exp %514 : vector<2x128xf32>
    %cst_167 = arith.constant 1.000000e+00 : f32
    %516 = vector.broadcast %cst_167 : f32 to vector<2x128xf32>
    %517 = arith.addf %516, %515 : vector<2x128xf32>
    %518 = arith.divf %516, %517 : vector<2x128xf32>
    %519 = vector.extract_strided_slice %496 {offsets = [0, 256], sizes = [2, 128], strides = [1, 1]} : vector<2x384xf32> to vector<2x128xf32>
    %520 = vector.extract_strided_slice %502 {offsets = [0, 256], sizes = [2, 128], strides = [1, 1]} : vector<2x384xf32> to vector<2x128xf32>
    %521 = arith.mulf %510, %520 : vector<2x128xf32>
    %522 = arith.addf %519, %521 : vector<2x128xf32>
    %523 = math.tanh %522 : vector<2x128xf32>
    %cst_168 = arith.constant 1.000000e+00 : f32
    %524 = vector.broadcast %cst_168 : f32 to vector<2x128xf32>
    %525 = arith.subf %524, %518 : vector<2x128xf32>
    %526 = arith.mulf %525, %523 : vector<2x128xf32>
    %527 = arith.mulf %518, %490 : vector<2x128xf32>
    %528 = arith.addf %526, %527 : vector<2x128xf32>
    %529 = arith.mulf %498, %528 : vector<2x128xf32>
    %cst_169 = arith.constant 1.000000e+00 : f32
    %530 = vector.broadcast %cst_169 : f32 to vector<2x128xf32>
    %531 = arith.subf %530, %498 : vector<2x128xf32>
    %532 = arith.mulf %531, %490 : vector<2x128xf32>
    %533 = arith.addf %529, %532 : vector<2x128xf32>
    %534 = arith.mulf %498, %528 : vector<2x128xf32>
    %c0_170 = arith.constant 0 : index
    %c3_171 = arith.constant 3 : index
    %c0_172 = arith.constant 0 : index
    %535 = vector.load %arg20[%c0_170, %c3_171, %c0_172] : memref<2x8x128xf32, #tpu.memory_space<vmem>>, vector<2x1x128xf32>
    %536 = vector.shape_cast %535 : vector<2x1x128xf32> to vector<2x128xf32>
    %537 = vector.shape_cast %534 : vector<2x128xf32> to vector<2x1x128xf32>
    tpu.vector_store %arg20[%c0_170, %c3_171, %c0_172], %537 {strides = array<i32>} : memref<2x8x128xf32, #tpu.memory_space<vmem>>, vector<2x1x128xf32>,
    %c4_173 = arith.constant 4 : index
    %c0_174 = arith.constant 0 : index
    %c0_175 = arith.constant 0 : index
    %538 = vector.load %arg6[%c4_173, %c0_174, %c0_175] : memref<8x2x384xf32, #tpu.memory_space<vmem>>, vector<1x2x384xf32>
    %539 = vector.shape_cast %538 : vector<1x2x384xf32> to vector<2x384xf32>
    %c4_176 = arith.constant 4 : index
    %c0_177 = arith.constant 0 : index
    %c0_178 = arith.constant 0 : index
    %540 = vector.load %arg7[%c4_176, %c0_177, %c0_178] : memref<8x2x128xf32, #tpu.memory_space<vmem>>, vector<1x2x128xf32>
    %541 = vector.shape_cast %540 : vector<1x2x128xf32> to vector<2x128xf32>
    %542 = arith.truncf %533 : vector<2x128xf32> to vector<2x128xbf16>
    %cst_179 = arith.constant dense<0.000000e+00> : vector<2x384xf32>
    %543 = tpu.matmul %542, %364, %cst_179 {dimension_numbers = #tpu.dot_dimension_numbers<[1], [0], [0], [1], [0, 0, 1, 1], [], []>} : vector<2x128xbf16>, vector<128x384xbf16>, vector<2x384xf32> -> vector<2x384xf32>
    %544 = vector.broadcast %365 : vector<1x384xf32> to vector<2x384xf32>
    %545 = arith.addf %543, %544 : vector<2x384xf32>
    %546 = vector.extract_strided_slice %539 {offsets = [0, 0], sizes = [2, 128], strides = [1, 1]} : vector<2x384xf32> to vector<2x128xf32>
    %547 = vector.extract_strided_slice %545 {offsets = [0, 0], sizes = [2, 128], strides = [1, 1]} : vector<2x384xf32> to vector<2x128xf32>
    %548 = arith.addf %546, %547 : vector<2x128xf32>
    %549 = arith.negf %548 : vector<2x128xf32>
    %550 = math.exp %549 : vector<2x128xf32>
    %cst_180 = arith.constant 1.000000e+00 : f32
    %551 = vector.broadcast %cst_180 : f32 to vector<2x128xf32>
    %552 = arith.addf %551, %550 : vector<2x128xf32>
    %553 = arith.divf %551, %552 : vector<2x128xf32>
    %554 = vector.extract_strided_slice %539 {offsets = [0, 128], sizes = [2, 128], strides = [1, 1]} : vector<2x384xf32> to vector<2x128xf32>
    %555 = vector.extract_strided_slice %545 {offsets = [0, 128], sizes = [2, 128], strides = [1, 1]} : vector<2x384xf32> to vector<2x128xf32>
    %556 = arith.addf %554, %555 : vector<2x128xf32>
    %557 = arith.negf %556 : vector<2x128xf32>
    %558 = math.exp %557 : vector<2x128xf32>
    %cst_181 = arith.constant 1.000000e+00 : f32
    %559 = vector.broadcast %cst_181 : f32 to vector<2x128xf32>
    %560 = arith.addf %559, %558 : vector<2x128xf32>
    %561 = arith.divf %559, %560 : vector<2x128xf32>
    %562 = vector.extract_strided_slice %539 {offsets = [0, 256], sizes = [2, 128], strides = [1, 1]} : vector<2x384xf32> to vector<2x128xf32>
    %563 = vector.extract_strided_slice %545 {offsets = [0, 256], sizes = [2, 128], strides = [1, 1]} : vector<2x384xf32> to vector<2x128xf32>
    %564 = arith.mulf %553, %563 : vector<2x128xf32>
    %565 = arith.addf %562, %564 : vector<2x128xf32>
    %566 = math.tanh %565 : vector<2x128xf32>
    %cst_182 = arith.constant 1.000000e+00 : f32
    %567 = vector.broadcast %cst_182 : f32 to vector<2x128xf32>
    %568 = arith.subf %567, %561 : vector<2x128xf32>
    %569 = arith.mulf %568, %566 : vector<2x128xf32>
    %570 = arith.mulf %561, %533 : vector<2x128xf32>
    %571 = arith.addf %569, %570 : vector<2x128xf32>
    %572 = arith.mulf %541, %571 : vector<2x128xf32>
    %cst_183 = arith.constant 1.000000e+00 : f32
    %573 = vector.broadcast %cst_183 : f32 to vector<2x128xf32>
    %574 = arith.subf %573, %541 : vector<2x128xf32>
    %575 = arith.mulf %574, %533 : vector<2x128xf32>
    %576 = arith.addf %572, %575 : vector<2x128xf32>
    %577 = arith.mulf %541, %571 : vector<2x128xf32>
    %c0_184 = arith.constant 0 : index
    %c4_185 = arith.constant 4 : index
    %c0_186 = arith.constant 0 : index
    %578 = vector.load %arg20[%c0_184, %c4_185, %c0_186] : memref<2x8x128xf32, #tpu.memory_space<vmem>>, vector<2x1x128xf32>
    %579 = vector.shape_cast %578 : vector<2x1x128xf32> to vector<2x128xf32>
    %580 = vector.shape_cast %577 : vector<2x128xf32> to vector<2x1x128xf32>
    tpu.vector_store %arg20[%c0_184, %c4_185, %c0_186], %580 {strides = array<i32>} : memref<2x8x128xf32, #tpu.memory_space<vmem>>, vector<2x1x128xf32>,
    %c5_187 = arith.constant 5 : index
    %c0_188 = arith.constant 0 : index
    %c0_189 = arith.constant 0 : index
    %581 = vector.load %arg6[%c5_187, %c0_188, %c0_189] : memref<8x2x384xf32, #tpu.memory_space<vmem>>, vector<1x2x384xf32>
    %582 = vector.shape_cast %581 : vector<1x2x384xf32> to vector<2x384xf32>
    %c5_190 = arith.constant 5 : index
    %c0_191 = arith.constant 0 : index
    %c0_192 = arith.constant 0 : index
    %583 = vector.load %arg7[%c5_190, %c0_191, %c0_192] : memref<8x2x128xf32, #tpu.memory_space<vmem>>, vector<1x2x128xf32>
    %584 = vector.shape_cast %583 : vector<1x2x128xf32> to vector<2x128xf32>
    %585 = arith.truncf %576 : vector<2x128xf32> to vector<2x128xbf16>
    %cst_193 = arith.constant dense<0.000000e+00> : vector<2x384xf32>
    %586 = tpu.matmul %585, %364, %cst_193 {dimension_numbers = #tpu.dot_dimension_numbers<[1], [0], [0], [1], [0, 0, 1, 1], [], []>} : vector<2x128xbf16>, vector<128x384xbf16>, vector<2x384xf32> -> vector<2x384xf32>
    %587 = vector.broadcast %365 : vector<1x384xf32> to vector<2x384xf32>
    %588 = arith.addf %586, %587 : vector<2x384xf32>
    %589 = vector.extract_strided_slice %582 {offsets = [0, 0], sizes = [2, 128], strides = [1, 1]} : vector<2x384xf32> to vector<2x128xf32>
    %590 = vector.extract_strided_slice %588 {offsets = [0, 0], sizes = [2, 128], strides = [1, 1]} : vector<2x384xf32> to vector<2x128xf32>
    %591 = arith.addf %589, %590 : vector<2x128xf32>
    %592 = arith.negf %591 : vector<2x128xf32>
    %593 = math.exp %592 : vector<2x128xf32>
    %cst_194 = arith.constant 1.000000e+00 : f32
    %594 = vector.broadcast %cst_194 : f32 to vector<2x128xf32>
    %595 = arith.addf %594, %593 : vector<2x128xf32>
    %596 = arith.divf %594, %595 : vector<2x128xf32>
    %597 = vector.extract_strided_slice %582 {offsets = [0, 128], sizes = [2, 128], strides = [1, 1]} : vector<2x384xf32> to vector<2x128xf32>
    %598 = vector.extract_strided_slice %588 {offsets = [0, 128], sizes = [2, 128], strides = [1, 1]} : vector<2x384xf32> to vector<2x128xf32>
    %599 = arith.addf %597, %598 : vector<2x128xf32>
    %600 = arith.negf %599 : vector<2x128xf32>
    %601 = math.exp %600 : vector<2x128xf32>
    %cst_195 = arith.constant 1.000000e+00 : f32
    %602 = vector.broadcast %cst_195 : f32 to vector<2x128xf32>
    %603 = arith.addf %602, %601 : vector<2x128xf32>
    %604 = arith.divf %602, %603 : vector<2x128xf32>
    %605 = vector.extract_strided_slice %582 {offsets = [0, 256], sizes = [2, 128], strides = [1, 1]} : vector<2x384xf32> to vector<2x128xf32>
    %606 = vector.extract_strided_slice %588 {offsets = [0, 256], sizes = [2, 128], strides = [1, 1]} : vector<2x384xf32> to vector<2x128xf32>
    %607 = arith.mulf %596, %606 : vector<2x128xf32>
    %608 = arith.addf %605, %607 : vector<2x128xf32>
    %609 = math.tanh %608 : vector<2x128xf32>
    %cst_196 = arith.constant 1.000000e+00 : f32
    %610 = vector.broadcast %cst_196 : f32 to vector<2x128xf32>
    %611 = arith.subf %610, %604 : vector<2x128xf32>
    %612 = arith.mulf %611, %609 : vector<2x128xf32>
    %613 = arith.mulf %604, %576 : vector<2x128xf32>
    %614 = arith.addf %612, %613 : vector<2x128xf32>
    %615 = arith.mulf %584, %614 : vector<2x128xf32>
    %cst_197 = arith.constant 1.000000e+00 : f32
    %616 = vector.broadcast %cst_197 : f32 to vector<2x128xf32>
    %617 = arith.subf %616, %584 : vector<2x128xf32>
    %618 = arith.mulf %617, %576 : vector<2x128xf32>
    %619 = arith.addf %615, %618 : vector<2x128xf32>
    %620 = arith.mulf %584, %614 : vector<2x128xf32>
    %c0_198 = arith.constant 0 : index
    %c5_199 = arith.constant 5 : index
    %c0_200 = arith.constant 0 : index
    %621 = vector.load %arg20[%c0_198, %c5_199, %c0_200] : memref<2x8x128xf32, #tpu.memory_space<vmem>>, vector<2x1x128xf32>
    %622 = vector.shape_cast %621 : vector<2x1x128xf32> to vector<2x128xf32>
    %623 = vector.shape_cast %620 : vector<2x128xf32> to vector<2x1x128xf32>
    tpu.vector_store %arg20[%c0_198, %c5_199, %c0_200], %623 {strides = array<i32>} : memref<2x8x128xf32, #tpu.memory_space<vmem>>, vector<2x1x128xf32>,
    %c6_201 = arith.constant 6 : index
    %c0_202 = arith.constant 0 : index
    %c0_203 = arith.constant 0 : index
    %624 = vector.load %arg6[%c6_201, %c0_202, %c0_203] : memref<8x2x384xf32, #tpu.memory_space<vmem>>, vector<1x2x384xf32>
    %625 = vector.shape_cast %624 : vector<1x2x384xf32> to vector<2x384xf32>
    %c6_204 = arith.constant 6 : index
    %c0_205 = arith.constant 0 : index
    %c0_206 = arith.constant 0 : index
    %626 = vector.load %arg7[%c6_204, %c0_205, %c0_206] : memref<8x2x128xf32, #tpu.memory_space<vmem>>, vector<1x2x128xf32>
    %627 = vector.shape_cast %626 : vector<1x2x128xf32> to vector<2x128xf32>
    %628 = arith.truncf %619 : vector<2x128xf32> to vector<2x128xbf16>
    %cst_207 = arith.constant dense<0.000000e+00> : vector<2x384xf32>
    %629 = tpu.matmul %628, %364, %cst_207 {dimension_numbers = #tpu.dot_dimension_numbers<[1], [0], [0], [1], [0, 0, 1, 1], [], []>} : vector<2x128xbf16>, vector<128x384xbf16>, vector<2x384xf32> -> vector<2x384xf32>
    %630 = vector.broadcast %365 : vector<1x384xf32> to vector<2x384xf32>
    %631 = arith.addf %629, %630 : vector<2x384xf32>
    %632 = vector.extract_strided_slice %625 {offsets = [0, 0], sizes = [2, 128], strides = [1, 1]} : vector<2x384xf32> to vector<2x128xf32>
    %633 = vector.extract_strided_slice %631 {offsets = [0, 0], sizes = [2, 128], strides = [1, 1]} : vector<2x384xf32> to vector<2x128xf32>
    %634 = arith.addf %632, %633 : vector<2x128xf32>
    %635 = arith.negf %634 : vector<2x128xf32>
    %636 = math.exp %635 : vector<2x128xf32>
    %cst_208 = arith.constant 1.000000e+00 : f32
    %637 = vector.broadcast %cst_208 : f32 to vector<2x128xf32>
    %638 = arith.addf %637, %636 : vector<2x128xf32>
    %639 = arith.divf %637, %638 : vector<2x128xf32>
    %640 = vector.extract_strided_slice %625 {offsets = [0, 128], sizes = [2, 128], strides = [1, 1]} : vector<2x384xf32> to vector<2x128xf32>
    %641 = vector.extract_strided_slice %631 {offsets = [0, 128], sizes = [2, 128], strides = [1, 1]} : vector<2x384xf32> to vector<2x128xf32>
    %642 = arith.addf %640, %641 : vector<2x128xf32>
    %643 = arith.negf %642 : vector<2x128xf32>
    %644 = math.exp %643 : vector<2x128xf32>
    %cst_209 = arith.constant 1.000000e+00 : f32
    %645 = vector.broadcast %cst_209 : f32 to vector<2x128xf32>
    %646 = arith.addf %645, %644 : vector<2x128xf32>
    %647 = arith.divf %645, %646 : vector<2x128xf32>
    %648 = vector.extract_strided_slice %625 {offsets = [0, 256], sizes = [2, 128], strides = [1, 1]} : vector<2x384xf32> to vector<2x128xf32>
    %649 = vector.extract_strided_slice %631 {offsets = [0, 256], sizes = [2, 128], strides = [1, 1]} : vector<2x384xf32> to vector<2x128xf32>
    %650 = arith.mulf %639, %649 : vector<2x128xf32>
    %651 = arith.addf %648, %650 : vector<2x128xf32>
    %652 = math.tanh %651 : vector<2x128xf32>
    %cst_210 = arith.constant 1.000000e+00 : f32
    %653 = vector.broadcast %cst_210 : f32 to vector<2x128xf32>
    %654 = arith.subf %653, %647 : vector<2x128xf32>
    %655 = arith.mulf %654, %652 : vector<2x128xf32>
    %656 = arith.mulf %647, %619 : vector<2x128xf32>
    %657 = arith.addf %655, %656 : vector<2x128xf32>
    %658 = arith.mulf %627, %657 : vector<2x128xf32>
    %cst_211 = arith.constant 1.000000e+00 : f32
    %659 = vector.broadcast %cst_211 : f32 to vector<2x128xf32>
    %660 = arith.subf %659, %627 : vector<2x128xf32>
    %661 = arith.mulf %660, %619 : vector<2x128xf32>
    %662 = arith.addf %658, %661 : vector<2x128xf32>
    %663 = arith.mulf %627, %657 : vector<2x128xf32>
    %c0_212 = arith.constant 0 : index
    %c6_213 = arith.constant 6 : index
    %c0_214 = arith.constant 0 : index
    %664 = vector.load %arg20[%c0_212, %c6_213, %c0_214] : memref<2x8x128xf32, #tpu.memory_space<vmem>>, vector<2x1x128xf32>
    %665 = vector.shape_cast %664 : vector<2x1x128xf32> to vector<2x128xf32>
    %666 = vector.shape_cast %663 : vector<2x128xf32> to vector<2x1x128xf32>
    tpu.vector_store %arg20[%c0_212, %c6_213, %c0_214], %666 {strides = array<i32>} : memref<2x8x128xf32, #tpu.memory_space<vmem>>, vector<2x1x128xf32>,
    %c7_215 = arith.constant 7 : index
    %c0_216 = arith.constant 0 : index
    %c0_217 = arith.constant 0 : index
    %667 = vector.load %arg6[%c7_215, %c0_216, %c0_217] : memref<8x2x384xf32, #tpu.memory_space<vmem>>, vector<1x2x384xf32>
    %668 = vector.shape_cast %667 : vector<1x2x384xf32> to vector<2x384xf32>
    %c7_218 = arith.constant 7 : index
    %c0_219 = arith.constant 0 : index
    %c0_220 = arith.constant 0 : index
    %669 = vector.load %arg7[%c7_218, %c0_219, %c0_220] : memref<8x2x128xf32, #tpu.memory_space<vmem>>, vector<1x2x128xf32>
    %670 = vector.shape_cast %669 : vector<1x2x128xf32> to vector<2x128xf32>
    %671 = arith.truncf %662 : vector<2x128xf32> to vector<2x128xbf16>
    %cst_221 = arith.constant dense<0.000000e+00> : vector<2x384xf32>
    %672 = tpu.matmul %671, %364, %cst_221 {dimension_numbers = #tpu.dot_dimension_numbers<[1], [0], [0], [1], [0, 0, 1, 1], [], []>} : vector<2x128xbf16>, vector<128x384xbf16>, vector<2x384xf32> -> vector<2x384xf32>
    %673 = vector.broadcast %365 : vector<1x384xf32> to vector<2x384xf32>
    %674 = arith.addf %672, %673 : vector<2x384xf32>
    %675 = vector.extract_strided_slice %668 {offsets = [0, 0], sizes = [2, 128], strides = [1, 1]} : vector<2x384xf32> to vector<2x128xf32>
    %676 = vector.extract_strided_slice %674 {offsets = [0, 0], sizes = [2, 128], strides = [1, 1]} : vector<2x384xf32> to vector<2x128xf32>
    %677 = arith.addf %675, %676 : vector<2x128xf32>
    %678 = arith.negf %677 : vector<2x128xf32>
    %679 = math.exp %678 : vector<2x128xf32>
    %cst_222 = arith.constant 1.000000e+00 : f32
    %680 = vector.broadcast %cst_222 : f32 to vector<2x128xf32>
    %681 = arith.addf %680, %679 : vector<2x128xf32>
    %682 = arith.divf %680, %681 : vector<2x128xf32>
    %683 = vector.extract_strided_slice %668 {offsets = [0, 128], sizes = [2, 128], strides = [1, 1]} : vector<2x384xf32> to vector<2x128xf32>
    %684 = vector.extract_strided_slice %674 {offsets = [0, 128], sizes = [2, 128], strides = [1, 1]} : vector<2x384xf32> to vector<2x128xf32>
    %685 = arith.addf %683, %684 : vector<2x128xf32>
    %686 = arith.negf %685 : vector<2x128xf32>
    %687 = math.exp %686 : vector<2x128xf32>
    %cst_223 = arith.constant 1.000000e+00 : f32
    %688 = vector.broadcast %cst_223 : f32 to vector<2x128xf32>
    %689 = arith.addf %688, %687 : vector<2x128xf32>
    %690 = arith.divf %688, %689 : vector<2x128xf32>
    %691 = vector.extract_strided_slice %668 {offsets = [0, 256], sizes = [2, 128], strides = [1, 1]} : vector<2x384xf32> to vector<2x128xf32>
    %692 = vector.extract_strided_slice %674 {offsets = [0, 256], sizes = [2, 128], strides = [1, 1]} : vector<2x384xf32> to vector<2x128xf32>
    %693 = arith.mulf %682, %692 : vector<2x128xf32>
    %694 = arith.addf %691, %693 : vector<2x128xf32>
    %695 = math.tanh %694 : vector<2x128xf32>
    %cst_224 = arith.constant 1.000000e+00 : f32
    %696 = vector.broadcast %cst_224 : f32 to vector<2x128xf32>
    %697 = arith.subf %696, %690 : vector<2x128xf32>
    %698 = arith.mulf %697, %695 : vector<2x128xf32>
    %699 = arith.mulf %690, %662 : vector<2x128xf32>
    %700 = arith.addf %698, %699 : vector<2x128xf32>
    %701 = arith.mulf %670, %700 : vector<2x128xf32>
    %c0_225 = arith.constant 0 : index
    %c7_226 = arith.constant 7 : index
    %c0_227 = arith.constant 0 : index
    %702 = vector.load %arg20[%c0_225, %c7_226, %c0_227] : memref<2x8x128xf32, #tpu.memory_space<vmem>>, vector<2x1x128xf32>
    %703 = vector.shape_cast %702 : vector<2x1x128xf32> to vector<2x128xf32>
    %704 = vector.shape_cast %701 : vector<2x128xf32> to vector<2x1x128xf32>
    tpu.vector_store %arg20[%c0_225, %c7_226, %c0_227], %704 {strides = array<i32>} : memref<2x8x128xf32, #tpu.memory_space<vmem>>, vector<2x1x128xf32>,
    %c0_228 = arith.constant 0 : index
    %c0_229 = arith.constant 0 : index
    %c0_230 = arith.constant 0 : index
    %705 = vector.load %arg20[%c0_228, %c0_229, %c0_230] : memref<2x8x128xf32, #tpu.memory_space<vmem>>, vector<2x8x128xf32>
    %c0_231 = arith.constant 0 : index
    %c0_232 = arith.constant 0 : index
    %c0_233 = arith.constant 0 : index
    %706 = vector.load %arg19[%c0_231, %c0_232, %c0_233] : memref<2x8x128xf32, #tpu.memory_space<vmem>>, vector<2x8x128xf32>
    %707 = vector.shape_cast %706 : vector<2x8x128xf32> to vector<16x128xf32>
    %c0_234 = arith.constant 0 : index
    %c0_235 = arith.constant 0 : index
    %708 = vector.load %arg11[%c0_234, %c0_235] : memref<128x128xf32, #tpu.memory_space<vmem>>, vector<128x128xf32>
    %cst_236 = arith.constant dense<0.000000e+00> : vector<16x128xf32>
    %709 = tpu.matmul %707, %708, %cst_236 {dimension_numbers = #tpu.dot_dimension_numbers<[1], [0], [0], [1], [0, 0, 1, 1], [], []>} : vector<16x128xf32>, vector<128x128xf32>, vector<16x128xf32> -> vector<16x128xf32>
    %710 = vector.shape_cast %709 : vector<16x128xf32> to vector<2x8x128xf32>
    "tpu.trace_start"() <{level = 10 : i32, message = "byh,bxh->byx"}> : () -> ()
    %cst_237 = arith.constant dense<0.000000e+00> : vector<2x8x8xf32>
    %711 = tpu.matmul %705, %710, %cst_237 {dimension_numbers = #tpu.dot_dimension_numbers<[2], [2], [1], [1], [0, 0, 0, 1, 1, 1], [0], [0]>} : vector<2x8x128xf32>, vector<2x8x128xf32>, vector<2x8x8xf32> -> vector<2x8x8xf32>
    "tpu.trace_stop"() : () -> ()
    %c0_238 = arith.constant 0 : index
    %c0_239 = arith.constant 0 : index
    %c0_240 = arith.constant 0 : index
    %712 = vector.load %arg8[%c0_238, %c0_239, %c0_240] : memref<2x8x8xf32, #tpu.memory_space<vmem>>, vector<2x8x8xf32>
    %cst_241 = arith.constant 5.000000e-01 : f32
    %713 = vector.broadcast %cst_241 : f32 to vector<2x8x8xf32>
    %714 = arith.cmpf ogt, %712, %713 : vector<2x8x8xf32>
    %cst_242 = arith.constant -1.000000e+06 : f32
    %715 = vector.broadcast %cst_242 : f32 to vector<2x8x8xf32>
    %716 = arith.select %714, %711, %715 : vector<2x8x8xi1>, vector<2x8x8xf32>
    %cst_243 = arith.constant dense<0xFF800000> : vector<2x8xf32>
    %717 = vector.multi_reduction <maximumf>, %716, %cst_243 [2] : vector<2x8x8xf32> to vector<2x8xf32>
    %718 = vector.shape_cast %717 : vector<2x8xf32> to vector<2x8x1xf32>
    %719 = vector.broadcast %718 : vector<2x8x1xf32> to vector<2x8x8xf32>
    %720 = arith.subf %716, %719 : vector<2x8x8xf32>
    %721 = math.exp %720 : vector<2x8x8xf32>
    %cst_244 = arith.constant dense<0.000000e+00> : vector<2x8xf32>
    %722 = vector.multi_reduction <add>, %721, %cst_244 [2] : vector<2x8x8xf32> to vector<2x8xf32>
    %723 = vector.shape_cast %722 : vector<2x8xf32> to vector<2x8x1xf32>
    %724 = vector.broadcast %723 : vector<2x8x1xf32> to vector<2x8x8xf32>
    %725 = arith.divf %721, %724 : vector<2x8x8xf32>
    %c0_245 = arith.constant 0 : index
    %c0_246 = arith.constant 0 : index
    %c0_247 = arith.constant 0 : index
    %726 = vector.load %arg18[%c0_245, %c0_246, %c0_247] : memref<2x8x8xf32, #tpu.memory_space<vmem>>, vector<2x8x8xf32>
    tpu.vector_store %arg18[%c0_245, %c0_246, %c0_247], %725 {strides = array<i32>} : memref<2x8x8xf32, #tpu.memory_space<vmem>>, vector<2x8x8xf32>,
    "tpu.trace_start"() <{level = 10 : i32, message = "byx,bxh->byh"}> : () -> ()
    %cst_248 = arith.constant dense<0.000000e+00> : vector<2x8x128xf32>
    %727 = tpu.matmul %725, %706, %cst_248 {dimension_numbers = #tpu.dot_dimension_numbers<[2], [1], [1], [2], [0, 0, 0, 1, 1, 2], [0], [0]>} : vector<2x8x8xf32>, vector<2x8x128xf32>, vector<2x8x128xf32> -> vector<2x8x128xf32>
    "tpu.trace_stop"() : () -> ()
    %728 = vector.shape_cast %727 : vector<2x8x128xf32> to vector<16x128xf32>
    %c0_249 = arith.constant 0 : index
    %c0_250 = arith.constant 0 : index
    %729 = vector.load %arg12[%c0_249, %c0_250] : memref<128x128xf32, #tpu.memory_space<vmem>>, vector<128x128xf32>
    %cst_251 = arith.constant dense<0.000000e+00> : vector<16x128xf32>
    %730 = tpu.matmul %728, %729, %cst_251 {dimension_numbers = #tpu.dot_dimension_numbers<[1], [0], [0], [1], [0, 0, 1, 1], [], []>} : vector<16x128xf32>, vector<128x128xf32>, vector<16x128xf32> -> vector<16x128xf32>
    %731 = vector.shape_cast %705 : vector<2x8x128xf32> to vector<16x128xf32>
    %c0_252 = arith.constant 0 : index
    %c0_253 = arith.constant 0 : index
    %732 = vector.load %arg13[%c0_252, %c0_253] : memref<128x128xf32, #tpu.memory_space<vmem>>, vector<128x128xf32>
    %cst_254 = arith.constant dense<0.000000e+00> : vector<16x128xf32>
    %733 = tpu.matmul %731, %732, %cst_254 {dimension_numbers = #tpu.dot_dimension_numbers<[1], [0], [0], [1], [0, 0, 1, 1], [], []>} : vector<16x128xf32>, vector<128x128xf32>, vector<16x128xf32> -> vector<16x128xf32>
    %734 = arith.addf %730, %733 : vector<16x128xf32>
    %c0_255 = arith.constant 0 : index
    %c0_256 = arith.constant 0 : index
    %735 = vector.load %arg14[%c0_255, %c0_256] : memref<1x128xf32, #tpu.memory_space<vmem>>, vector<1x128xf32>
    %736 = vector.broadcast %735 : vector<1x128xf32> to vector<16x128xf32>
    %737 = arith.addf %734, %736 : vector<16x128xf32>
    %738 = math.tanh %737 : vector<16x128xf32>
    %c0_257 = arith.constant 0 : index
    %c0_258 = arith.constant 0 : index
    %739 = vector.load %arg15[%c0_257, %c0_258] : memref<128x128xf32, #tpu.memory_space<vmem>>, vector<128x128xf32>
    %cst_259 = arith.constant dense<0.000000e+00> : vector<16x128xf32>
    %740 = tpu.matmul %738, %739, %cst_259 {dimension_numbers = #tpu.dot_dimension_numbers<[1], [0], [0], [1], [0, 0, 1, 1], [], []>} : vector<16x128xf32>, vector<128x128xf32>, vector<16x128xf32> -> vector<16x128xf32>
    %c0_260 = arith.constant 0 : index
    %c0_261 = arith.constant 0 : index
    %741 = vector.load %arg16[%c0_260, %c0_261] : memref<1x128xf32, #tpu.memory_space<vmem>>, vector<1x128xf32>
    %742 = vector.broadcast %741 : vector<1x128xf32> to vector<16x128xf32>
    %743 = arith.addf %740, %742 : vector<16x128xf32>
    %cst_262 = arith.constant dense<0xFF800000> : vector<16xf32>
    %744 = vector.multi_reduction <maximumf>, %743, %cst_262 [1] : vector<16x128xf32> to vector<16xf32>
    %745 = vector.shape_cast %744 : vector<16xf32> to vector<16x1xf32>
    %746 = vector.broadcast %745 : vector<16x1xf32> to vector<16x128xf32>
    %747 = arith.subf %743, %746 : vector<16x128xf32>
    %748 = math.exp %747 : vector<16x128xf32>
    %cst_263 = arith.constant dense<0.000000e+00> : vector<16xf32>
    %749 = vector.multi_reduction <add>, %748, %cst_263 [1] : vector<16x128xf32> to vector<16xf32>
    %750 = vector.shape_cast %749 : vector<16xf32> to vector<16x1xf32>
    %751 = math.log %750 : vector<16x1xf32>
    %752 = arith.addf %751, %745 : vector<16x1xf32>
    %753 = vector.broadcast %752 : vector<16x1xf32> to vector<16x128xf32>
    %754 = arith.subf %743, %753 : vector<16x128xf32>
    %755 = vector.shape_cast %754 : vector<16x128xf32> to vector<2x8x128xf32>
    %c0_264 = arith.constant 0 : index
    %c0_265 = arith.constant 0 : index
    %c0_266 = arith.constant 0 : index
    %756 = vector.load %arg17[%c0_264, %c0_265, %c0_266] : memref<2x8x128xf32, #tpu.memory_space<vmem>>, vector<2x8x128xf32>
    tpu.vector_store %arg17[%c0_264, %c0_265, %c0_266], %755 {strides = array<i32>} : memref<2x8x128xf32, #tpu.memory_space<vmem>>, vector<2x8x128xf32>,
    return
  }
}

</mosaic_0001>

<bundles_post_ra>
// kernel: seq2seq_forward.1
= control target key start
LH: loop header
LB: loop body
LE: loop exit
PB: predicated region body
PF: predicated region fallthrough
CT: control target
= control target key end

     0   :  { %s6890_s0 = inlined_call_operand.vmem [shape: f32[8,2,384], index: 0, kind: input, shape index: {}]   ;;  %s6891_s1 = inlined_call_operand.vmem [shape: f32[8,2,128], index: 1, kind: input, shape index: {}]   ;;  %s6892_s2 = inlined_call_operand.vmem [shape: bf16[128,384], index: 2, kind: input, shape index: {}]   ;;  %s6893_s3 = inlined_call_operand.hbm [shape: f32[1,384], index: 3, kind: input, shape index: {}]   ;;  %s6894_s4 = inlined_call_operand.vmem [shape: f32[128,128], index: 4, kind: input, shape index: {}]   ;;  %s6895_s5 = inlined_call_operand.hbm [shape: f32[1,128], index: 5, kind: input, shape index: {}]   ;;  %s6896_s6 = inlined_call_operand.vmem [shape: f32[8,2,384], index: 6, kind: input, shape index: {}]   ;;  %s6897_s7 = inlined_call_operand.vmem [shape: f32[8,2,128], index: 7, kind: input, shape index: {}]   ;;  %s6898_s8 = inlined_call_operand.vmem [shape: f32[2,8,8], index: 8, kind: input, shape index: {}]   ;;  %s6899_s9 = inlined_call_operand.vmem [shape: bf16[128,384], index: 9, kind: input, shape index: {}]   ;;  %s6900_s10 = inlined_call_operand.hbm [shape: f32[1,384], index: 10, kind: input, shape index: {}]   ;;  %s6901_s11 = inlined_call_operand.vmem [shape: f32[128,128], index: 11, kind: input, shape index: {}]   ;;  %s6902_s12 = inlined_call_operand.vmem [shape: f32[128,128], index: 12, kind: input, shape index: {}]   ;;  %s6903_s13 = inlined_call_operand.vmem [shape: f32[128,128], index: 13, kind: input, shape index: {}]   ;;  %s6904_s14 = inlined_call_operand.hbm [shape: f32[1,128], index: 14, kind: input, shape index: {}]   ;;  %s6905_s15 = inlined_call_operand.vmem [shape: f32[128,128], index: 15, kind: input, shape index: {}]   ;;  %s6906_s16 = inlined_call_operand.hbm [shape: f32[1,128], index: 16, kind: input, shape index: {}]   ;;  %s6907_s17 = inlined_call_operand.hbm [shape: f32[2,8,128], index: 17, kind: output, shape index: {0}]   ;;  %s6908_s18 = inlined_call_operand.hbm [shape: f32[2,8,8], index: 18, kind: output, shape index: {1}]  }
   0x1   :  { %6912 = sst [smem:[#allocation21_spill]] %s6890_s0 }
   0x2   :  { %6913 = sst [smem:[#allocation22_spill]] %s6891_s1 }
   0x3   :  { %6914 = sst [smem:[#allocation23_spill]] %s6892_s2 }
   0x4   :  { %24 = vsyncpa [#allocation5], 0 }
   0x5   :  { %25 = vsyncpa [#allocation8], 0 }
   0x6   :  { %26 = vsyncpa [#allocation11], 0 }
   0x7   :  { %27 = vsyncpa [#allocation6], 0 }
   0x8   :  { %28 = vsyncpa [#allocation15], 0  ;;  %s5147_s27 = smov [#allocation7]   ;;  %s5148_s29 = smov [#allocation10]  }
   0x9   :  { %s53_s28 = sshll.u32 %s5147_s27, 4  ;;  %s87_s30 = sshll.u32 %s5148_s29, 4  ;;  %s54_s28 = int_to_ptr.vmem [resolvable:$true] %s53_s28  ;;  %s88_s30 = int_to_ptr.vmem [resolvable:$true] %s87_s30 }
   0xa   :  { %s4983_s1 = scalar_lea.hbm %s6895_s5, 16 }
   0xb   :  { %p4984_p0 = scmp.ne.s32.totalorder %s6895_s5, %s4983_s1  ;;  %p4987_p1 = scmp.lt.u32.totalorder %s4983_s1, %s6895_s5 }
   0xd   :  { %p4989_p2 = pnand %p4987_p1, %p4984_p0 }
   0xf   :  { %4992 = shalt.err (!%p4989_p2)
}
  0x10   :  { %s4993_s23 = scalar_lea.vmem %s54_s28, 16  ;;  %s4997_s24 = scalar_lea.vmem %s54_s28, 32 }
  0x11   :  { %p4994_p3 = scmp.ne.s32.totalorder %s54_s28, %s4993_s23  ;;  %p4998_p4 = scmp.lt.s32.totalorder %s54_s28, %s54_s28 }
  0x12   :  { %p4999_p5 = scmp.lt.s32.totalorder %s4997_s24, %s4993_s23 }
  0x14   :  { %p5000_p6 = por %p4999_p5, %p4998_p4 }
  0x16   :  { %p5001_p7 = pnand %p5000_p6, %p4994_p3 }
  0x18   :  { %5004 = shalt.err (!%p5001_p7)
}
  0x19   :  { %56 = dma.hbm_to_vmem [thread:$0]  %s6895_s5, 16, %s54_s28, [#allocation8]  }
  0x1a   :  { %s5005_s0 = scalar_lea.hbm %s6904_s14, 16 }
  0x1b   :  { %p5006_p8 = scmp.ne.s32.totalorder %s6904_s14, %s5005_s0  ;;  %p5009_p9 = scmp.lt.u32.totalorder %s5005_s0, %s6904_s14 }
  0x1d   :  { %p5011_p10 = pnand %p5009_p9, %p5006_p8 }
  0x1f   :  { %5014 = shalt.err (!%p5011_p10)
}
  0x20   :  { %s5015_s22 = scalar_lea.vmem %s88_s30, 16  ;;  %s5019_s2 = scalar_lea.vmem %s88_s30, 32 }
  0x21   :  { %p5016_p11 = scmp.ne.s32.totalorder %s88_s30, %s5015_s22  ;;  %p5020_p12 = scmp.lt.s32.totalorder %s88_s30, %s88_s30 }
  0x22   :  { %p5021_p13 = scmp.lt.s32.totalorder %s5019_s2, %s5015_s22 }
  0x24   :  { %p5022_p0 = por %p5021_p13, %p5020_p12 }
  0x26   :  { %p5023_p1 = pnand %p5022_p0, %p5016_p11 }
  0x28   :  { %5026 = shalt.err (!%p5023_p1)
}
  0x29   :  { %90 = dma.hbm_to_vmem [thread:$0]  %s6904_s14, 16, %s88_s30, [#allocation11]  }
  0x2a   :  { %s5149_s23 = smov [#allocation4]   ;;  %s5150_s25 = smov [#allocation9]  }
  0x2b   :  { %s41_s24 = sshll.u32 %s5149_s23, 4  ;;  %s71_s26 = sshll.u32 %s5150_s25, 4  ;;  %s42_s24 = int_to_ptr.vmem [resolvable:$true] %s41_s24  ;;  %s72_s26 = int_to_ptr.vmem [resolvable:$true] %s71_s26 }
  0x2c   :  { %s5027_s0 = scalar_lea.hbm %s6893_s3, 48 }
  0x2d   :  { %p5028_p2 = scmp.ne.s32.totalorder %s6893_s3, %s5027_s0  ;;  %p5031_p3 = scmp.lt.u32.totalorder %s5027_s0, %s6893_s3 }
  0x2f   :  { %p5033_p4 = pnand %p5031_p3, %p5028_p2 }
  0x31   :  { %5036 = shalt.err (!%p5033_p4)
}
  0x32   :  { %s5037_s14 = scalar_lea.vmem %s42_s24, 48  ;;  %s5041_s30 = scalar_lea.vmem %s42_s24, 64 }
  0x33   :  { %p5038_p5 = scmp.ne.s32.totalorder %s42_s24, %s5037_s14  ;;  %p5042_p6 = scmp.lt.s32.totalorder %s42_s24, %s42_s24 }
  0x34   :  { %p5043_p7 = scmp.lt.s32.totalorder %s5041_s30, %s5037_s14 }
  0x36   :  { %p5044_p8 = por %p5043_p7, %p5042_p6 }
  0x38   :  { %p5045_p9 = pnand %p5044_p8, %p5038_p5 }
  0x3a   :  { %5048 = shalt.err (!%p5045_p9)
}
  0x3b   :  { %44 = dma.hbm_to_vmem [thread:$0]  %s6893_s3, 48, %s42_s24, [#allocation5]  }
  0x3c   :  { %s5049_s23 = scalar_lea.hbm %s6900_s10, 48 }
  0x3d   :  { %p5050_p10 = scmp.ne.s32.totalorder %s6900_s10, %s5049_s23  ;;  %p5053_p11 = scmp.lt.u32.totalorder %s5049_s23, %s6900_s10 }
  0x3f   :  { %p5055_p12 = pnand %p5053_p11, %p5050_p10 }
  0x41   :  { %5058 = shalt.err (!%p5055_p12)
}
  0x42   :  { %s5059_s19 = scalar_lea.vmem %s72_s26, 48  ;;  %s5063_s1 = scalar_lea.vmem %s72_s26, 64 }
  0x43   :  { %p5060_p13 = scmp.ne.s32.totalorder %s72_s26, %s5059_s19  ;;  %p5064_p0 = scmp.lt.s32.totalorder %s72_s26, %s72_s26 }
  0x44   :  { %p5065_p1 = scmp.lt.s32.totalorder %s5063_s1, %s5059_s19 }
  0x46   :  { %p5066_p2 = por %p5065_p1, %p5064_p0 }
  0x48   :  { %p5067_p3 = pnand %p5066_p2, %p5060_p13 }
  0x4a   :  { %5070 = shalt.err (!%p5067_p3)
}
  0x4b   :  { %74 = dma.hbm_to_vmem [thread:$0]  %s6900_s10, 48, %s72_s26, [#allocation8]  }
  0x4c   :  { %s5151_s20 = smov [#allocation12]   ;;  %s5071_s22 = scalar_lea.hbm %s6906_s16, 16 }
  0x4d   :  { %s99_s21 = sshll.u32 %s5151_s20, 4  ;;  %p5072_p4 = scmp.ne.s32.totalorder %s6906_s16, %s5071_s22  ;;  %s100_s21 = int_to_ptr.vmem [resolvable:$true] %s99_s21 }
  0x4e   :  { %p5075_p5 = scmp.lt.u32.totalorder %s5071_s22, %s6906_s16 }
  0x50   :  { %p5077_p6 = pnand %p5075_p5, %p5072_p4 }
  0x52   :  { %5080 = shalt.err (!%p5077_p6)
}
  0x53   :  { %s5081_s25 = scalar_lea.vmem %s100_s21, 16  ;;  %s5085_s10 = scalar_lea.vmem %s100_s21, 32 }
  0x54   :  { %p5082_p7 = scmp.ne.s32.totalorder %s100_s21, %s5081_s25  ;;  %p5086_p8 = scmp.lt.s32.totalorder %s100_s21, %s100_s21 }
  0x55   :  { %p5087_p9 = scmp.lt.s32.totalorder %s5085_s10, %s5081_s25 }
  0x57   :  { %p5088_p10 = por %p5087_p9, %p5086_p8 }
  0x59   :  { %p5089_p11 = pnand %p5088_p10, %p5082_p7 }
  0x5b   :  { %5092 = shalt.err (!%p5089_p11)
}
  0x5c   :  { %102 = dma.hbm_to_vmem [thread:$0]  %s6906_s16, 16, %s100_s21, [#allocation11]  }
  0x5d   :  { %5137 = dma.done.wait [#allocation5], 48  }
  0x5e   :  { %5138 = vsyncadd [#allocation5], 4294967248 }
  0x5f   :  { %5139 = dma.done.wait [#allocation8], 64  }
  0x60   :  { %5140 = vsyncadd [#allocation8], 4294967232 }
  0x61   :  { %5141 = dma.done.wait [#allocation11], 32  }
  0x62   :  { %5142 = vsyncadd [#allocation11], 4294967264  ;;  %v5152_v0 = vmov 0.0   ;;  %v5153_v1 = vmov 0   ;;  %vm5154_vm0 = vmmov 0   ;;  %s6915_s19 = sld [smem:[#allocation23_spill]]  ;;  %v155_v26 = vlaneseq }
  0x63   :  { %4006 = vmatprep.subr.bf16.mxu1 %v5152_v0  ;;  %330 = vmatprep.mubr.bf16.mxu0 %v5153_v1  ;;  %v151_v29 = vld [vmem:[#allocation4] sm:$0x7]  ;;  %s6916_s5 = sld [smem:[#allocation21_spill]]  ;;  %s6917_s25 = sld [smem:[#allocation22_spill]]  ;;  %vm3099_vm3 = vcmask 64512  }
  0x64   :  { %4022 = vmatprep.mubr.msk.bf16.mxu1 %vm5154_vm0, %v5152_v0  ;;  %v5511_v27 = vshrl.u32 %v155_v26, 7 }
  0x66   :  { %v157_v28 = vsub.s32 0, %v5511_v27  ;;  %v161_v30 = vsub.s32 1, %v5511_v27  ;;  %v165_v51 = vsub.s32 2, %v5511_v27 }
  0x68   :  { %v5323_v2 = vld [vmem:[%s6915_s19 + $0x4] ss:$12 sps:$4 sm:$0xff]   ;;  %v5328_v3 = vld [vmem:[%s6915_s19] ss:$12 sps:$4 sm:$0xff]   ;;  %v5334_v4 = vld [vmem:[%s6915_s19 + $0x1c] ss:$12 sps:$4 sm:$0xff]   ;;  %v5517_v31 = vrot.slane %v151_v29, %v157_v28  ;;  %v5521_v32 = vrot.slane %v151_v29, %v161_v30  ;;  %v5531_v52 = vrot.slane %v151_v29, %v165_v51 }
  0x69   :  { %298 = vmatprep.subr.bf16.mxu0 %v5323_v2  ;;  %v5340_v5 = vld [vmem:[%s6915_s19 + $0x18] ss:$12 sps:$4 sm:$0xff]   ;;  %v5346_v6 = vld [vmem:[%s6915_s19 + $0x34] ss:$12 sps:$4 sm:$0xff]   ;;  %v5352_v7 = vld [vmem:[%s6915_s19 + $0x30] ss:$12 sps:$4 sm:$0xff]  }
  0x6a   :  { %299 = vmatpush1.bf16.msra.mxu0 %v5328_v3  ;;  %v5358_v8 = vld [vmem:[%s6915_s19 + $0x4c] ss:$12 sps:$4 sm:$0xff]   ;;  %v5363_v9 = vld [vmem:[%s6915_s19 + $0x8] ss:$12 sps:$4 sm:$0xff]   ;;  %v5374_v11 = vld [vmem:[%s6915_s19 + $0x64] ss:$12 sps:$4 sm:$0xff]  }
  0x6b   :  { %300 = vmatprep.subr.bf16.mxu0 %v5334_v4  ;;  %v5369_v10 = vld [vmem:[%s6915_s19 + $0x48] ss:$12 sps:$4 sm:$0xff]   ;;  %4007 = vmatpush3.bf16.msra.mxu1 %v5363_v9  ;;  %v5381_v12 = vld [vmem:[%s6915_s19 + $0x20] ss:$12 sps:$4 sm:$0xff]   ;;  %v5400_v15 = vld [vmem:[%s6915_s19 + $0x38] ss:$12 sps:$4 sm:$0xff]  }
  0x6c   :  { %4008 = vmatprep.subr.bf16.mxu1 %v5152_v0  ;;  %v5387_v13 = vld [vmem:[%s6915_s19 + $0x60] ss:$12 sps:$4 sm:$0xff]   ;;  %v5393_v14 = vld [vmem:[%s6915_s19 + $0x7c] ss:$12 sps:$4 sm:$0xff]   ;;  %v5406_v16 = vld [vmem:[%s6915_s19 + $0x78] ss:$12 sps:$4 sm:$0xff]  }
  0x6d   :  { %v5411_v17 = vld [vmem:[%s6915_s19 + $0x94] ss:$12 sps:$4 sm:$0xff]   ;;  %v5417_v18 = vld [vmem:[%s6915_s19 + $0x50] ss:$12 sps:$4 sm:$0xff]   ;;  %v5430_v20 = vld [vmem:[%s6915_s19 + $0xac] ss:$12 sps:$4 sm:$0xff]  }
  0x6e   :  { %301 = vmatpush1.bf16.msra.mxu0 %v5340_v5  ;;  %v5424_v19 = vld [vmem:[%s6915_s19 + $0x90] ss:$12 sps:$4 sm:$0xff]   ;;  %v5435_v21 = vld [vmem:[%s6915_s19 + $0x68] ss:$12 sps:$4 sm:$0xff]   ;;  %v5449_v23 = vld [vmem:[%s6915_s19 + $0x80] ss:$12 sps:$4 sm:$0xff]  }
  0x6f   :  { %302 = vmatprep.subr.bf16.mxu0 %v5346_v6  ;;  %4009 = vmatpush3.bf16.msra.mxu1 %v5381_v12  ;;  %v5443_v22 = vld [vmem:[%s6915_s19 + $0xa8] ss:$12 sps:$4 sm:$0xff]   ;;  %v5460_v24 = vld [vmem:[%s6915_s19 + $0x98] ss:$12 sps:$4 sm:$0xff]   ;;  %v5471_v25 = vld [vmem:[%s6915_s19 + $0xb0] ss:$12 sps:$4 sm:$0xff]  }
  0x70   :  { %4010 = vmatprep.subr.bf16.mxu1 %v5152_v0  ;;  %v152_v33 = vld [vmem:[%s6916_s5] sm:$0x3f] }
  0x71   :  { %v387_v38 = vrot.slane %v152_v33, 2  ;;  %v397_v56 = vrot.slane %v152_v33, 4  ;;  %v153_v61 = vld [vmem:[%s6917_s25] sm:$0x3] }
  0x72   :  { %303 = vmatpush1.bf16.msra.mxu0 %v5352_v7  ;;  %v406_v63 = vsub.f32 1.0, %v153_v61 }
  0x73   :  { %304 = vmatprep.subr.bf16.mxu0 %v5358_v8  ;;  %4011 = vmatpush3.bf16.msra.mxu1 %v5400_v15 }
  0x74   :  { %4012 = vmatprep.subr.bf16.mxu1 %v5152_v0 }
  0x76   :  { %305 = vmatpush1.bf16.msra.mxu0 %v5369_v10 }
  0x77   :  { %306 = vmatprep.subr.bf16.mxu0 %v5374_v11  ;;  %4013 = vmatpush3.bf16.msra.mxu1 %v5417_v18 }
  0x78   :  { %4014 = vmatprep.subr.bf16.mxu1 %v5152_v0 }
  0x7a   :  { %307 = vmatpush1.bf16.msra.mxu0 %v5387_v13 }
  0x7b   :  { %308 = vmatprep.subr.bf16.mxu0 %v5393_v14  ;;  %4015 = vmatpush3.bf16.msra.mxu1 %v5435_v21 }
  0x7c   :  { %4016 = vmatprep.subr.bf16.mxu1 %v5152_v0 }
  0x7e   :  { %309 = vmatpush1.bf16.msra.mxu0 %v5406_v16 }
  0x7f   :  { %310 = vmatprep.subr.bf16.mxu0 %v5411_v17  ;;  %4017 = vmatpush3.bf16.msra.mxu1 %v5449_v23 }
  0x80   :  { %4018 = vmatprep.subr.bf16.mxu1 %v5152_v0 }
  0x82   :  { %311 = vmatpush1.bf16.msra.mxu0 %v5424_v19 }
  0x83   :  { %312 = vmatprep.subr.bf16.mxu0 %v5430_v20  ;;  %4019 = vmatpush3.bf16.msra.mxu1 %v5460_v24 }
  0x84   :  { %4020 = vmatprep.subr.bf16.mxu1 %v5152_v0 }
  0x86   :  { %313 = vmatpush1.bf16.msra.mxu0 %v5443_v22 }
  0x87   :  { %414 = vmatprep.subr.bf16.mxu0 %v5323_v2  ;;  %4021 = vmatpush3.bf16.msra.mxu1 %v5471_v25 }
  0x88   :  { %4026 = vmatprep.subr.bf16.mxu1 %v5152_v0 }
  0x89   :  { %331 = vmatmul.mubr.bf16.vlgmr.msra.gmra.mrb[0].mxu0 %v5153_v1 }
  0x8a   :  { %415 = vmatpush1.bf16.msra.mxu0 %v5328_v3  ;;  %446 = vmatprep.mubr.bf16.mxu0 %v5153_v1 }
  0x8b   :  { %416 = vmatprep.subr.bf16.mxu0 %v5334_v4  ;;  %4023 = vmatmul.mubr.bf16.vlgmr.msra.gmra.mrb[0].mxu1 %v5153_v1 }
  0x8c   :  { %4027 = vmatpush3.bf16.msra.mxu1 %v5363_v9  ;;  %4042 = vmatprep.mubr.msk.bf16.mxu1 %vm5154_vm0, %v5152_v0 }
  0x8d   :  { %4028 = vmatprep.subr.bf16.mxu1 %v5152_v0 }
  0x8e   :  { %417 = vmatpush1.bf16.msra.mxu0 %v5340_v5 }
  0x8f   :  { %418 = vmatprep.subr.bf16.mxu0 %v5346_v6 }
  0x90   :  { %4029 = vmatpush3.bf16.msra.mxu1 %v5381_v12 }
  0x91   :  { %4030 = vmatprep.subr.bf16.mxu1 %v5152_v0 }
  0x92   :  { %419 = vmatpush1.bf16.msra.mxu0 %v5352_v7 }
  0x93   :  { %420 = vmatprep.subr.bf16.mxu0 %v5358_v8 }
  0x94   :  { %4031 = vmatpush3.bf16.msra.mxu1 %v5400_v15 }
  0x95   :  { %4032 = vmatprep.subr.bf16.mxu1 %v5152_v0 }
  0x96   :  { %421 = vmatpush1.bf16.msra.mxu0 %v5369_v10 }
  0x97   :  { %422 = vmatprep.subr.bf16.mxu0 %v5374_v11 }
  0x98   :  { %4033 = vmatpush3.bf16.msra.mxu1 %v5417_v18 }
  0x99   :  { %4034 = vmatprep.subr.bf16.mxu1 %v5152_v0 }
  0x9a   :  { %423 = vmatpush1.bf16.msra.mxu0 %v5387_v13 }
  0x9b   :  { %424 = vmatprep.subr.bf16.mxu0 %v5393_v14 }
  0x9c   :  { %4035 = vmatpush3.bf16.msra.mxu1 %v5435_v21 }
  0x9d   :  { %4036 = vmatprep.subr.bf16.mxu1 %v5152_v0 }
  0x9e   :  { %425 = vmatpush1.bf16.msra.mxu0 %v5406_v16 }
  0x9f   :  { %426 = vmatprep.subr.bf16.mxu0 %v5411_v17 }
  0xa0   :  { %4037 = vmatpush3.bf16.msra.mxu1 %v5449_v23 }
  0xa1   :  { %4038 = vmatprep.subr.bf16.mxu1 %v5152_v0 }
  0xa2   :  { %427 = vmatpush1.bf16.msra.mxu0 %v5424_v19 }
  0xa3   :  { %428 = vmatprep.subr.bf16.mxu0 %v5430_v20 }
  0xa4   :  { %4039 = vmatpush3.bf16.msra.mxu1 %v5460_v24 }
  0xa5   :  { %4040 = vmatprep.subr.bf16.mxu1 %v5152_v0 }
  0xa6   :  { %429 = vmatpush1.bf16.msra.mxu0 %v5443_v22 }
  0xa7   :  { %530 = vmatprep.subr.bf16.mxu0 %v5323_v2 }
  0xa8   :  { %4041 = vmatpush3.bf16.msra.mxu1 %v5471_v25 }
  0xa9   :  { %4046 = vmatprep.subr.bf16.mxu1 %v5152_v0 }
 0x15c   :  { %v332_v34 = vpop.f32.mrb[0].mxu0 }
 0x15d   :  { %v333_v35 = vadd.f32 %v332_v34, %v5517_v31  ;;  %v334_v36 = vpop.f32.mrb[1].mxu0 }
 0x15e   :  { %v335_v37 = vadd.f32 %v334_v36, %v5521_v32  ;;  %v336_v39 = vpop.f32.mrb[2].mxu0  ;;  %v373_v44 = vpop.f32.mrb[0].mxu1 }
 0x15f   :  { %v379_v40 = vadd.f32 %v333_v35, %v152_v33  ;;  %v337_v41 = vpop.f32.mrb[3].mxu0  ;;  %v4024_v46 = vpop.f32.mrb[1].mxu1  ;;  %v374_v55 = vadd.f32 %v373_v44, %v5531_v52 }
 0x160   :  { %v389_v43 = vadd.f32 %v387_v38, %v335_v37  ;;  %v376_v47 = vpop.f32.mrb[2].mxu1  ;;  %v407_v37 = vmul.f32 0.0, %v406_v63 }
 0x161   :  { %v3644_v42 = vmul.f32 -1.442695, %v379_v40  ;;  %v4025_v48 = vpop.f32.mrb[3].mxu1  ;;  %v3646_v40 = vld [vmem:[%s6916_s5 + $0x6] sm:$0x3f] }
 0x162   :  { %v3645_v45 = vmul.f32 -1.442695, %v389_v43  ;;  %v503_v47 = vrot.slane %v3646_v40, 2  ;;  %v513_v63 = vrot.slane %v3646_v40, 4 }
 0x163   :  { %4753 = vpow2.f32 %v3644_v42 }
 0x164   :  { %4755 = vpow2.f32 %v3645_v45 }
 0x16d   :  { %v4754_v49 = vpop.eup %4753 }
 0x16e   :  { %v383_v50 = vadd.f32 1.0, %v4754_v49  ;;  %v4756_v53 = vpop.eup %4755 }
 0x16f   :  { %v393_v54 = vadd.f32 1.0, %v4756_v53 }
 0x170   :  { %4757 = vrcp.f32 %v383_v50 }
 0x171   :  { %4759 = vrcp.f32 %v393_v54 }
 0x17a   :  { %v4758_v57 = vpop.eup %4757 }
 0x17b   :  { %v396_v58 = vmul.f32 %v4758_v57, %v374_v55  ;;  %v4760_v60 = vpop.eup %4759 }
 0x17c   :  { %v401_v62 = vsub.f32 1.0, %v4760_v60  ;;  %v403_v29 = vmul.f32 0.0, %v4760_v60 }
 0x17d   :  { %v399_v59 = vadd.f32 %v397_v56, %v396_v58 }
 0x17f   :  { %4761 = vtanh.f32 %v399_v59 }
 0x189   :  { %v4762_v34 = vpop.eup %4761 }
 0x18a   :  { %v402_v35 = vmul.f32 %v4762_v34, %v401_v62 }
 0x18c   :  { %v404_v36 = vadd.f32 %v403_v29, %v402_v35 }
 0x18e   :  { %v5537_v38 = vmul.f32 %v404_v36, %v153_v61 }
 0x190   :  { %v5540_v33 = vadd.f32 %v407_v37, %v5537_v38  ;;  %v3647_v37 = vld [vmem:[%s6917_s25 + $0x2] sm:$0x3] }
 0x192   :  { %v413_v39 = vpack.c.bf16 %v5540_v33, %v5540_v33 }
 0x194   :  { %447 = vmatmul.mubr.bf16.vlgmr.msra.gmra.mrb[4].mxu0 %v413_v39  ;;  %4043 = vmatmul.mubr.bf16.vlgmr.msra.gmra.mrb[4].mxu1 %v413_v39 }
 0x195   :  { %531 = vmatpush1.bf16.msra.mxu0 %v5328_v3  ;;  %4047 = vmatpush3.bf16.msra.mxu1 %v5363_v9 }
 0x196   :  { %532 = vmatprep.subr.bf16.mxu0 %v5334_v4  ;;  %4048 = vmatprep.subr.bf16.mxu1 %v5152_v0 }
 0x197   :  { %562 = vmatprep.mubr.bf16.mxu0 %v5153_v1  ;;  %4062 = vmatprep.mubr.msk.bf16.mxu1 %vm5154_vm0, %v5152_v0 }
 0x199   :  { %533 = vmatpush1.bf16.msra.mxu0 %v5340_v5  ;;  %4049 = vmatpush3.bf16.msra.mxu1 %v5381_v12 }
 0x19a   :  { %534 = vmatprep.subr.bf16.mxu0 %v5346_v6  ;;  %4050 = vmatprep.subr.bf16.mxu1 %v5152_v0 }
 0x19d   :  { %535 = vmatpush1.bf16.msra.mxu0 %v5352_v7  ;;  %4051 = vmatpush3.bf16.msra.mxu1 %v5400_v15 }
 0x19e   :  { %536 = vmatprep.subr.bf16.mxu0 %v5358_v8  ;;  %4052 = vmatprep.subr.bf16.mxu1 %v5152_v0 }
 0x1a1   :  { %537 = vmatpush1.bf16.msra.mxu0 %v5369_v10  ;;  %4053 = vmatpush3.bf16.msra.mxu1 %v5417_v18 }
 0x1a2   :  { %538 = vmatprep.subr.bf16.mxu0 %v5374_v11  ;;  %4054 = vmatprep.subr.bf16.mxu1 %v5152_v0 }
 0x1a5   :  { %539 = vmatpush1.bf16.msra.mxu0 %v5387_v13  ;;  %4055 = vmatpush3.bf16.msra.mxu1 %v5435_v21 }
 0x1a6   :  { %540 = vmatprep.subr.bf16.mxu0 %v5393_v14  ;;  %4056 = vmatprep.subr.bf16.mxu1 %v5152_v0 }
 0x1a9   :  { %541 = vmatpush1.bf16.msra.mxu0 %v5406_v16  ;;  %4057 = vmatpush3.bf16.msra.mxu1 %v5449_v23 }
 0x1aa   :  { %542 = vmatprep.subr.bf16.mxu0 %v5411_v17  ;;  %4058 = vmatprep.subr.bf16.mxu1 %v5152_v0 }
 0x1ad   :  { %543 = vmatpush1.bf16.msra.mxu0 %v5424_v19  ;;  %4059 = vmatpush3.bf16.msra.mxu1 %v5460_v24 }
 0x1ae   :  { %544 = vmatprep.subr.bf16.mxu0 %v5430_v20  ;;  %4060 = vmatprep.subr.bf16.mxu1 %v5152_v0 }
 0x1b1   :  { %545 = vmatpush1.bf16.msra.mxu0 %v5443_v22  ;;  %4061 = vmatpush3.bf16.msra.mxu1 %v5471_v25 }
 0x1b2   :  { %646 = vmatprep.subr.bf16.mxu0 %v5323_v2  ;;  %4066 = vmatprep.subr.bf16.mxu1 %v5152_v0 }
 0x267   :  { %v448_v41 = vpop.f32.mrb[4].mxu0  ;;  %v489_v42 = vpop.f32.mrb[4].mxu1 }
 0x268   :  { %v449_v43 = vadd.f32 %v448_v41, %v5517_v31  ;;  %v450_v44 = vpop.f32.mrb[5].mxu0  ;;  %v4044_v45 = vpop.f32.mrb[5].mxu1  ;;  %v490_v62 = vadd.f32 %v489_v42, %v5531_v52 }
 0x269   :  { %v451_v46 = vadd.f32 %v450_v44, %v5521_v32  ;;  %v452_v48 = vpop.f32.mrb[6].mxu0  ;;  %v492_v49 = vpop.f32.mrb[6].mxu1  ;;  %v522_v45 = vsub.f32 1.0, %v3647_v37 }
 0x26a   :  { %v495_v50 = vadd.f32 %v3646_v40, %v449_v43  ;;  %v453_v53 = vpop.f32.mrb[7].mxu0  ;;  %v4045_v54 = vpop.f32.mrb[7].mxu1 }
 0x26b   :  { %v505_v56 = vadd.f32 %v503_v47, %v451_v46  ;;  %v523_v40 = vmul.f32 %v522_v45, %v5540_v33 }
 0x26c   :  { %v3648_v55 = vmul.f32 -1.442695, %v495_v50 }
 0x26d   :  { %v3649_v57 = vmul.f32 -1.442695, %v505_v56 }
 0x26e   :  { %4763 = vpow2.f32 %v3648_v55 }
 0x26f   :  { %4765 = vpow2.f32 %v3649_v57 }
 0x278   :  { %v4764_v58 = vpop.eup %4763 }
 0x279   :  { %v499_v59 = vadd.f32 1.0, %v4764_v58  ;;  %v4766_v60 = vpop.eup %4765 }
 0x27a   :  { %v509_v61 = vadd.f32 1.0, %v4766_v60 }
 0x27b   :  { %4767 = vrcp.f32 %v499_v59 }
 0x27c   :  { %4769 = vrcp.f32 %v509_v61 }
 0x285   :  { %v4768_v34 = vpop.eup %4767 }
 0x286   :  { %v512_v29 = vmul.f32 %v4768_v34, %v490_v62  ;;  %v4770_v36 = vpop.eup %4769 }
 0x287   :  { %v517_v39 = vsub.f32 1.0, %v4770_v36  ;;  %v519_v44 = vmul.f32 %v4770_v36, %v5540_v33  ;;  %v3650_v33 = vld [vmem:[%s6916_s5 + $0xc] sm:$0x3f] }
 0x288   :  { %v515_v35 = vadd.f32 %v513_v63, %v512_v29  ;;  %v619_v57 = vrot.slane %v3650_v33, 2 }
 0x28a   :  { %4771 = vtanh.f32 %v515_v35 }
 0x294   :  { %v4772_v41 = vpop.eup %4771 }
 0x295   :  { %v518_v43 = vmul.f32 %v4772_v41, %v517_v39 }
 0x297   :  { %v520_v46 = vadd.f32 %v519_v44, %v518_v43  ;;  %v629_v43 = vrot.slane %v3650_v33, 4 }
 0x299   :  { %v5589_v47 = vmul.f32 %v3647_v37, %v520_v46 }
 0x29b   :  { %v5593_v42 = vadd.f32 %v523_v40, %v5589_v47 }
 0x29d   :  { %v529_v48 = vpack.c.bf16 %v5593_v42, %v5593_v42 }
 0x29f   :  { %563 = vmatmul.mubr.bf16.vlgmr.msra.gmra.mrb[8].mxu0 %v529_v48  ;;  %4063 = vmatmul.mubr.bf16.vlgmr.msra.gmra.mrb[8].mxu1 %v529_v48  ;;  %v3651_v48 = vld [vmem:[%s6917_s25 + $0x4] sm:$0x3] }
 0x2a0   :  { %647 = vmatpush1.bf16.msra.mxu0 %v5328_v3  ;;  %4067 = vmatpush3.bf16.msra.mxu1 %v5363_v9 }
 0x2a1   :  { %648 = vmatprep.subr.bf16.mxu0 %v5334_v4  ;;  %4068 = vmatprep.subr.bf16.mxu1 %v5152_v0 }
 0x2a2   :  { %678 = vmatprep.mubr.bf16.mxu0 %v5153_v1  ;;  %4082 = vmatprep.mubr.msk.bf16.mxu1 %vm5154_vm0, %v5152_v0 }
 0x2a4   :  { %649 = vmatpush1.bf16.msra.mxu0 %v5340_v5  ;;  %4069 = vmatpush3.bf16.msra.mxu1 %v5381_v12 }
 0x2a5   :  { %650 = vmatprep.subr.bf16.mxu0 %v5346_v6  ;;  %4070 = vmatprep.subr.bf16.mxu1 %v5152_v0 }
 0x2a8   :  { %651 = vmatpush1.bf16.msra.mxu0 %v5352_v7  ;;  %4071 = vmatpush3.bf16.msra.mxu1 %v5400_v15 }
 0x2a9   :  { %652 = vmatprep.subr.bf16.mxu0 %v5358_v8  ;;  %4072 = vmatprep.subr.bf16.mxu1 %v5152_v0 }
 0x2ac   :  { %653 = vmatpush1.bf16.msra.mxu0 %v5369_v10  ;;  %4073 = vmatpush3.bf16.msra.mxu1 %v5417_v18 }
 0x2ad   :  { %654 = vmatprep.subr.bf16.mxu0 %v5374_v11  ;;  %4074 = vmatprep.subr.bf16.mxu1 %v5152_v0 }
 0x2b0   :  { %655 = vmatpush1.bf16.msra.mxu0 %v5387_v13  ;;  %4075 = vmatpush3.bf16.msra.mxu1 %v5435_v21 }
 0x2b1   :  { %656 = vmatprep.subr.bf16.mxu0 %v5393_v14  ;;  %4076 = vmatprep.subr.bf16.mxu1 %v5152_v0 }
 0x2b4   :  { %657 = vmatpush1.bf16.msra.mxu0 %v5406_v16  ;;  %4077 = vmatpush3.bf16.msra.mxu1 %v5449_v23 }
 0x2b5   :  { %658 = vmatprep.subr.bf16.mxu0 %v5411_v17  ;;  %4078 = vmatprep.subr.bf16.mxu1 %v5152_v0 }
 0x2b8   :  { %659 = vmatpush1.bf16.msra.mxu0 %v5424_v19  ;;  %4079 = vmatpush3.bf16.msra.mxu1 %v5460_v24 }
 0x2b9   :  { %660 = vmatprep.subr.bf16.mxu0 %v5430_v20  ;;  %4080 = vmatprep.subr.bf16.mxu1 %v5152_v0 }
 0x2bc   :  { %661 = vmatpush1.bf16.msra.mxu0 %v5443_v22  ;;  %4081 = vmatpush3.bf16.msra.mxu1 %v5471_v25 }
 0x2bd   :  { %762 = vmatprep.subr.bf16.mxu0 %v5323_v2  ;;  %4086 = vmatprep.subr.bf16.mxu1 %v5152_v0 }
 0x372   :  { %v564_v49 = vpop.f32.mrb[8].mxu0  ;;  %v605_v50 = vpop.f32.mrb[8].mxu1 }
 0x373   :  { %v565_v53 = vadd.f32 %v564_v49, %v5517_v31  ;;  %v566_v54 = vpop.f32.mrb[9].mxu0  ;;  %v4064_v55 = vpop.f32.mrb[9].mxu1  ;;  %v606_v41 = vadd.f32 %v605_v50, %v5531_v52 }
 0x374   :  { %v567_v56 = vadd.f32 %v566_v54, %v5521_v32  ;;  %v568_v58 = vpop.f32.mrb[10].mxu0  ;;  %v608_v59 = vpop.f32.mrb[10].mxu1 }
 0x375   :  { %v611_v60 = vadd.f32 %v3650_v33, %v565_v53  ;;  %v569_v61 = vpop.f32.mrb[11].mxu0  ;;  %v4065_v62 = vpop.f32.mrb[11].mxu1 }
 0x376   :  { %v621_v34 = vadd.f32 %v619_v57, %v567_v56  ;;  %v638_v56 = vsub.f32 1.0, %v3651_v48 }
 0x377   :  { %v3652_v63 = vmul.f32 -1.442695, %v611_v60 }
 0x378   :  { %v3653_v29 = vmul.f32 -1.442695, %v621_v34  ;;  %v639_v33 = vmul.f32 %v638_v56, %v5593_v42 }
 0x379   :  { %4773 = vpow2.f32 %v3652_v63 }
 0x37a   :  { %4775 = vpow2.f32 %v3653_v29 }
 0x383   :  { %v4774_v35 = vpop.eup %4773 }
 0x384   :  { %v615_v36 = vadd.f32 1.0, %v4774_v35  ;;  %v4776_v37 = vpop.eup %4775 }
 0x385   :  { %v625_v39 = vadd.f32 1.0, %v4776_v37 }
 0x386   :  { %4777 = vrcp.f32 %v615_v36 }
 0x387   :  { %4779 = vrcp.f32 %v625_v39 }
 0x390   :  { %v4778_v44 = vpop.eup %4777 }
 0x391   :  { %v628_v45 = vmul.f32 %v4778_v44, %v606_v41  ;;  %v4780_v40 = vpop.eup %4779 }
 0x392   :  { %v633_v49 = vsub.f32 1.0, %v4780_v40  ;;  %v635_v55 = vmul.f32 %v4780_v40, %v5593_v42  ;;  %v3654_v42 = vld [vmem:[%s6916_s5 + $0x12] sm:$0x3f] }
 0x393   :  { %v631_v46 = vadd.f32 %v629_v43, %v628_v45  ;;  %v735_v35 = vrot.slane %v3654_v42, 2 }
 0x395   :  { %4781 = vtanh.f32 %v631_v46 }
 0x39f   :  { %v4782_v53 = vpop.eup %4781 }
 0x3a0   :  { %v634_v54 = vmul.f32 %v4782_v53, %v633_v49 }
 0x3a2   :  { %v636_v57 = vadd.f32 %v635_v55, %v634_v54  ;;  %v745_v55 = vrot.slane %v3654_v42, 4 }
 0x3a4   :  { %v5642_v58 = vmul.f32 %v3651_v48, %v636_v57 }
 0x3a6   :  { %v5646_v50 = vadd.f32 %v639_v33, %v5642_v58 }
 0x3a8   :  { %v645_v59 = vpack.c.bf16 %v5646_v50, %v5646_v50 }
 0x3aa   :  { %679 = vmatmul.mubr.bf16.vlgmr.msra.gmra.mrb[12].mxu0 %v645_v59  ;;  %4083 = vmatmul.mubr.bf16.vlgmr.msra.gmra.mrb[12].mxu1 %v645_v59 }
 0x3ab   :  { %763 = vmatpush1.bf16.msra.mxu0 %v5328_v3  ;;  %4087 = vmatpush3.bf16.msra.mxu1 %v5363_v9 }
 0x3ac   :  { %764 = vmatprep.subr.bf16.mxu0 %v5334_v4  ;;  %4088 = vmatprep.subr.bf16.mxu1 %v5152_v0 }
 0x3ad   :  { %794 = vmatprep.mubr.bf16.mxu0 %v5153_v1  ;;  %4102 = vmatprep.mubr.msk.bf16.mxu1 %vm5154_vm0, %v5152_v0 }
 0x3af   :  { %765 = vmatpush1.bf16.msra.mxu0 %v5340_v5  ;;  %4089 = vmatpush3.bf16.msra.mxu1 %v5381_v12 }
 0x3b0   :  { %766 = vmatprep.subr.bf16.mxu0 %v5346_v6  ;;  %4090 = vmatprep.subr.bf16.mxu1 %v5152_v0 }
 0x3b3   :  { %767 = vmatpush1.bf16.msra.mxu0 %v5352_v7  ;;  %4091 = vmatpush3.bf16.msra.mxu1 %v5400_v15 }
 0x3b4   :  { %768 = vmatprep.subr.bf16.mxu0 %v5358_v8  ;;  %4092 = vmatprep.subr.bf16.mxu1 %v5152_v0 }
 0x3b7   :  { %769 = vmatpush1.bf16.msra.mxu0 %v5369_v10  ;;  %4093 = vmatpush3.bf16.msra.mxu1 %v5417_v18 }
 0x3b8   :  { %770 = vmatprep.subr.bf16.mxu0 %v5374_v11  ;;  %4094 = vmatprep.subr.bf16.mxu1 %v5152_v0 }
 0x3bb   :  { %771 = vmatpush1.bf16.msra.mxu0 %v5387_v13  ;;  %4095 = vmatpush3.bf16.msra.mxu1 %v5435_v21 }
 0x3bc   :  { %772 = vmatprep.subr.bf16.mxu0 %v5393_v14  ;;  %4096 = vmatprep.subr.bf16.mxu1 %v5152_v0 }
 0x3bf   :  { %773 = vmatpush1.bf16.msra.mxu0 %v5406_v16  ;;  %4097 = vmatpush3.bf16.msra.mxu1 %v5449_v23 }
 0x3c0   :  { %774 = vmatprep.subr.bf16.mxu0 %v5411_v17  ;;  %4098 = vmatprep.subr.bf16.mxu1 %v5152_v0 }
 0x3c3   :  { %775 = vmatpush1.bf16.msra.mxu0 %v5424_v19  ;;  %4099 = vmatpush3.bf16.msra.mxu1 %v5460_v24 }
 0x3c4   :  { %776 = vmatprep.subr.bf16.mxu0 %v5430_v20  ;;  %4100 = vmatprep.subr.bf16.mxu1 %v5152_v0 }
 0x3c7   :  { %777 = vmatpush1.bf16.msra.mxu0 %v5443_v22  ;;  %4101 = vmatpush3.bf16.msra.mxu1 %v5471_v25 }
 0x3c8   :  { %878 = vmatprep.subr.bf16.mxu0 %v5323_v2  ;;  %4106 = vmatprep.subr.bf16.mxu1 %v5152_v0 }
 0x47d   :  { %v680_v60 = vpop.f32.mrb[12].mxu0  ;;  %v721_v61 = vpop.f32.mrb[12].mxu1 }
 0x47e   :  { %v681_v62 = vadd.f32 %v680_v60, %v5517_v31  ;;  %v682_v63 = vpop.f32.mrb[13].mxu0  ;;  %v4084_v34 = vpop.f32.mrb[13].mxu1  ;;  %v722_v54 = vadd.f32 %v721_v61, %v5531_v52  ;;  %v3655_v60 = vld [vmem:[%s6917_s25 + $0x6] sm:$0x3] }
 0x47f   :  { %v683_v29 = vadd.f32 %v682_v63, %v5521_v32  ;;  %v684_v36 = vpop.f32.mrb[14].mxu0  ;;  %v724_v37 = vpop.f32.mrb[14].mxu1 }
 0x480   :  { %v727_v39 = vadd.f32 %v3654_v42, %v681_v62  ;;  %v685_v41 = vpop.f32.mrb[15].mxu0  ;;  %v4085_v43 = vpop.f32.mrb[15].mxu1 }
 0x481   :  { %v737_v45 = vadd.f32 %v735_v35, %v683_v29  ;;  %v754_v35 = vsub.f32 1.0, %v3655_v60 }
 0x482   :  { %v3656_v44 = vmul.f32 -1.442695, %v727_v39 }
 0x483   :  { %v3657_v46 = vmul.f32 -1.442695, %v737_v45  ;;  %v755_v42 = vmul.f32 %v754_v35, %v5646_v50 }
 0x484   :  { %4783 = vpow2.f32 %v3656_v44 }
 0x485   :  { %4785 = vpow2.f32 %v3657_v46 }
 0x48e   :  { %v4784_v40 = vpop.eup %4783 }
 0x48f   :  { %v731_v48 = vadd.f32 1.0, %v4784_v40  ;;  %v4786_v49 = vpop.eup %4785 }
 0x490   :  { %v741_v53 = vadd.f32 1.0, %v4786_v49 }
 0x491   :  { %4787 = vrcp.f32 %v731_v48 }
 0x492   :  { %4789 = vrcp.f32 %v741_v53 }
 0x49b   :  { %v4788_v56 = vpop.eup %4787 }
 0x49c   :  { %v744_v57 = vmul.f32 %v4788_v56, %v722_v54  ;;  %v4790_v59 = vpop.eup %4789 }
 0x49d   :  { %v749_v62 = vsub.f32 1.0, %v4790_v59  ;;  %v751_v29 = vmul.f32 %v4790_v59, %v5646_v50 }
 0x49e   :  { %v747_v33 = vadd.f32 %v745_v55, %v744_v57 }
 0x4a0   :  { %4791 = vtanh.f32 %v747_v33 }
 0x4aa   :  { %v4792_v63 = vpop.eup %4791 }
 0x4ab   :  { %v750_v34 = vmul.f32 %v4792_v63, %v749_v62  ;;  %v3659_v63 = vld [vmem:[%s6917_s25 + $0x8] sm:$0x3] }
 0x4ad   :  { %v752_v36 = vadd.f32 %v751_v29, %v750_v34 }
 0x4af   :  { %v5695_v37 = vmul.f32 %v3655_v60, %v752_v36  ;;  %v5155_v60 = vmov 1966171168   ;;  %v5748_v36 = vand.u32 127, %v155_v26 }
 0x4b0   :  { %v1227_v62 = vunpack.c.l.s4 %v5155_v60 }
 0x4b1   :  { %v5699_v61 = vadd.f32 %v755_v42, %v5695_v37  ;;  %vm1223_vm1 = vcmp.lt.s32.totalorder %v5748_v36, 32  ;;  %v6101_v36 = vld [vmem:[%s6899_s9 + $0x50] ss:$12 sps:$4 sm:$0xff]  }
 0x4b2   :  { %v1228_v35 = vunpack.c.0.s8 %v1227_v62 }
 0x4b3   :  { %v761_v39 = vpack.c.bf16 %v5699_v61, %v5699_v61 }
 0x4b5   :  { %795 = vmatmul.mubr.bf16.vlgmr.msra.gmra.mrb[16].mxu0 %v761_v39  ;;  %4103 = vmatmul.mubr.bf16.vlgmr.msra.gmra.mrb[16].mxu1 %v761_v39 }
 0x4b6   :  { %879 = vmatpush1.bf16.msra.mxu0 %v5328_v3  ;;  %4107 = vmatpush3.bf16.msra.mxu1 %v5363_v9  ;;  %v3658_v3 = vld [vmem:[%s6916_s5 + $0x18] sm:$0x3f] }
 0x4b7   :  { %880 = vmatprep.subr.bf16.mxu0 %v5334_v4  ;;  %4108 = vmatprep.subr.bf16.mxu1 %v5152_v0  ;;  %v861_v55 = vrot.slane %v3658_v3, 4 }
 0x4b8   :  { %910 = vmatprep.mubr.bf16.mxu0 %v5153_v1  ;;  %4122 = vmatprep.mubr.msk.bf16.mxu1 %vm5154_vm0, %v5152_v0 }
 0x4ba   :  { %881 = vmatpush1.bf16.msra.mxu0 %v5340_v5  ;;  %4109 = vmatpush3.bf16.msra.mxu1 %v5381_v12 }
 0x4bb   :  { %882 = vmatprep.subr.bf16.mxu0 %v5346_v6  ;;  %4110 = vmatprep.subr.bf16.mxu1 %v5152_v0 }
 0x4be   :  { %883 = vmatpush1.bf16.msra.mxu0 %v5352_v7  ;;  %4111 = vmatpush3.bf16.msra.mxu1 %v5400_v15 }
 0x4bf   :  { %884 = vmatprep.subr.bf16.mxu0 %v5358_v8  ;;  %4112 = vmatprep.subr.bf16.mxu1 %v5152_v0 }
 0x4c2   :  { %885 = vmatpush1.bf16.msra.mxu0 %v5369_v10  ;;  %4113 = vmatpush3.bf16.msra.mxu1 %v5417_v18 }
 0x4c3   :  { %886 = vmatprep.subr.bf16.mxu0 %v5374_v11  ;;  %4114 = vmatprep.subr.bf16.mxu1 %v5152_v0  ;;  %v851_v11 = vrot.slane %v3658_v3, 2 }
 0x4c6   :  { %887 = vmatpush1.bf16.msra.mxu0 %v5387_v13  ;;  %4115 = vmatpush3.bf16.msra.mxu1 %v5435_v21 }
 0x4c7   :  { %888 = vmatprep.subr.bf16.mxu0 %v5393_v14  ;;  %4116 = vmatprep.subr.bf16.mxu1 %v5152_v0 }
 0x4ca   :  { %889 = vmatpush1.bf16.msra.mxu0 %v5406_v16  ;;  %4117 = vmatpush3.bf16.msra.mxu1 %v5449_v23 }
 0x4cb   :  { %890 = vmatprep.subr.bf16.mxu0 %v5411_v17  ;;  %4118 = vmatprep.subr.bf16.mxu1 %v5152_v0 }
 0x4ce   :  { %891 = vmatpush1.bf16.msra.mxu0 %v5424_v19  ;;  %4119 = vmatpush3.bf16.msra.mxu1 %v5460_v24 }
 0x4cf   :  { %892 = vmatprep.subr.bf16.mxu0 %v5430_v20  ;;  %4120 = vmatprep.subr.bf16.mxu1 %v5152_v0 }
 0x4d2   :  { %893 = vmatpush1.bf16.msra.mxu0 %v5443_v22  ;;  %4121 = vmatpush3.bf16.msra.mxu1 %v5471_v25 }
 0x4d3   :  { %994 = vmatprep.subr.bf16.mxu0 %v5323_v2  ;;  %4126 = vmatprep.subr.bf16.mxu1 %v5152_v0 }
 0x588   :  { %v796_v4 = vpop.f32.mrb[16].mxu0  ;;  %v837_v5 = vpop.f32.mrb[16].mxu1 }
 0x589   :  { %v797_v6 = vadd.f32 %v796_v4, %v5517_v31  ;;  %v798_v7 = vpop.f32.mrb[17].mxu0  ;;  %v4104_v8 = vpop.f32.mrb[17].mxu1  ;;  %v838_v54 = vadd.f32 %v837_v5, %v5531_v52  ;;  %v5752_v5 = vsub.s32 %v1228_v35, %v5511_v27 }
 0x58a   :  { %v799_v10 = vadd.f32 %v798_v7, %v5521_v32  ;;  %v800_v13 = vpop.f32.mrb[18].mxu0  ;;  %v840_v50 = vpop.f32.mrb[18].mxu1 }
 0x58b   :  { %v843_v41 = vadd.f32 %v3658_v3, %v797_v6  ;;  %v801_v43 = vpop.f32.mrb[19].mxu0  ;;  %v4105_v2 = vpop.f32.mrb[19].mxu1  ;;  %v870_v3 = vsub.f32 1.0, %v3659_v63 }
 0x58c   :  { %v853_v45 = vadd.f32 %v851_v11, %v799_v10  ;;  %v5771_v43 = vld [vmem:[%s6915_s19] ss:$12 sps:$4 sm:$0xff]   ;;  %v5788_v2 = vld [vmem:[%s6915_s19 + $0x18] ss:$12 sps:$4 sm:$0xff]  }
 0x58d   :  { %v3660_v44 = vmul.f32 -1.442695, %v843_v41  ;;  %v871_v7 = vmul.f32 %v870_v3, %v5699_v61 }
 0x58e   :  { %v3661_v46 = vmul.f32 -1.442695, %v853_v45  ;;  %v5816_v45 = vld [vmem:[%s6915_s19 + $0x48] ss:$12 sps:$4 sm:$0xff]  }
 0x58f   :  { %4793 = vpow2.f32 %v3660_v44  ;;  %v5802_v44 = vld [vmem:[%s6915_s19 + $0x30] ss:$12 sps:$4 sm:$0xff]  }
 0x590   :  { %4795 = vpow2.f32 %v3661_v46  ;;  %v5830_v46 = vld [vmem:[%s6915_s19 + $0x60] ss:$12 sps:$4 sm:$0xff]  }
 0x599   :  { %v4794_v40 = vpop.eup %4793 }
 0x59a   :  { %v847_v48 = vadd.f32 1.0, %v4794_v40  ;;  %v4796_v49 = vpop.eup %4795 }
 0x59b   :  { %v857_v53 = vadd.f32 1.0, %v4796_v49 }
 0x59c   :  { %4797 = vrcp.f32 %v847_v48 }
 0x59d   :  { %4799 = vrcp.f32 %v857_v53 }
 0x5a6   :  { %v4798_v56 = vpop.eup %4797 }
 0x5a7   :  { %v860_v57 = vmul.f32 %v4798_v56, %v838_v54  ;;  %v4800_v59 = vpop.eup %4799 }
 0x5a8   :  { %v865_v34 = vsub.f32 1.0, %v4800_v59  ;;  %v867_v39 = vmul.f32 %v4800_v59, %v5699_v61 }
 0x5a9   :  { %v863_v33 = vadd.f32 %v861_v55, %v860_v57 }
 0x5ab   :  { %4801 = vtanh.f32 %v863_v33 }
 0x5b5   :  { %v4802_v29 = vpop.eup %4801 }
 0x5b6   :  { %v866_v42 = vmul.f32 %v4802_v29, %v865_v34 }
 0x5b8   :  { %v868_v4 = vadd.f32 %v867_v39, %v866_v42  ;;  %v3663_v42 = vld [vmem:[%s6917_s25 + $0xa] sm:$0x3] }
 0x5ba   :  { %v869_v6 = vmul.f32 %v3659_v63, %v868_v4 }
 0x5bc   :  { %v5756_v8 = vadd.f32 %v871_v7, %v869_v6  ;;  %v1308_v26 = vsel %vm1223_vm1, %v5695_v37, %v869_v6  ;;  %v1336_v10 = vsel %vm1223_vm1, %v869_v6, %v5695_v37  ;;  %v5778_v37 = vld [vmem:[%s6915_s19 + $0x1c] ss:$12 sps:$4 sm:$0xff]   ;;  %v986_v7 = vsub.f32 1.0, %v3663_v42 }
 0x5bd   :  { %v1316_v11 = vrot.slane %v1308_v26, %v5752_v5  ;;  %v1344_v13 = vrot.slane %v1336_v10, %v5752_v5 }
 0x5be   :  { %v877_v50 = vpack.c.bf16 %v5756_v8, %v5756_v8 }
 0x5bf   :  { %v1317_v41 = vcombine.high %v1316_v11, %v1316_v11  ;;  %3680 = vst.sshfl [vmem:[#allocation2 + $0x3] sm:$0x1 pattern:$0x73625140] %v1316_v11  ;;  %v1345_v61 = vcombine.high %v1344_v13, %v1344_v13  ;;  %v987_v11 = vmul.f32 %v986_v7, %v5756_v8 }
 0x5c0   :  { %3682 = vst.sshfl [vmem:[#allocation2 + $0x4] sm:$0x1 pattern:$0x73625140] %v1344_v13  ;;  %911 = vmatmul.mubr.bf16.vlgmr.msra.gmra.mrb[20].mxu0 %v877_v50  ;;  %4123 = vmatmul.mubr.bf16.vlgmr.msra.gmra.mrb[20].mxu1 %v877_v50 }
 0x5c1   :  { %3681 = vst.sshfl [vmem:[#allocation2 + $0xb] sm:$0x1 pattern:$0x73625140] %v1317_v41  ;;  %995 = vmatpush1.bf16.msra.mxu0 %v5771_v43  ;;  %4127 = vmatpush3.bf16.msra.mxu1 %v5363_v9  ;;  %v5795_v9 = vld [vmem:[%s6915_s19 + $0x34] ss:$12 sps:$4 sm:$0xff]  }
 0x5c2   :  { %3683 = vst.sshfl [vmem:[#allocation2 + $0xc] sm:$0x1 pattern:$0x73625140] %v1345_v61  ;;  %996 = vmatprep.subr.bf16.mxu0 %v5778_v37  ;;  %4128 = vmatprep.subr.bf16.mxu1 %v5152_v0 }
 0x5c3   :  { %1026 = vmatprep.mubr.bf16.mxu0 %v5153_v1  ;;  %4142 = vmatprep.mubr.msk.bf16.mxu1 %vm5154_vm0, %v5152_v0 }
 0x5c5   :  { %997 = vmatpush1.bf16.msra.mxu0 %v5788_v2  ;;  %4129 = vmatpush3.bf16.msra.mxu1 %v5381_v12  ;;  %v5809_v12 = vld [vmem:[%s6915_s19 + $0x4c] ss:$12 sps:$4 sm:$0xff]  }
 0x5c6   :  { %998 = vmatprep.subr.bf16.mxu0 %v5795_v9  ;;  %4130 = vmatprep.subr.bf16.mxu1 %v5152_v0 }
 0x5c9   :  { %999 = vmatpush1.bf16.msra.mxu0 %v5802_v44  ;;  %4131 = vmatpush3.bf16.msra.mxu1 %v5400_v15  ;;  %v5823_v15 = vld [vmem:[%s6915_s19 + $0x64] ss:$12 sps:$4 sm:$0xff]  }
 0x5ca   :  { %1000 = vmatprep.subr.bf16.mxu0 %v5809_v12  ;;  %4132 = vmatprep.subr.bf16.mxu1 %v5152_v0 }
 0x5cd   :  { %1001 = vmatpush1.bf16.msra.mxu0 %v5816_v45  ;;  %4133 = vmatpush3.bf16.msra.mxu1 %v5417_v18 }
 0x5ce   :  { %1002 = vmatprep.subr.bf16.mxu0 %v5823_v15  ;;  %4134 = vmatprep.subr.bf16.mxu1 %v5152_v0 }
 0x5d1   :  { %1003 = vmatpush1.bf16.msra.mxu0 %v5830_v46  ;;  %4135 = vmatpush3.bf16.msra.mxu1 %v5435_v21 }
 0x5d2   :  { %1004 = vmatprep.subr.bf16.mxu0 %v5393_v14  ;;  %4136 = vmatprep.subr.bf16.mxu1 %v5152_v0  ;;  %v4944_v14 = vld [vmem:[%s6915_s19 + $0x4] ss:$12 sps:$4 sm:$0xff]  }
 0x5d5   :  { %1005 = vmatpush1.bf16.msra.mxu0 %v5406_v16  ;;  %4137 = vmatpush3.bf16.msra.mxu1 %v5449_v23  ;;  %v3662_v16 = vld [vmem:[%s6916_s5 + $0x1e] sm:$0x3f] }
 0x5d6   :  { %1006 = vmatprep.subr.bf16.mxu0 %v5411_v17  ;;  %4138 = vmatprep.subr.bf16.mxu1 %v5152_v0  ;;  %v967_v23 = vrot.slane %v3662_v16, 2  ;;  %v977_v62 = vrot.slane %v3662_v16, 4 }
 0x5d9   :  { %1007 = vmatpush1.bf16.msra.mxu0 %v5424_v19  ;;  %4139 = vmatpush3.bf16.msra.mxu1 %v5460_v24 }
 0x5da   :  { %1008 = vmatprep.subr.bf16.mxu0 %v5430_v20  ;;  %4140 = vmatprep.subr.bf16.mxu1 %v5152_v0 }
 0x5dd   :  { %1009 = vmatpush1.bf16.msra.mxu0 %v5443_v22  ;;  %4141 = vmatpush3.bf16.msra.mxu1 %v5471_v25 }
 0x5de   :  { %1110 = vmatprep.subr.bf16.mxu0 %v4944_v14  ;;  %4146 = vmatprep.subr.bf16.mxu1 %v5152_v0 }
 0x693   :  { %v912_v17 = vpop.f32.mrb[20].mxu0  ;;  %v953_v18 = vpop.f32.mrb[20].mxu1 }
 0x694   :  { %v913_v19 = vadd.f32 %v912_v17, %v5517_v31  ;;  %v914_v20 = vpop.f32.mrb[21].mxu0  ;;  %v4124_v21 = vpop.f32.mrb[21].mxu1  ;;  %v954_v60 = vadd.f32 %v953_v18, %v5531_v52  ;;  %v4955_v18 = vld [vmem:[%s6915_s19 + $0x98] ss:$12 sps:$4 sm:$0xff]  }
 0x695   :  { %v915_v22 = vadd.f32 %v914_v20, %v5521_v32  ;;  %v916_v24 = vpop.f32.mrb[22].mxu0  ;;  %v956_v25 = vpop.f32.mrb[22].mxu1  ;;  %v4957_v20 = vld [vmem:[%s6915_s19 + $0xa8] ss:$12 sps:$4 sm:$0xff]   ;;  %v4958_v21 = vld [vmem:[%s6915_s19 + $0xb0] ss:$12 sps:$4 sm:$0xff]  }
 0x696   :  { %v959_v40 = vadd.f32 %v3662_v16, %v913_v19  ;;  %v917_v48 = vpop.f32.mrb[23].mxu0  ;;  %v4125_v49 = vpop.f32.mrb[23].mxu1  ;;  %v4956_v19 = vld [vmem:[%s6915_s19 + $0xac] ss:$12 sps:$4 sm:$0xff]  }
 0x697   :  { %v969_v54 = vadd.f32 %v967_v23, %v915_v22  ;;  %v3666_v22 = vld [vmem:[%s6916_s5 + $0x24] sm:$0x3f] }
 0x698   :  { %v3664_v53 = vmul.f32 -1.442695, %v959_v40 }
 0x699   :  { %v3665_v55 = vmul.f32 -1.442695, %v969_v54 }
 0x69a   :  { %4803 = vpow2.f32 %v3664_v53  ;;  %v1083_v53 = vrot.slane %v3666_v22, 2 }
 0x69b   :  { %4805 = vpow2.f32 %v3665_v55 }
 0x6a4   :  { %v4804_v56 = vpop.eup %4803 }
 0x6a5   :  { %v963_v57 = vadd.f32 1.0, %v4804_v56  ;;  %v4806_v33 = vpop.eup %4805 }
 0x6a6   :  { %v973_v59 = vadd.f32 1.0, %v4806_v33 }
 0x6a7   :  { %4807 = vrcp.f32 %v963_v57 }
 0x6a8   :  { %4809 = vrcp.f32 %v973_v59 }
 0x6b1   :  { %v4808_v63 = vpop.eup %4807 }
 0x6b2   :  { %v976_v34 = vmul.f32 %v4808_v63, %v954_v60  ;;  %v4810_v35 = vpop.eup %4809 }
 0x6b3   :  { %v981_v39 = vsub.f32 1.0, %v4810_v35  ;;  %v983_v6 = vmul.f32 %v4810_v35, %v5756_v8 }
 0x6b4   :  { %v979_v29 = vadd.f32 %v977_v62, %v976_v34 }
 0x6b6   :  { %4811 = vtanh.f32 %v979_v29 }
 0x6c0   :  { %v4812_v3 = vpop.eup %4811 }
 0x6c1   :  { %v982_v4 = vmul.f32 %v4812_v3, %v981_v39  ;;  %v1093_v39 = vrot.slane %v3666_v22, 4 }
 0x6c3   :  { %v984_v26 = vadd.f32 %v983_v6, %v982_v4 }
 0x6c5   :  { %v985_v10 = vmul.f32 %v3663_v42, %v984_v26  ;;  %v3667_v26 = vld [vmem:[%s6917_s25 + $0xc] sm:$0x3] }
 0x6c7   :  { %v5861_v13 = vadd.f32 %v987_v11, %v985_v10  ;;  %v1280_v50 = vsel %vm1223_vm1, %v5642_v58, %v985_v10  ;;  %v1364_v41 = vsel %vm1223_vm1, %v985_v10, %v5642_v58  ;;  %v4945_v58 = vld [vmem:[%s6915_s19 + $0x8] ss:$12 sps:$4 sm:$0xff]  }
 0x6c8   :  { %v1288_v61 = vrot.slane %v1280_v50, %v5752_v5  ;;  %v1372_v14 = vrot.slane %v1364_v41, %v5752_v5 }
 0x6c9   :  { %v993_v16 = vpack.c.bf16 %v5861_v13, %v5861_v13 }
 0x6ca   :  { %v1289_v17 = vcombine.high %v1288_v61, %v1288_v61  ;;  %3678 = vst.sshfl [vmem:[#allocation2 + $0x2] sm:$0x1 pattern:$0x73625140] %v1288_v61  ;;  %v1373_v8 = vcombine.high %v1372_v14, %v1372_v14  ;;  %v1102_v61 = vsub.f32 1.0, %v3667_v26 }
 0x6cb   :  { %3684 = vst.sshfl [vmem:[#allocation2 + $0x5] sm:$0x1 pattern:$0x73625140] %v1372_v14  ;;  %1027 = vmatmul.mubr.bf16.vlgmr.msra.gmra.mrb[24].mxu0 %v993_v16  ;;  %4143 = vmatmul.mubr.bf16.vlgmr.msra.gmra.mrb[24].mxu1 %v993_v16 }
 0x6cc   :  { %3679 = vst.sshfl [vmem:[#allocation2 + $0xa] sm:$0x1 pattern:$0x73625140] %v1289_v17  ;;  %1111 = vmatpush1.bf16.msra.mxu0 %v5771_v43  ;;  %4147 = vmatpush3.bf16.msra.mxu1 %v4945_v58  ;;  %v4946_v43 = vld [vmem:[%s6915_s19 + $0x20] ss:$12 sps:$4 sm:$0xff]   ;;  %v1103_v17 = vmul.f32 %v1102_v61, %v5861_v13 }
 0x6cd   :  { %3685 = vst.sshfl [vmem:[#allocation2 + $0xd] sm:$0x1 pattern:$0x73625140] %v1373_v8  ;;  %1112 = vmatprep.subr.bf16.mxu0 %v5778_v37  ;;  %4148 = vmatprep.subr.bf16.mxu1 %v5152_v0  ;;  %v4947_v37 = vld [vmem:[%s6915_s19 + $0x38] ss:$12 sps:$4 sm:$0xff]  }
 0x6ce   :  { %1142 = vmatprep.mubr.bf16.mxu0 %v5153_v1  ;;  %4162 = vmatprep.mubr.msk.bf16.mxu1 %vm5154_vm0, %v5152_v0 }
 0x6d0   :  { %1113 = vmatpush1.bf16.msra.mxu0 %v5788_v2  ;;  %4149 = vmatpush3.bf16.msra.mxu1 %v4946_v43  ;;  %v4948_v2 = vld [vmem:[%s6915_s19 + $0x50] ss:$12 sps:$4 sm:$0xff]  }
 0x6d1   :  { %1114 = vmatprep.subr.bf16.mxu0 %v5795_v9  ;;  %4150 = vmatprep.subr.bf16.mxu1 %v5152_v0  ;;  %v4949_v9 = vld [vmem:[%s6915_s19 + $0x68] ss:$12 sps:$4 sm:$0xff]  }
 0x6d4   :  { %1115 = vmatpush1.bf16.msra.mxu0 %v5802_v44  ;;  %4151 = vmatpush3.bf16.msra.mxu1 %v4947_v37  ;;  %v4950_v44 = vld [vmem:[%s6915_s19 + $0x7c] ss:$12 sps:$4 sm:$0xff]  }
 0x6d5   :  { %1116 = vmatprep.subr.bf16.mxu0 %v5809_v12  ;;  %4152 = vmatprep.subr.bf16.mxu1 %v5152_v0  ;;  %v4951_v12 = vld [vmem:[%s6915_s19 + $0x78] ss:$12 sps:$4 sm:$0xff]  }
 0x6d8   :  { %1117 = vmatpush1.bf16.msra.mxu0 %v5816_v45  ;;  %4153 = vmatpush3.bf16.msra.mxu1 %v4948_v2  ;;  %v4952_v45 = vld [vmem:[%s6915_s19 + $0x80] ss:$12 sps:$4 sm:$0xff]  }
 0x6d9   :  { %1118 = vmatprep.subr.bf16.mxu0 %v5823_v15  ;;  %4154 = vmatprep.subr.bf16.mxu1 %v5152_v0  ;;  %v4953_v15 = vld [vmem:[%s6915_s19 + $0x94] ss:$12 sps:$4 sm:$0xff]  }
 0x6dc   :  { %1119 = vmatpush1.bf16.msra.mxu0 %v5830_v46  ;;  %4155 = vmatpush3.bf16.msra.mxu1 %v4949_v9  ;;  %v4954_v46 = vld [vmem:[%s6915_s19 + $0x90] ss:$12 sps:$4 sm:$0xff]  }
 0x6dd   :  { %1120 = vmatprep.subr.bf16.mxu0 %v4950_v44  ;;  %4156 = vmatprep.subr.bf16.mxu1 %v5152_v0 }
 0x6e0   :  { %1121 = vmatpush1.bf16.msra.mxu0 %v4951_v12  ;;  %4157 = vmatpush3.bf16.msra.mxu1 %v4952_v45  ;;  %v1449_v12 = vld [vmem:[%s6894_s4 + $0x8] sm:$0xff] }
 0x6e1   :  { %1122 = vmatprep.subr.bf16.mxu0 %v4953_v15  ;;  %4158 = vmatprep.subr.bf16.mxu1 %v5152_v0  ;;  %v5156_v15 = vmov 0.0|0.0  }
 0x6e4   :  { %1123 = vmatpush1.bf16.msra.mxu0 %v4954_v46  ;;  %4159 = vmatpush3.bf16.msra.mxu1 %v4955_v18  ;;  %v1450_v46 = vld [vmem:[%s6894_s4 + $0x10] sm:$0xff]  ;;  %v1451_v18 = vld [vmem:[%s6894_s4 + $0x18] sm:$0xff] }
 0x6e5   :  { %1124 = vmatprep.subr.bf16.mxu0 %v4956_v19  ;;  %4160 = vmatprep.subr.bf16.mxu1 %v5152_v0  ;;  %v4525_v19 = vpack.c.bf16 %v1451_v18, %v1450_v46 }
 0x6e8   :  { %1125 = vmatpush1.bf16.msra.mxu0 %v4957_v20  ;;  %4161 = vmatpush3.bf16.msra.mxu1 %v4958_v21  ;;  %v1452_v20 = vld [vmem:[%s6894_s4 + $0x20] sm:$0xff]  ;;  %v1453_v21 = vld [vmem:[%s6894_s4 + $0x28] sm:$0xff] }
 0x6e9   :  { %4521 = vmatprep.subr.bf16.mxu0 %v5156_v15 }
 0x79e   :  { %v1028_v23 = vpop.f32.mrb[24].mxu0  ;;  %v1069_v24 = vpop.f32.mrb[24].mxu1 }
 0x79f   :  { %v1029_v25 = vadd.f32 %v1028_v23, %v5517_v31  ;;  %v1030_v40 = vpop.f32.mrb[25].mxu0  ;;  %v4144_v48 = vpop.f32.mrb[25].mxu1  ;;  %v1070_v42 = vadd.f32 %v1069_v24, %v5531_v52  ;;  %v1454_v23 = vld [vmem:[%s6894_s4 + $0x30] sm:$0xff]  ;;  %v1455_v24 = vld [vmem:[%s6894_s4 + $0x38] sm:$0xff] }
 0x7a0   :  { %v1031_v49 = vadd.f32 %v1030_v40, %v5521_v32  ;;  %v1032_v54 = vpop.f32.mrb[26].mxu0  ;;  %v1072_v55 = vpop.f32.mrb[26].mxu1  ;;  %v1456_v40 = vld [vmem:[%s6894_s4 + $0x40] sm:$0xff]  ;;  %v1457_v48 = vld [vmem:[%s6894_s4 + $0x48] sm:$0xff] }
 0x7a1   :  { %v1075_v56 = vadd.f32 %v3666_v22, %v1029_v25  ;;  %v1033_v57 = vpop.f32.mrb[27].mxu0  ;;  %v4145_v33 = vpop.f32.mrb[27].mxu1  ;;  %v4528_v22 = vpack.c.bf16 %v1453_v21, %v1452_v20  ;;  %v4531_v25 = vpack.c.bf16 %v1455_v24, %v1454_v23  ;;  %v1459_v54 = vld [vmem:[%s6894_s4 + $0x58] sm:$0xff] }
 0x7a2   :  { %v1085_v60 = vadd.f32 %v1083_v53, %v1031_v49  ;;  %v4534_v49 = vpack.c.bf16 %v1457_v48, %v1456_v40  ;;  %v1458_v53 = vld [vmem:[%s6894_s4 + $0x50] sm:$0xff]  ;;  %v1461_v57 = vld [vmem:[%s6894_s4 + $0x68] sm:$0xff] }
 0x7a3   :  { %v3668_v59 = vmul.f32 -1.442695, %v1075_v56  ;;  %v4537_v55 = vpack.c.bf16 %v1459_v54, %v1458_v53  ;;  %v1460_v56 = vld [vmem:[%s6894_s4 + $0x60] sm:$0xff]  ;;  %v6071_v48 = vld [vmem:[%s6899_s9 + $0x8] ss:$12 sps:$4 sm:$0xff]  }
 0x7a4   :  { %v3669_v62 = vmul.f32 -1.442695, %v1085_v60  ;;  %v4540_v33 = vpack.c.bf16 %v1461_v57, %v1460_v56  ;;  %v1463_v60 = vld [vmem:[%s6894_s4 + $0x78] sm:$0xff] }
 0x7a5   :  { %4813 = vpow2.f32 %v3668_v59  ;;  %v1462_v59 = vld [vmem:[%s6894_s4 + $0x70] sm:$0xff] }
 0x7a6   :  { %4815 = vpow2.f32 %v3669_v62  ;;  %v4543_v62 = vpack.c.bf16 %v1463_v60, %v1462_v59  ;;  %v6109_v59 = vld [vmem:[%s6899_s9 + $0x64] ss:$12 sps:$4 sm:$0xff]   ;;  %v6114_v60 = vld [vmem:[%s6899_s9 + $0x60] ss:$12 sps:$4 sm:$0xff]  }
 0x7af   :  { %v4814_v63 = vpop.eup %4813 }
 0x7b0   :  { %v1079_v34 = vadd.f32 1.0, %v4814_v63  ;;  %v4816_v29 = vpop.eup %4815  ;;  %v6012_v63 = vld [vmem:[%s6899_s9 + $0x4] ss:$12 sps:$4 sm:$0xff]  }
 0x7b1   :  { %v1089_v35 = vadd.f32 1.0, %v4816_v29  ;;  %v6022_v29 = vld [vmem:[%s6899_s9 + $0x1c] ss:$12 sps:$4 sm:$0xff]   ;;  %1722 = vmatprep.subr.bf16.mxu1 %v6012_v63 }
 0x7b2   :  { %4817 = vrcp.f32 %v1079_v34  ;;  %v6017_v34 = vld [vmem:[%s6899_s9] ss:$12 sps:$4 sm:$0xff]  }
 0x7b3   :  { %4819 = vrcp.f32 %v1089_v35  ;;  %v6029_v35 = vld [vmem:[%s6899_s9 + $0x18] ss:$12 sps:$4 sm:$0xff]  }
 0x7bc   :  { %v4818_v3 = vpop.eup %4817 }
 0x7bd   :  { %v1092_v4 = vmul.f32 %v4818_v3, %v1070_v42  ;;  %v4820_v7 = vpop.eup %4819  ;;  %v6035_v42 = vld [vmem:[%s6899_s9 + $0x34] ss:$12 sps:$4 sm:$0xff]   ;;  %v6047_v3 = vld [vmem:[%s6899_s9 + $0x4c] ss:$12 sps:$4 sm:$0xff]  }
 0x7be   :  { %v1097_v10 = vsub.f32 1.0, %v4820_v7  ;;  %v1099_v41 = vmul.f32 %v4820_v7, %v5861_v13 }
 0x7bf   :  { %v1095_v6 = vadd.f32 %v1093_v39, %v1092_v4  ;;  %v6041_v39 = vld [vmem:[%s6899_s9 + $0x30] ss:$12 sps:$4 sm:$0xff]   ;;  %v6053_v4 = vld [vmem:[%s6899_s9 + $0x48] ss:$12 sps:$4 sm:$0xff]  }
 0x7c1   :  { %4821 = vtanh.f32 %v1095_v6  ;;  %v3670_v6 = vld [vmem:[%s6916_s5 + $0x2a] sm:$0x3f] }
 0x7c2   :  { %v1199_v61 = vrot.slane %v3670_v6, 2 }
 0x7cb   :  { %v4822_v11 = vpop.eup %4821 }
 0x7cc   :  { %v1098_v50 = vmul.f32 %v4822_v11, %v1097_v10 }
 0x7ce   :  { %v1100_v14 = vadd.f32 %v1099_v41, %v1098_v50 }
 0x7d0   :  { %v1101_v16 = vmul.f32 %v3667_v26, %v1100_v14 }
 0x7d2   :  { %v5945_v8 = vadd.f32 %v1103_v17, %v1101_v16  ;;  %v1252_v58 = vsel %vm1223_vm1, %v5589_v47, %v1101_v16  ;;  %v1392_v43 = vsel %vm1223_vm1, %v1101_v16, %v5589_v47  ;;  %v1448_v47 = vld [vmem:[%s6894_s4] sm:$0xff] }
 0x7d3   :  { %v1260_v37 = vrot.slane %v1252_v58, %v5752_v5  ;;  %v1400_v2 = vrot.slane %v1392_v43, %v5752_v5  ;;  %v4522_v45 = vpack.c.bf16 %v1449_v12, %v1448_v47 }
 0x7d4   :  { %v1109_v9 = vpack.c.bf16 %v5945_v8, %v5945_v8 }
 0x7d5   :  { %v1261_v44 = vcombine.high %v1260_v37, %v1260_v37  ;;  %3676 = vst.sshfl [vmem:[#allocation2 + $0x1] sm:$0x1 pattern:$0x73625140] %v1260_v37  ;;  %v1401_v13 = vcombine.high %v1400_v2, %v1400_v2 }
 0x7d6   :  { %3686 = vst.sshfl [vmem:[#allocation2 + $0x6] sm:$0x1 pattern:$0x73625140] %v1400_v2  ;;  %1143 = vmatmul.mubr.bf16.vlgmr.msra.gmra.mrb[28].mxu0 %v1109_v9  ;;  %4163 = vmatmul.mubr.bf16.vlgmr.msra.gmra.mrb[28].mxu1 %v1109_v9 }
 0x7d7   :  { %3677 = vst.sshfl [vmem:[#allocation2 + $0x9] sm:$0x1 pattern:$0x73625140] %v1261_v44  ;;  %4198 = vmatprep.mubr.msk.f32.mxu0 %vm5154_vm0, %v5152_v0  ;;  %1754 = vmatprep.mubr.bf16.mxu1 %v5153_v1 }
 0x7d8   :  { %3687 = vst.sshfl [vmem:[#allocation2 + $0xe] sm:$0x1 pattern:$0x73625140] %v1401_v13  ;;  %4523 = vmatpush3.bf16.msra.mxu0 %v4522_v45  ;;  %1723 = vmatpush1.bf16.msra.mxu1 %v6017_v34  ;;  %v1209_v45 = vrot.slane %v3670_v6, 4 }
 0x7d9   :  { %4524 = vmatprep.subr.bf16.mxu0 %v5156_v15  ;;  %1724 = vmatprep.subr.bf16.mxu1 %v6022_v29 }
 0x7dc   :  { %4526 = vmatpush3.bf16.msra.mxu0 %v4525_v19  ;;  %1725 = vmatpush1.bf16.msra.mxu1 %v6029_v35  ;;  %v3671_v19 = vld [vmem:[%s6917_s25 + $0xe] sm:$0x3] }
 0x7dd   :  { %4527 = vmatprep.subr.bf16.mxu0 %v5156_v15  ;;  %1726 = vmatprep.subr.bf16.mxu1 %v6035_v42  ;;  %v1218_v24 = vsub.f32 1.0, %v3671_v19 }
 0x7e0   :  { %4529 = vmatpush3.bf16.msra.mxu0 %v4528_v22  ;;  %1727 = vmatpush1.bf16.msra.mxu1 %v6041_v39 }
 0x7e1   :  { %4530 = vmatprep.subr.bf16.mxu0 %v5156_v15  ;;  %1728 = vmatprep.subr.bf16.mxu1 %v6047_v3 }
 0x7e4   :  { %4532 = vmatpush3.bf16.msra.mxu0 %v4531_v25  ;;  %1729 = vmatpush1.bf16.msra.mxu1 %v6053_v4 }
 0x7e5   :  { %4533 = vmatprep.subr.bf16.mxu0 %v5156_v15  ;;  %1730 = vmatprep.subr.bf16.mxu1 %v6109_v59 }
 0x7e8   :  { %4535 = vmatpush3.bf16.msra.mxu0 %v4534_v49  ;;  %1731 = vmatpush1.bf16.msra.mxu1 %v6114_v60 }
 0x7e9   :  { %4536 = vmatprep.subr.bf16.mxu0 %v5156_v15 }
 0x7ec   :  { %4538 = vmatpush3.bf16.msra.mxu0 %v4537_v55 }
 0x7ed   :  { %4539 = vmatprep.subr.bf16.mxu0 %v5156_v15 }
 0x7f0   :  { %4541 = vmatpush3.bf16.msra.mxu0 %v4540_v33  ;;  %v6085_v33 = vld [vmem:[%s6899_s9 + $0x20] ss:$12 sps:$4 sm:$0xff]  }
 0x7f1   :  { %4542 = vmatprep.subr.bf16.mxu0 %v5156_v15 }
 0x7f4   :  { %4544 = vmatpush3.bf16.msra.mxu0 %v4543_v62  ;;  %v6119_v62 = vld [vmem:[%s6899_s9 + $0x68] ss:$12 sps:$4 sm:$0xff]  }
 0x7f5   :  { %4201 = vmatprep.subr.bf16.mxu0 %v5152_v0 }
 0x8a9   :  { %v1144_v7 = vpop.f32.mrb[28].mxu0  ;;  %v1185_v26 = vpop.f32.mrb[28].mxu1 }
 0x8aa   :  { %v1145_v10 = vadd.f32 %v1144_v7, %v5517_v31  ;;  %v1146_v11 = vpop.f32.mrb[29].mxu0  ;;  %v4164_v50 = vpop.f32.mrb[29].mxu1  ;;  %v1186_v12 = vadd.f32 %v1185_v26, %v5531_v52  ;;  %v1219_v52 = vmul.f32 %v1218_v24, %v5945_v8  ;;  %v6133_v7 = vld [vmem:[%s6899_s9 + $0x78] ss:$12 sps:$4 sm:$0xff]   ;;  %v6138_v26 = vld [vmem:[%s6899_s9 + $0x80] ss:$12 sps:$4 sm:$0xff]  }
 0x8ab   :  { %v1147_v41 = vadd.f32 %v1146_v11, %v5521_v32  ;;  %v1148_v14 = vpop.f32.mrb[30].mxu0  ;;  %v1188_v16 = vpop.f32.mrb[30].mxu1  ;;  %v6151_v11 = vld [vmem:[%s6899_s9 + $0x90] ss:$12 sps:$4 sm:$0xff]   ;;  %v6156_v50 = vld [vmem:[%s6899_s9 + $0x98] ss:$12 sps:$4 sm:$0xff]  }
 0x8ac   :  { %v1191_v17 = vadd.f32 %v3670_v6, %v1145_v10  ;;  %v1149_v58 = vpop.f32.mrb[31].mxu0  ;;  %v4165_v43 = vpop.f32.mrb[31].mxu1  ;;  %v6127_v6 = vld [vmem:[%s6899_s9 + $0x7c] ss:$12 sps:$4 sm:$0xff]   ;;  %v6143_v10 = vld [vmem:[%s6899_s9 + $0x94] ss:$12 sps:$4 sm:$0xff]  }
 0x8ad   :  { %v1201_v2 = vadd.f32 %v1199_v61, %v1147_v41  ;;  %1732 = vmatprep.subr.bf16.mxu1 %v6127_v6  ;;  %v6163_v41 = vld [vmem:[%s6899_s9 + $0xac] ss:$12 sps:$4 sm:$0xff]   ;;  %v6170_v61 = vld [vmem:[%s6899_s9 + $0xa8] ss:$12 sps:$4 sm:$0xff]   ;;  %v6175_v14 = vld [vmem:[%s6899_s9 + $0xb0] ss:$12 sps:$4 sm:$0xff]  }
 0x8ae   :  { %v3672_v37 = vmul.f32 -1.442695, %v1191_v17  ;;  %1733 = vmatpush1.bf16.msra.mxu1 %v6133_v7  ;;  %v3690_v16 = vld [vmem:[#allocation7] ss:$0 sm:$0xff] }
 0x8af   :  { %v3673_v9 = vmul.f32 -1.442695, %v1201_v2  ;;  %1734 = vmatprep.subr.bf16.mxu1 %v6143_v10 }
 0x8b0   :  { %4823 = vpow2.f32 %v3672_v37 }
 0x8b1   :  { %4825 = vpow2.f32 %v3673_v9  ;;  %v1574_v9 = vld [vmem:[#allocation9] sm:$0x7] }
 0x8b2   :  { %1735 = vmatpush1.bf16.msra.mxu1 %v6151_v11 }
 0x8b3   :  { %1736 = vmatprep.subr.bf16.mxu1 %v6163_v41 }
 0x8b6   :  { %1737 = vmatpush1.bf16.msra.mxu1 %v6170_v61 }
 0x8b7   :  { %1865 = vmatprep.subr.bf16.mxu1 %v6012_v63 }
 0x8ba   :  { %v4824_v44 = vpop.eup %4823 }
 0x8bb   :  { %v1195_v13 = vadd.f32 1.0, %v4824_v44  ;;  %v4826_v47 = vpop.eup %4825  ;;  %v6224_v44 = vrot.slane %v1574_v9, %v157_v28 }
 0x8bc   :  { %v1205_v31 = vadd.f32 1.0, %v4826_v47  ;;  %v1575_v47 = vld [vmem:[%s6896_s6] sm:$0x3f] }
 0x8bd   :  { %4827 = vrcp.f32 %v1195_v13  ;;  %v6228_v13 = vrot.slane %v1574_v9, %v161_v30 }
 0x8be   :  { %4829 = vrcp.f32 %v1205_v31 }
 0x8c7   :  { %v4828_v32 = vpop.eup %4827 }
 0x8c8   :  { %v1208_v15 = vmul.f32 %v4828_v32, %v1186_v12  ;;  %v4830_v18 = vpop.eup %4829 }
 0x8c9   :  { %v1213_v20 = vsub.f32 1.0, %v4830_v18  ;;  %v1215_v23 = vmul.f32 %v4830_v18, %v5945_v8  ;;  %v1811_v18 = vrot.slane %v1575_v47, 2 }
 0x8ca   :  { %v1211_v46 = vadd.f32 %v1209_v45, %v1208_v15 }
 0x8cc   :  { %4831 = vtanh.f32 %v1211_v46 }
 0x8d6   :  { %v4832_v21 = vpop.eup %4831 }
 0x8d7   :  { %v1214_v22 = vmul.f32 %v4832_v21, %v1213_v20 }
 0x8d9   :  { %v1216_v25 = vadd.f32 %v1215_v23, %v1214_v22 }
 0x8db   :  { %v1217_v40 = vmul.f32 %v3671_v19, %v1216_v25 }
 0x8dd   :  { %v1220_v49 = vadd.f32 %v1219_v52, %v1217_v40  ;;  %v1224_v53 = vsel %vm1223_vm1, %v5537_v38, %v1217_v40  ;;  %v1420_v54 = vsel %vm1223_vm1, %v1217_v40, %v5537_v38  ;;  %v6094_v38 = vld [vmem:[%s6899_s9 + $0x38] ss:$12 sps:$4 sm:$0xff]  }
 0x8de   :  { %v1232_v55 = vrot.slane %v1224_v53, %v5752_v5  ;;  %v1428_v56 = vrot.slane %v1420_v54, %v5752_v5 }
 0x8df   :  { %4199 = vmatmul.mubr.f32.vlgmr.msra.gmra.mrb[32].mxu0 %v1220_v49  ;;  %v6237_v49 = vrot.slane %v1574_v9, %v165_v51 }
 0x8e0   :  { %v1233_v8 = vcombine.high %v1232_v55, %v1232_v55  ;;  %3674 = vst.sshfl [vmem:[#allocation2] sm:$0x1 pattern:$0x73625140] %v1232_v55  ;;  %v1429_v57 = vcombine.high %v1428_v56, %v1428_v56  ;;  %4202 = vmatpush3.bf16.msra.mxu0 %v6071_v48  ;;  %4217 = vmatprep.mubr.msk.bf16.mxu0 %vm5154_vm0, %v5152_v0  ;;  %v1821_v55 = vrot.slane %v1575_v47, 4 }
 0x8e1   :  { %3688 = vst.sshfl [vmem:[#allocation2 + $0x7] sm:$0x1 pattern:$0x73625140] %v1428_v56  ;;  %4203 = vmatprep.subr.bf16.mxu0 %v5152_v0 }
 0x8e2   :  { %3675 = vst.sshfl [vmem:[#allocation2 + $0x8] sm:$0x1 pattern:$0x73625140] %v1233_v8 }
 0x8e3   :  { %3689 = vst.sshfl [vmem:[#allocation2 + $0xf] sm:$0x1 pattern:$0x73625140] %v1429_v57 }
 0x8e4   :  { %4204 = vmatpush3.bf16.msra.mxu0 %v6085_v33 }
 0x8e5   :  { %4205 = vmatprep.subr.bf16.mxu0 %v5152_v0 }
 0x8e8   :  { %4206 = vmatpush3.bf16.msra.mxu0 %v6094_v38 }
 0x8e9   :  { %4207 = vmatprep.subr.bf16.mxu0 %v5152_v0 }
 0x8ec   :  { %4208 = vmatpush3.bf16.msra.mxu0 %v6101_v36 }
 0x8ed   :  { %4209 = vmatprep.subr.bf16.mxu0 %v5152_v0 }
 0x8f0   :  { %4210 = vmatpush3.bf16.msra.mxu0 %v6119_v62 }
 0x8f1   :  { %4211 = vmatprep.subr.bf16.mxu0 %v5152_v0 }
 0x8f4   :  { %4212 = vmatpush3.bf16.msra.mxu0 %v6138_v26 }
 0x8f5   :  { %4213 = vmatprep.subr.bf16.mxu0 %v5152_v0 }
 0x8f8   :  { %4214 = vmatpush3.bf16.msra.mxu0 %v6156_v50 }
 0x8f9   :  { %4215 = vmatprep.subr.bf16.mxu0 %v5152_v0 }
 0x8fc   :  { %4216 = vmatpush3.bf16.msra.mxu0 %v6175_v14 }
 0x8fd   :  { %4221 = vmatprep.subr.bf16.mxu0 %v5152_v0 }
 0x9b2   :  { %v1537_v17 = vpop.f32.mrb[32].mxu0 }
 0x9b3   :  { %v1538_v58 = vadd.f32 %v3690_v16, %v1537_v17  ;;  %v4200_v43 = vpop.f32.mrb[33].mxu0  ;;  %v1576_v17 = vld [vmem:[%s6897_s7] sm:$0x3] }
 0x9b5   :  { %4833 = vtanh.f32 %v1538_v58 }
 0x9bf   :  { %v6183_v37 = vpop.eup %4833 }
 0x9c0   :  { %v1577_v2 = vpack.c.bf16 %v6183_v37, %v6183_v37 }
 0x9c2   :  { %1755 = vmatmul.mubr.bf16.vlgmr.msra.gmra.mrb[32].mxu1 %v1577_v2  ;;  %4218 = vmatmul.mubr.bf16.vlgmr.msra.gmra.mrb[36].mxu0 %v1577_v2  ;;  %v1830_v2 = vsub.f32 1.0, %v1576_v17 }
 0x9c3   :  { %1866 = vmatpush1.bf16.msra.mxu1 %v6017_v34  ;;  %4222 = vmatpush3.bf16.msra.mxu0 %v6071_v48 }
 0x9c4   :  { %1867 = vmatprep.subr.bf16.mxu1 %v6022_v29  ;;  %4223 = vmatprep.subr.bf16.mxu0 %v5152_v0 }
 0x9c5   :  { %1897 = vmatprep.mubr.bf16.mxu1 %v5153_v1  ;;  %4237 = vmatprep.mubr.msk.bf16.mxu0 %vm5154_vm0, %v5152_v0 }
 0x9c7   :  { %1868 = vmatpush1.bf16.msra.mxu1 %v6029_v35  ;;  %4224 = vmatpush3.bf16.msra.mxu0 %v6085_v33 }
 0x9c8   :  { %1869 = vmatprep.subr.bf16.mxu1 %v6035_v42  ;;  %4225 = vmatprep.subr.bf16.mxu0 %v5152_v0 }
 0x9cb   :  { %1870 = vmatpush1.bf16.msra.mxu1 %v6041_v39  ;;  %4226 = vmatpush3.bf16.msra.mxu0 %v6094_v38 }
 0x9cc   :  { %1871 = vmatprep.subr.bf16.mxu1 %v6047_v3  ;;  %4227 = vmatprep.subr.bf16.mxu0 %v5152_v0 }
 0x9cf   :  { %1872 = vmatpush1.bf16.msra.mxu1 %v6053_v4  ;;  %4228 = vmatpush3.bf16.msra.mxu0 %v6101_v36 }
 0x9d0   :  { %1873 = vmatprep.subr.bf16.mxu1 %v6109_v59  ;;  %4229 = vmatprep.subr.bf16.mxu0 %v5152_v0 }
 0x9d3   :  { %1874 = vmatpush1.bf16.msra.mxu1 %v6114_v60  ;;  %4230 = vmatpush3.bf16.msra.mxu0 %v6119_v62 }
 0x9d4   :  { %1875 = vmatprep.subr.bf16.mxu1 %v6127_v6  ;;  %4231 = vmatprep.subr.bf16.mxu0 %v5152_v0 }
 0x9d7   :  { %1876 = vmatpush1.bf16.msra.mxu1 %v6133_v7  ;;  %4232 = vmatpush3.bf16.msra.mxu0 %v6138_v26 }
 0x9d8   :  { %1877 = vmatprep.subr.bf16.mxu1 %v6143_v10  ;;  %4233 = vmatprep.subr.bf16.mxu0 %v5152_v0 }
 0x9db   :  { %1878 = vmatpush1.bf16.msra.mxu1 %v6151_v11  ;;  %4234 = vmatpush3.bf16.msra.mxu0 %v6156_v50 }
 0x9dc   :  { %1879 = vmatprep.subr.bf16.mxu1 %v6163_v41  ;;  %4235 = vmatprep.subr.bf16.mxu0 %v5152_v0 }
 0x9df   :  { %1880 = vmatpush1.bf16.msra.mxu1 %v6170_v61  ;;  %4236 = vmatpush3.bf16.msra.mxu0 %v6175_v14 }
 0x9e0   :  { %2008 = vmatprep.subr.bf16.mxu1 %v6012_v63  ;;  %4241 = vmatprep.subr.bf16.mxu0 %v5152_v0 }
 0xa95   :  { %v1756_v31 = vpop.f32.mrb[32].mxu1  ;;  %v1797_v12 = vpop.f32.mrb[36].mxu0 }
 0xa96   :  { %v1757_v45 = vadd.f32 %v1756_v31, %v6224_v44  ;;  %v1758_v32 = vpop.f32.mrb[33].mxu1  ;;  %v4219_v15 = vpop.f32.mrb[37].mxu0  ;;  %v1798_v54 = vadd.f32 %v1797_v12, %v6237_v49 }
 0xa97   :  { %v1759_v46 = vadd.f32 %v1758_v32, %v6228_v13  ;;  %v1760_v19 = vpop.f32.mrb[34].mxu1  ;;  %v1800_v28 = vpop.f32.mrb[38].mxu0 }
 0xa98   :  { %v1803_v20 = vadd.f32 %v1757_v45, %v1575_v47  ;;  %v1761_v21 = vpop.f32.mrb[35].mxu1  ;;  %v4220_v22 = vpop.f32.mrb[39].mxu0  ;;  %v1831_v47 = vmul.f32 %v6183_v37, %v1830_v2  ;;  %v3720_v2 = vld [vmem:[%s6897_s7 + $0x2] sm:$0x3] }
 0xa99   :  { %v1813_v23 = vadd.f32 %v1811_v18, %v1759_v46 }
 0xa9a   :  { %v3715_v30 = vmul.f32 -1.442695, %v1803_v20 }
 0xa9b   :  { %v3716_v24 = vmul.f32 -1.442695, %v1813_v23 }
 0xa9c   :  { %4835 = vpow2.f32 %v3715_v30 }
 0xa9d   :  { %4837 = vpow2.f32 %v3716_v24 }
 0xaa6   :  { %v4836_v25 = vpop.eup %4835 }
 0xaa7   :  { %v1807_v40 = vadd.f32 1.0, %v4836_v25  ;;  %v4838_v52 = vpop.eup %4837 }
 0xaa8   :  { %v1817_v53 = vadd.f32 1.0, %v4838_v52 }
 0xaa9   :  { %4839 = vrcp.f32 %v1807_v40 }
 0xaaa   :  { %4841 = vrcp.f32 %v1817_v53 }
 0xab3   :  { %v4840_v56 = vpop.eup %4839 }
 0xab4   :  { %v1820_v8 = vmul.f32 %v4840_v56, %v1798_v54  ;;  %v4842_v16 = vpop.eup %4841 }
 0xab5   :  { %v1825_v58 = vsub.f32 1.0, %v4842_v16  ;;  %v1827_v27 = vmul.f32 %v4842_v16, %v6183_v37  ;;  %v3719_v37 = vld [vmem:[%s6896_s6 + $0x6] sm:$0x3f] }
 0xab6   :  { %v1823_v57 = vadd.f32 %v1821_v55, %v1820_v8  ;;  %v1954_v22 = vrot.slane %v3719_v37, 2 }
 0xab8   :  { %4843 = vtanh.f32 %v1823_v57 }
 0xac2   :  { %v4844_v43 = vpop.eup %4843 }
 0xac3   :  { %v1826_v51 = vmul.f32 %v4844_v43, %v1825_v58 }
 0xac5   :  { %v1828_v9 = vadd.f32 %v1827_v27, %v1826_v51 }
 0xac7   :  { %v1829_v31 = vmul.f32 %v1828_v9, %v1576_v17  ;;  %v1964_v17 = vrot.slane %v3719_v37, 4 }
 0xac9   :  { %v6245_v12 = vadd.f32 %v1831_v47, %v1829_v31  ;;  %v1840_v45 = vrot.slane %v1829_v31, %v5752_v5 }
 0xacb   :  { %v1841_v32 = vcombine.high %v1840_v45, %v1840_v45  ;;  %3717 = vst.sshfl [vmem:[#allocation3] sm:$0x1 pattern:$0x73625140] %v1840_v45  ;;  %v1864_v15 = vpack.c.bf16 %v6245_v12, %v6245_v12 }
 0xacd   :  { %3718 = vst.sshfl [vmem:[#allocation3 + $0x8] sm:$0x1 pattern:$0x73625140] %v1841_v32  ;;  %1898 = vmatmul.mubr.bf16.vlgmr.msra.gmra.mrb[36].mxu1 %v1864_v15  ;;  %4238 = vmatmul.mubr.bf16.vlgmr.msra.gmra.mrb[40].mxu0 %v1864_v15  ;;  %v1973_v32 = vsub.f32 1.0, %v3720_v2 }
 0xace   :  { %2009 = vmatpush1.bf16.msra.mxu1 %v6017_v34  ;;  %4242 = vmatpush3.bf16.msra.mxu0 %v6071_v48 }
 0xacf   :  { %2010 = vmatprep.subr.bf16.mxu1 %v6022_v29  ;;  %4243 = vmatprep.subr.bf16.mxu0 %v5152_v0 }
 0xad0   :  { %2040 = vmatprep.mubr.bf16.mxu1 %v5153_v1  ;;  %4257 = vmatprep.mubr.msk.bf16.mxu0 %vm5154_vm0, %v5152_v0 }
 0xad2   :  { %2011 = vmatpush1.bf16.msra.mxu1 %v6029_v35  ;;  %4244 = vmatpush3.bf16.msra.mxu0 %v6085_v33 }
 0xad3   :  { %2012 = vmatprep.subr.bf16.mxu1 %v6035_v42  ;;  %4245 = vmatprep.subr.bf16.mxu0 %v5152_v0 }
 0xad6   :  { %2013 = vmatpush1.bf16.msra.mxu1 %v6041_v39  ;;  %4246 = vmatpush3.bf16.msra.mxu0 %v6094_v38 }
 0xad7   :  { %2014 = vmatprep.subr.bf16.mxu1 %v6047_v3  ;;  %4247 = vmatprep.subr.bf16.mxu0 %v5152_v0 }
 0xada   :  { %2015 = vmatpush1.bf16.msra.mxu1 %v6053_v4  ;;  %4248 = vmatpush3.bf16.msra.mxu0 %v6101_v36 }
 0xadb   :  { %2016 = vmatprep.subr.bf16.mxu1 %v6109_v59  ;;  %4249 = vmatprep.subr.bf16.mxu0 %v5152_v0 }
 0xade   :  { %2017 = vmatpush1.bf16.msra.mxu1 %v6114_v60  ;;  %4250 = vmatpush3.bf16.msra.mxu0 %v6119_v62 }
 0xadf   :  { %2018 = vmatprep.subr.bf16.mxu1 %v6127_v6  ;;  %4251 = vmatprep.subr.bf16.mxu0 %v5152_v0 }
 0xae2   :  { %2019 = vmatpush1.bf16.msra.mxu1 %v6133_v7  ;;  %4252 = vmatpush3.bf16.msra.mxu0 %v6138_v26 }
 0xae3   :  { %2020 = vmatprep.subr.bf16.mxu1 %v6143_v10  ;;  %4253 = vmatprep.subr.bf16.mxu0 %v5152_v0 }
 0xae6   :  { %2021 = vmatpush1.bf16.msra.mxu1 %v6151_v11  ;;  %4254 = vmatpush3.bf16.msra.mxu0 %v6156_v50 }
 0xae7   :  { %2022 = vmatprep.subr.bf16.mxu1 %v6163_v41  ;;  %4255 = vmatprep.subr.bf16.mxu0 %v5152_v0 }
 0xaea   :  { %2023 = vmatpush1.bf16.msra.mxu1 %v6170_v61  ;;  %4256 = vmatpush3.bf16.msra.mxu0 %v6175_v14 }
 0xaeb   :  { %2151 = vmatprep.subr.bf16.mxu1 %v6012_v63  ;;  %4261 = vmatprep.subr.bf16.mxu0 %v5152_v0 }
 0xba0   :  { %v1899_v46 = vpop.f32.mrb[36].mxu1  ;;  %v1940_v18 = vpop.f32.mrb[40].mxu0 }
 0xba1   :  { %v1900_v19 = vadd.f32 %v1899_v46, %v6224_v44  ;;  %v1901_v28 = vpop.f32.mrb[37].mxu1  ;;  %v4239_v20 = vpop.f32.mrb[41].mxu0  ;;  %v1941_v16 = vadd.f32 %v1940_v18, %v6237_v49 }
 0xba2   :  { %v1902_v21 = vadd.f32 %v1901_v28, %v6228_v13  ;;  %v1903_v30 = vpop.f32.mrb[38].mxu1  ;;  %v1943_v23 = vpop.f32.mrb[42].mxu0 }
 0xba3   :  { %v1946_v24 = vadd.f32 %v3719_v37, %v1900_v19  ;;  %v1904_v25 = vpop.f32.mrb[39].mxu1  ;;  %v4240_v40 = vpop.f32.mrb[43].mxu0  ;;  %v1974_v37 = vmul.f32 %v1973_v32, %v6245_v12  ;;  %v3726_v32 = vld [vmem:[%s6897_s7 + $0x4] sm:$0x3] }
 0xba4   :  { %v1956_v53 = vadd.f32 %v1954_v22, %v1902_v21 }
 0xba5   :  { %v3721_v52 = vmul.f32 -1.442695, %v1946_v24 }
 0xba6   :  { %v3722_v54 = vmul.f32 -1.442695, %v1956_v53 }
 0xba7   :  { %4845 = vpow2.f32 %v3721_v52 }
 0xba8   :  { %4847 = vpow2.f32 %v3722_v54 }
 0xbb1   :  { %v4846_v55 = vpop.eup %4845 }
 0xbb2   :  { %v1950_v56 = vadd.f32 1.0, %v4846_v55  ;;  %v4848_v8 = vpop.eup %4847 }
 0xbb3   :  { %v1960_v57 = vadd.f32 1.0, %v4848_v8 }
 0xbb4   :  { %4849 = vrcp.f32 %v1950_v56 }
 0xbb5   :  { %4851 = vrcp.f32 %v1960_v57 }
 0xbbe   :  { %v4850_v58 = vpop.eup %4849 }
 0xbbf   :  { %v1963_v43 = vmul.f32 %v4850_v58, %v1941_v16  ;;  %v4852_v51 = vpop.eup %4851 }
 0xbc0   :  { %v1968_v9 = vsub.f32 1.0, %v4852_v51  ;;  %v1970_v47 = vmul.f32 %v4852_v51, %v6245_v12  ;;  %v3725_v12 = vld [vmem:[%s6896_s6 + $0xc] sm:$0x3f] }
 0xbc1   :  { %v1966_v27 = vadd.f32 %v1964_v17, %v1963_v43  ;;  %v2097_v40 = vrot.slane %v3725_v12, 2 }
 0xbc3   :  { %4853 = vtanh.f32 %v1966_v27 }
 0xbcd   :  { %v4854_v31 = vpop.eup %4853 }
 0xbce   :  { %v1969_v45 = vmul.f32 %v4854_v31, %v1968_v9 }
 0xbd0   :  { %v1971_v15 = vadd.f32 %v1970_v47, %v1969_v45 }
 0xbd2   :  { %v1972_v46 = vmul.f32 %v3720_v2, %v1971_v15  ;;  %v2107_v2 = vrot.slane %v3725_v12, 4 }
 0xbd4   :  { %v6296_v18 = vadd.f32 %v1974_v37, %v1972_v46  ;;  %v1983_v19 = vrot.slane %v1972_v46, %v5752_v5 }
 0xbd6   :  { %v1984_v28 = vcombine.high %v1983_v19, %v1983_v19  ;;  %3723 = vst.sshfl [vmem:[#allocation3 + $0x1] sm:$0x1 pattern:$0x73625140] %v1983_v19  ;;  %v2007_v20 = vpack.c.bf16 %v6296_v18, %v6296_v18 }
 0xbd8   :  { %3724 = vst.sshfl [vmem:[#allocation3 + $0x9] sm:$0x1 pattern:$0x73625140] %v1984_v28  ;;  %2041 = vmatmul.mubr.bf16.vlgmr.msra.gmra.mrb[40].mxu1 %v2007_v20  ;;  %4258 = vmatmul.mubr.bf16.vlgmr.msra.gmra.mrb[44].mxu0 %v2007_v20  ;;  %v2116_v28 = vsub.f32 1.0, %v3726_v32 }
 0xbd9   :  { %2152 = vmatpush1.bf16.msra.mxu1 %v6017_v34  ;;  %4262 = vmatpush3.bf16.msra.mxu0 %v6071_v48 }
 0xbda   :  { %2153 = vmatprep.subr.bf16.mxu1 %v6022_v29  ;;  %4263 = vmatprep.subr.bf16.mxu0 %v5152_v0 }
 0xbdb   :  { %2183 = vmatprep.mubr.bf16.mxu1 %v5153_v1  ;;  %4277 = vmatprep.mubr.msk.bf16.mxu0 %vm5154_vm0, %v5152_v0 }
 0xbdd   :  { %2154 = vmatpush1.bf16.msra.mxu1 %v6029_v35  ;;  %4264 = vmatpush3.bf16.msra.mxu0 %v6085_v33 }
 0xbde   :  { %2155 = vmatprep.subr.bf16.mxu1 %v6035_v42  ;;  %4265 = vmatprep.subr.bf16.mxu0 %v5152_v0 }
 0xbe1   :  { %2156 = vmatpush1.bf16.msra.mxu1 %v6041_v39  ;;  %4266 = vmatpush3.bf16.msra.mxu0 %v6094_v38 }
 0xbe2   :  { %2157 = vmatprep.subr.bf16.mxu1 %v6047_v3  ;;  %4267 = vmatprep.subr.bf16.mxu0 %v5152_v0 }
 0xbe5   :  { %2158 = vmatpush1.bf16.msra.mxu1 %v6053_v4  ;;  %4268 = vmatpush3.bf16.msra.mxu0 %v6101_v36 }
 0xbe6   :  { %2159 = vmatprep.subr.bf16.mxu1 %v6109_v59  ;;  %4269 = vmatprep.subr.bf16.mxu0 %v5152_v0 }
 0xbe9   :  { %2160 = vmatpush1.bf16.msra.mxu1 %v6114_v60  ;;  %4270 = vmatpush3.bf16.msra.mxu0 %v6119_v62 }
 0xbea   :  { %2161 = vmatprep.subr.bf16.mxu1 %v6127_v6  ;;  %4271 = vmatprep.subr.bf16.mxu0 %v5152_v0 }
 0xbed   :  { %2162 = vmatpush1.bf16.msra.mxu1 %v6133_v7  ;;  %4272 = vmatpush3.bf16.msra.mxu0 %v6138_v26 }
 0xbee   :  { %2163 = vmatprep.subr.bf16.mxu1 %v6143_v10  ;;  %4273 = vmatprep.subr.bf16.mxu0 %v5152_v0 }
 0xbf1   :  { %2164 = vmatpush1.bf16.msra.mxu1 %v6151_v11  ;;  %4274 = vmatpush3.bf16.msra.mxu0 %v6156_v50 }
 0xbf2   :  { %2165 = vmatprep.subr.bf16.mxu1 %v6163_v41  ;;  %4275 = vmatprep.subr.bf16.mxu0 %v5152_v0 }
 0xbf5   :  { %2166 = vmatpush1.bf16.msra.mxu1 %v6170_v61  ;;  %4276 = vmatpush3.bf16.msra.mxu0 %v6175_v14 }
 0xbf6   :  { %2294 = vmatprep.subr.bf16.mxu1 %v6012_v63  ;;  %4281 = vmatprep.subr.bf16.mxu0 %v5152_v0 }
 0xcab   :  { %v2042_v21 = vpop.f32.mrb[40].mxu1  ;;  %v2083_v22 = vpop.f32.mrb[44].mxu0 }
 0xcac   :  { %v2043_v30 = vadd.f32 %v2042_v21, %v6224_v44  ;;  %v2044_v23 = vpop.f32.mrb[41].mxu1  ;;  %v4259_v24 = vpop.f32.mrb[45].mxu0  ;;  %v2084_v51 = vadd.f32 %v2083_v22, %v6237_v49 }
 0xcad   :  { %v2045_v25 = vadd.f32 %v2044_v23, %v6228_v13  ;;  %v2046_v52 = vpop.f32.mrb[42].mxu1  ;;  %v2086_v53 = vpop.f32.mrb[46].mxu0 }
 0xcae   :  { %v2089_v54 = vadd.f32 %v3725_v12, %v2043_v30  ;;  %v2047_v55 = vpop.f32.mrb[43].mxu1  ;;  %v4260_v56 = vpop.f32.mrb[47].mxu0  ;;  %v2117_v12 = vmul.f32 %v2116_v28, %v6296_v18  ;;  %v3732_v28 = vld [vmem:[%s6897_s7 + $0x6] sm:$0x3] }
 0xcaf   :  { %v2099_v57 = vadd.f32 %v2097_v40, %v2045_v25 }
 0xcb0   :  { %v3727_v8 = vmul.f32 -1.442695, %v2089_v54 }
 0xcb1   :  { %v3728_v16 = vmul.f32 -1.442695, %v2099_v57 }
 0xcb2   :  { %4855 = vpow2.f32 %v3727_v8 }
 0xcb3   :  { %4857 = vpow2.f32 %v3728_v16 }
 0xcbc   :  { %v4856_v17 = vpop.eup %4855 }
 0xcbd   :  { %v2093_v58 = vadd.f32 1.0, %v4856_v17  ;;  %v4858_v43 = vpop.eup %4857 }
 0xcbe   :  { %v2103_v27 = vadd.f32 1.0, %v4858_v43 }
 0xcbf   :  { %4859 = vrcp.f32 %v2093_v58 }
 0xcc0   :  { %4861 = vrcp.f32 %v2103_v27 }
 0xcc9   :  { %v4860_v9 = vpop.eup %4859 }
 0xcca   :  { %v2106_v31 = vmul.f32 %v4860_v9, %v2084_v51  ;;  %v4862_v45 = vpop.eup %4861 }
 0xccb   :  { %v2111_v15 = vsub.f32 1.0, %v4862_v45  ;;  %v2113_v37 = vmul.f32 %v4862_v45, %v6296_v18  ;;  %v3731_v18 = vld [vmem:[%s6896_s6 + $0x12] sm:$0x3f] }
 0xccc   :  { %v2109_v47 = vadd.f32 %v2107_v2, %v2106_v31  ;;  %v2240_v56 = vrot.slane %v3731_v18, 2 }
 0xcce   :  { %4863 = vtanh.f32 %v2109_v47 }
 0xcd8   :  { %v4864_v46 = vpop.eup %4863 }
 0xcd9   :  { %v2112_v19 = vmul.f32 %v4864_v46, %v2111_v15 }
 0xcdb   :  { %v2114_v20 = vadd.f32 %v2113_v37, %v2112_v19 }
 0xcdd   :  { %v2115_v21 = vmul.f32 %v3726_v32, %v2114_v20  ;;  %v2250_v32 = vrot.slane %v3731_v18, 4 }
 0xcdf   :  { %v6347_v22 = vadd.f32 %v2117_v12, %v2115_v21  ;;  %v2126_v30 = vrot.slane %v2115_v21, %v5752_v5 }
 0xce1   :  { %v2127_v23 = vcombine.high %v2126_v30, %v2126_v30  ;;  %3729 = vst.sshfl [vmem:[#allocation3 + $0x2] sm:$0x1 pattern:$0x73625140] %v2126_v30  ;;  %v2150_v24 = vpack.c.bf16 %v6347_v22, %v6347_v22 }
 0xce3   :  { %3730 = vst.sshfl [vmem:[#allocation3 + $0xa] sm:$0x1 pattern:$0x73625140] %v2127_v23  ;;  %2184 = vmatmul.mubr.bf16.vlgmr.msra.gmra.mrb[44].mxu1 %v2150_v24  ;;  %4278 = vmatmul.mubr.bf16.vlgmr.msra.gmra.mrb[48].mxu0 %v2150_v24  ;;  %v2259_v23 = vsub.f32 1.0, %v3732_v28 }
 0xce4   :  { %2295 = vmatpush1.bf16.msra.mxu1 %v6017_v34  ;;  %4282 = vmatpush3.bf16.msra.mxu0 %v6071_v48 }
 0xce5   :  { %2296 = vmatprep.subr.bf16.mxu1 %v6022_v29  ;;  %4283 = vmatprep.subr.bf16.mxu0 %v5152_v0 }
 0xce6   :  { %2326 = vmatprep.mubr.bf16.mxu1 %v5153_v1  ;;  %4297 = vmatprep.mubr.msk.bf16.mxu0 %vm5154_vm0, %v5152_v0 }
 0xce8   :  { %2297 = vmatpush1.bf16.msra.mxu1 %v6029_v35  ;;  %4284 = vmatpush3.bf16.msra.mxu0 %v6085_v33 }
 0xce9   :  { %2298 = vmatprep.subr.bf16.mxu1 %v6035_v42  ;;  %4285 = vmatprep.subr.bf16.mxu0 %v5152_v0 }
 0xcec   :  { %2299 = vmatpush1.bf16.msra.mxu1 %v6041_v39  ;;  %4286 = vmatpush3.bf16.msra.mxu0 %v6094_v38 }
 0xced   :  { %2300 = vmatprep.subr.bf16.mxu1 %v6047_v3  ;;  %4287 = vmatprep.subr.bf16.mxu0 %v5152_v0 }
 0xcf0   :  { %2301 = vmatpush1.bf16.msra.mxu1 %v6053_v4  ;;  %4288 = vmatpush3.bf16.msra.mxu0 %v6101_v36 }
 0xcf1   :  { %2302 = vmatprep.subr.bf16.mxu1 %v6109_v59  ;;  %4289 = vmatprep.subr.bf16.mxu0 %v5152_v0 }
 0xcf4   :  { %2303 = vmatpush1.bf16.msra.mxu1 %v6114_v60  ;;  %4290 = vmatpush3.bf16.msra.mxu0 %v6119_v62 }
 0xcf5   :  { %2304 = vmatprep.subr.bf16.mxu1 %v6127_v6  ;;  %4291 = vmatprep.subr.bf16.mxu0 %v5152_v0 }
 0xcf8   :  { %2305 = vmatpush1.bf16.msra.mxu1 %v6133_v7  ;;  %4292 = vmatpush3.bf16.msra.mxu0 %v6138_v26 }
 0xcf9   :  { %2306 = vmatprep.subr.bf16.mxu1 %v6143_v10  ;;  %4293 = vmatprep.subr.bf16.mxu0 %v5152_v0 }
 0xcfc   :  { %2307 = vmatpush1.bf16.msra.mxu1 %v6151_v11  ;;  %4294 = vmatpush3.bf16.msra.mxu0 %v6156_v50 }
 0xcfd   :  { %2308 = vmatprep.subr.bf16.mxu1 %v6163_v41  ;;  %4295 = vmatprep.subr.bf16.mxu0 %v5152_v0 }
 0xd00   :  { %2309 = vmatpush1.bf16.msra.mxu1 %v6170_v61  ;;  %4296 = vmatpush3.bf16.msra.mxu0 %v6175_v14 }
 0xd01   :  { %2437 = vmatprep.subr.bf16.mxu1 %v6012_v63  ;;  %4301 = vmatprep.subr.bf16.mxu0 %v5152_v0 }
 0xdb6   :  { %v2185_v25 = vpop.f32.mrb[44].mxu1  ;;  %v2226_v40 = vpop.f32.mrb[48].mxu0 }
 0xdb7   :  { %v2186_v52 = vadd.f32 %v2185_v25, %v6224_v44  ;;  %v2187_v53 = vpop.f32.mrb[45].mxu1  ;;  %v4279_v54 = vpop.f32.mrb[49].mxu0  ;;  %v2227_v45 = vadd.f32 %v2226_v40, %v6237_v49 }
 0xdb8   :  { %v2188_v55 = vadd.f32 %v2187_v53, %v6228_v13  ;;  %v2189_v8 = vpop.f32.mrb[46].mxu1  ;;  %v2229_v57 = vpop.f32.mrb[50].mxu0 }
 0xdb9   :  { %v2232_v16 = vadd.f32 %v3731_v18, %v2186_v52  ;;  %v2190_v17 = vpop.f32.mrb[47].mxu1  ;;  %v4280_v58 = vpop.f32.mrb[51].mxu0  ;;  %v2260_v18 = vmul.f32 %v2259_v23, %v6347_v22 }
 0xdba   :  { %v2242_v27 = vadd.f32 %v2240_v56, %v2188_v55 }
 0xdbb   :  { %v3733_v43 = vmul.f32 -1.442695, %v2232_v16 }
 0xdbc   :  { %v3734_v51 = vmul.f32 -1.442695, %v2242_v27 }
 0xdbd   :  { %4865 = vpow2.f32 %v3733_v43 }
 0xdbe   :  { %4867 = vpow2.f32 %v3734_v51 }
 0xdc7   :  { %v4866_v2 = vpop.eup %4865 }
 0xdc8   :  { %v2236_v9 = vadd.f32 1.0, %v4866_v2  ;;  %v4868_v31 = vpop.eup %4867 }
 0xdc9   :  { %v2246_v47 = vadd.f32 1.0, %v4868_v31 }
 0xdca   :  { %4869 = vrcp.f32 %v2236_v9 }
 0xdcb   :  { %4871 = vrcp.f32 %v2246_v47 }
 0xdd4   :  { %v4870_v15 = vpop.eup %4869 }
 0xdd5   :  { %v2249_v46 = vmul.f32 %v4870_v15, %v2227_v45  ;;  %v4872_v19 = vpop.eup %4871 }
 0xdd6   :  { %v2254_v20 = vsub.f32 1.0, %v4872_v19  ;;  %v2256_v12 = vmul.f32 %v4872_v19, %v6347_v22 }
 0xdd7   :  { %v2252_v37 = vadd.f32 %v2250_v32, %v2249_v46  ;;  %v3738_v46 = vld [vmem:[%s6897_s7 + $0x8] sm:$0x3] }
 0xdd9   :  { %4873 = vtanh.f32 %v2252_v37 }
 0xde3   :  { %v4874_v21 = vpop.eup %4873 }
 0xde4   :  { %v2255_v30 = vmul.f32 %v4874_v21, %v2254_v20  ;;  %v2402_v21 = vsub.f32 1.0, %v3738_v46 }
 0xde6   :  { %v2257_v24 = vadd.f32 %v2256_v12, %v2255_v30 }
 0xde8   :  { %v2258_v25 = vmul.f32 %v3732_v28, %v2257_v24 }
 0xdea   :  { %v6398_v40 = vadd.f32 %v2260_v18, %v2258_v25  ;;  %v2269_v52 = vrot.slane %v2258_v25, %v5752_v5 }
 0xdec   :  { %v2270_v53 = vcombine.high %v2269_v52, %v2269_v52  ;;  %3735 = vst.sshfl [vmem:[#allocation3 + $0x3] sm:$0x1 pattern:$0x73625140] %v2269_v52  ;;  %v2293_v54 = vpack.c.bf16 %v6398_v40, %v6398_v40  ;;  %v2403_v23 = vmul.f32 %v2402_v21, %v6398_v40  ;;  %v4971_v21 = vld [vmem:[%s6899_s9 + $0x64] ss:$12 sps:$4 sm:$0xff]  }
 0xdee   :  { %3736 = vst.sshfl [vmem:[#allocation3 + $0xb] sm:$0x1 pattern:$0x73625140] %v2270_v53  ;;  %2327 = vmatmul.mubr.bf16.vlgmr.msra.gmra.mrb[48].mxu1 %v2293_v54  ;;  %4298 = vmatmul.mubr.bf16.vlgmr.msra.gmra.mrb[52].mxu0 %v2293_v54  ;;  %v6457_v53 = vld [vmem:[%s6899_s9] ss:$12 sps:$4 sm:$0xff]  }
 0xdef   :  { %2438 = vmatpush1.bf16.msra.mxu1 %v6017_v34  ;;  %4302 = vmatpush3.bf16.msra.mxu0 %v6071_v48  ;;  %v3737_v34 = vld [vmem:[%s6896_s6 + $0x18] sm:$0x3f] }
 0xdf0   :  { %2439 = vmatprep.subr.bf16.mxu1 %v6022_v29  ;;  %4303 = vmatprep.subr.bf16.mxu0 %v5152_v0  ;;  %v2383_v22 = vrot.slane %v3737_v34, 2  ;;  %v2393_v31 = vrot.slane %v3737_v34, 4  ;;  %v6474_v54 = vld [vmem:[%s6899_s9 + $0x18] ss:$12 sps:$4 sm:$0xff]  }
 0xdf1   :  { %2469 = vmatprep.mubr.bf16.mxu1 %v5153_v1  ;;  %4317 = vmatprep.mubr.msk.bf16.mxu0 %vm5154_vm0, %v5152_v0 }
 0xdf3   :  { %2440 = vmatpush1.bf16.msra.mxu1 %v6029_v35  ;;  %4304 = vmatpush3.bf16.msra.mxu0 %v6085_v33 }
 0xdf4   :  { %2441 = vmatprep.subr.bf16.mxu1 %v6035_v42  ;;  %4305 = vmatprep.subr.bf16.mxu0 %v5152_v0 }
 0xdf7   :  { %2442 = vmatpush1.bf16.msra.mxu1 %v6041_v39  ;;  %4306 = vmatpush3.bf16.msra.mxu0 %v6094_v38 }
 0xdf8   :  { %2443 = vmatprep.subr.bf16.mxu1 %v6047_v3  ;;  %4307 = vmatprep.subr.bf16.mxu0 %v5152_v0 }
 0xdfb   :  { %2444 = vmatpush1.bf16.msra.mxu1 %v6053_v4  ;;  %4308 = vmatpush3.bf16.msra.mxu0 %v6101_v36 }
 0xdfc   :  { %2445 = vmatprep.subr.bf16.mxu1 %v6109_v59  ;;  %4309 = vmatprep.subr.bf16.mxu0 %v5152_v0 }
 0xdff   :  { %2446 = vmatpush1.bf16.msra.mxu1 %v6114_v60  ;;  %4310 = vmatpush3.bf16.msra.mxu0 %v6119_v62 }
 0xe00   :  { %2447 = vmatprep.subr.bf16.mxu1 %v6127_v6  ;;  %4311 = vmatprep.subr.bf16.mxu0 %v5152_v0 }
 0xe03   :  { %2448 = vmatpush1.bf16.msra.mxu1 %v6133_v7  ;;  %4312 = vmatpush3.bf16.msra.mxu0 %v6138_v26 }
 0xe04   :  { %2449 = vmatprep.subr.bf16.mxu1 %v6143_v10  ;;  %4313 = vmatprep.subr.bf16.mxu0 %v5152_v0 }
 0xe07   :  { %2450 = vmatpush1.bf16.msra.mxu1 %v6151_v11  ;;  %4314 = vmatpush3.bf16.msra.mxu0 %v6156_v50 }
 0xe08   :  { %2451 = vmatprep.subr.bf16.mxu1 %v6163_v41  ;;  %4315 = vmatprep.subr.bf16.mxu0 %v5152_v0 }
 0xe0b   :  { %2452 = vmatpush1.bf16.msra.mxu1 %v6170_v61  ;;  %4316 = vmatpush3.bf16.msra.mxu0 %v6175_v14 }
 0xe0c   :  { %2580 = vmatprep.subr.bf16.mxu1 %v6012_v63  ;;  %4321 = vmatprep.subr.bf16.mxu0 %v5152_v0 }
 0xec1   :  { %v2328_v29 = vpop.f32.mrb[48].mxu1  ;;  %v2369_v35 = vpop.f32.mrb[52].mxu0 }
 0xec2   :  { %v2329_v42 = vadd.f32 %v2328_v29, %v6224_v44  ;;  %v2330_v39 = vpop.f32.mrb[49].mxu1  ;;  %v4299_v3 = vpop.f32.mrb[53].mxu0  ;;  %v2370_v9 = vadd.f32 %v2369_v35, %v6237_v49  ;;  %v6502_v29 = vld [vmem:[%s6899_s9 + $0x48] ss:$12 sps:$4 sm:$0xff]  }
 0xec3   :  { %v2331_v4 = vadd.f32 %v2330_v39, %v6228_v13  ;;  %v2332_v55 = vpop.f32.mrb[50].mxu1  ;;  %v2372_v56 = vpop.f32.mrb[54].mxu0 }
 0xec4   :  { %v2375_v8 = vadd.f32 %v3737_v34, %v2329_v42  ;;  %v2333_v57 = vpop.f32.mrb[51].mxu1  ;;  %v4300_v63 = vpop.f32.mrb[55].mxu0  ;;  %v6488_v34 = vld [vmem:[%s6899_s9 + $0x30] ss:$12 sps:$4 sm:$0xff]  }
 0xec5   :  { %v2385_v17 = vadd.f32 %v2383_v22, %v2331_v4 }
 0xec6   :  { %v3739_v16 = vmul.f32 -1.442695, %v2375_v8 }
 0xec7   :  { %v3740_v58 = vmul.f32 -1.442695, %v2385_v17 }
 0xec8   :  { %4875 = vpow2.f32 %v3739_v16 }
 0xec9   :  { %4877 = vpow2.f32 %v3740_v58  ;;  %v3744_v58 = vld [vmem:[%s6897_s7 + $0xa] sm:$0x3] }
 0xed2   :  { %v4876_v43 = vpop.eup %4875 }
 0xed3   :  { %v2379_v27 = vadd.f32 1.0, %v4876_v43  ;;  %v4878_v51 = vpop.eup %4877 }
 0xed4   :  { %v2389_v2 = vadd.f32 1.0, %v4878_v51 }
 0xed5   :  { %4879 = vrcp.f32 %v2379_v27 }
 0xed6   :  { %4881 = vrcp.f32 %v2389_v2 }
 0xedf   :  { %v4880_v47 = vpop.eup %4879 }
 0xee0   :  { %v2392_v45 = vmul.f32 %v4880_v47, %v2370_v9  ;;  %v4882_v15 = vpop.eup %4881  ;;  %v2545_v9 = vsub.f32 1.0, %v3744_v58 }
 0xee1   :  { %v2397_v37 = vsub.f32 1.0, %v4882_v15  ;;  %v2399_v28 = vmul.f32 %v4882_v15, %v6398_v40  ;;  %v6464_v40 = vld [vmem:[%s6899_s9 + $0x1c] ss:$12 sps:$4 sm:$0xff]  }
 0xee2   :  { %v2395_v32 = vadd.f32 %v2393_v31, %v2392_v45 }
 0xee4   :  { %4883 = vtanh.f32 %v2395_v32 }
 0xeee   :  { %v4884_v19 = vpop.eup %4883 }
 0xeef   :  { %v2398_v20 = vmul.f32 %v4884_v19, %v2397_v37  ;;  %v4967_v19 = vld [vmem:[%s6899_s9 + $0x8] ss:$12 sps:$4 sm:$0xff]  }
 0xef1   :  { %v2400_v12 = vadd.f32 %v2399_v28, %v2398_v20  ;;  %v4968_v28 = vld [vmem:[%s6899_s9 + $0x20] ss:$12 sps:$4 sm:$0xff]   ;;  %v4970_v20 = vld [vmem:[%s6899_s9 + $0x50] ss:$12 sps:$4 sm:$0xff]  }
 0xef3   :  { %v2401_v30 = vmul.f32 %v3738_v46, %v2400_v12  ;;  %v4972_v12 = vld [vmem:[%s6899_s9 + $0x60] ss:$12 sps:$4 sm:$0xff]  }
 0xef5   :  { %v6449_v24 = vadd.f32 %v2403_v23, %v2401_v30  ;;  %v2412_v25 = vrot.slane %v2401_v30, %v5752_v5  ;;  %v4973_v30 = vld [vmem:[%s6899_s9 + $0x68] ss:$12 sps:$4 sm:$0xff]  }
 0xef6   :  { %v4974_v23 = vld [vmem:[%s6899_s9 + $0x7c] ss:$12 sps:$4 sm:$0xff]  }
 0xef7   :  { %v2413_v18 = vcombine.high %v2412_v25, %v2412_v25  ;;  %3741 = vst.sshfl [vmem:[#allocation3 + $0x4] sm:$0x1 pattern:$0x73625140] %v2412_v25  ;;  %v2436_v52 = vpack.c.bf16 %v6449_v24, %v6449_v24  ;;  %v2546_v45 = vmul.f32 %v2545_v9, %v6449_v24  ;;  %v4976_v25 = vld [vmem:[%s6899_s9 + $0x80] ss:$12 sps:$4 sm:$0xff]  }
 0xef9   :  { %3742 = vst.sshfl [vmem:[#allocation3 + $0xc] sm:$0x1 pattern:$0x73625140] %v2413_v18  ;;  %2470 = vmatmul.mubr.bf16.vlgmr.msra.gmra.mrb[52].mxu1 %v2436_v52  ;;  %4318 = vmatmul.mubr.bf16.vlgmr.msra.gmra.mrb[56].mxu0 %v2436_v52  ;;  %v4977_v18 = vld [vmem:[%s6899_s9 + $0x94] ss:$12 sps:$4 sm:$0xff]  }
 0xefa   :  { %2581 = vmatpush1.bf16.msra.mxu1 %v6457_v53  ;;  %4322 = vmatpush3.bf16.msra.mxu0 %v6071_v48  ;;  %v6481_v48 = vld [vmem:[%s6899_s9 + $0x34] ss:$12 sps:$4 sm:$0xff]   ;;  %v4978_v52 = vld [vmem:[%s6899_s9 + $0x90] ss:$12 sps:$4 sm:$0xff]  }
 0xefb   :  { %2582 = vmatprep.subr.bf16.mxu1 %v6464_v40  ;;  %4323 = vmatprep.subr.bf16.mxu0 %v5152_v0 }
 0xefc   :  { %2612 = vmatprep.mubr.bf16.mxu1 %v5153_v1  ;;  %4337 = vmatprep.mubr.msk.bf16.mxu0 %vm5154_vm0, %v5152_v0 }
 0xefe   :  { %2583 = vmatpush1.bf16.msra.mxu1 %v6474_v54  ;;  %4324 = vmatpush3.bf16.msra.mxu0 %v6085_v33  ;;  %v6495_v33 = vld [vmem:[%s6899_s9 + $0x4c] ss:$12 sps:$4 sm:$0xff]  }
 0xeff   :  { %2584 = vmatprep.subr.bf16.mxu1 %v6481_v48  ;;  %4325 = vmatprep.subr.bf16.mxu0 %v5152_v0 }
 0xf02   :  { %2585 = vmatpush1.bf16.msra.mxu1 %v6488_v34  ;;  %4326 = vmatpush3.bf16.msra.mxu0 %v6094_v38  ;;  %v4966_v38 = vld [vmem:[%s6899_s9 + $0x4] ss:$12 sps:$4 sm:$0xff]  }
 0xf03   :  { %2586 = vmatprep.subr.bf16.mxu1 %v6495_v33  ;;  %4327 = vmatprep.subr.bf16.mxu0 %v5152_v0 }
 0xf06   :  { %2587 = vmatpush1.bf16.msra.mxu1 %v6502_v29  ;;  %4328 = vmatpush3.bf16.msra.mxu0 %v6101_v36  ;;  %v3743_v36 = vld [vmem:[%s6896_s6 + $0x1e] sm:$0x3f] }
 0xf07   :  { %2588 = vmatprep.subr.bf16.mxu1 %v6109_v59  ;;  %4329 = vmatprep.subr.bf16.mxu0 %v5152_v0  ;;  %v2536_v8 = vrot.slane %v3743_v36, 4 }
 0xf0a   :  { %2589 = vmatpush1.bf16.msra.mxu1 %v6114_v60  ;;  %4330 = vmatpush3.bf16.msra.mxu0 %v6119_v62 }
 0xf0b   :  { %2590 = vmatprep.subr.bf16.mxu1 %v6127_v6  ;;  %4331 = vmatprep.subr.bf16.mxu0 %v5152_v0 }
 0xf0e   :  { %2591 = vmatpush1.bf16.msra.mxu1 %v6133_v7  ;;  %4332 = vmatpush3.bf16.msra.mxu0 %v6138_v26 }
 0xf0f   :  { %2592 = vmatprep.subr.bf16.mxu1 %v6143_v10  ;;  %4333 = vmatprep.subr.bf16.mxu0 %v5152_v0  ;;  %v2526_v10 = vrot.slane %v3743_v36, 2 }
 0xf12   :  { %2593 = vmatpush1.bf16.msra.mxu1 %v6151_v11  ;;  %4334 = vmatpush3.bf16.msra.mxu0 %v6156_v50 }
 0xf13   :  { %2594 = vmatprep.subr.bf16.mxu1 %v6163_v41  ;;  %4335 = vmatprep.subr.bf16.mxu0 %v5152_v0 }
 0xf16   :  { %2595 = vmatpush1.bf16.msra.mxu1 %v6170_v61  ;;  %4336 = vmatpush3.bf16.msra.mxu0 %v6175_v14 }
 0xf17   :  { %2723 = vmatprep.subr.bf16.mxu1 %v4966_v38  ;;  %4341 = vmatprep.subr.bf16.mxu0 %v5152_v0  ;;  %v3749_v38 = vld [vmem:[%s6896_s6 + $0x24] sm:$0x3f] }
 0xfcc   :  { %v2471_v59 = vpop.f32.mrb[52].mxu1  ;;  %v2512_v60 = vpop.f32.mrb[56].mxu0 }
 0xfcd   :  { %v2472_v62 = vadd.f32 %v2471_v59, %v6224_v44  ;;  %v2473_v6 = vpop.f32.mrb[53].mxu1  ;;  %v4319_v7 = vpop.f32.mrb[57].mxu0  ;;  %v2513_v56 = vadd.f32 %v2512_v60, %v6237_v49 }
 0xfce   :  { %v2474_v26 = vadd.f32 %v2473_v6, %v6228_v13  ;;  %v2475_v11 = vpop.f32.mrb[54].mxu1  ;;  %v2515_v50 = vpop.f32.mrb[58].mxu0 }
 0xfcf   :  { %v2518_v41 = vadd.f32 %v3743_v36, %v2472_v62  ;;  %v2476_v61 = vpop.f32.mrb[55].mxu1  ;;  %v4320_v14 = vpop.f32.mrb[59].mxu0 }
 0xfd0   :  { %v2528_v42 = vadd.f32 %v2526_v10, %v2474_v26  ;;  %v2669_v26 = vrot.slane %v3749_v38, 2 }
 0xfd1   :  { %v3745_v35 = vmul.f32 -1.442695, %v2518_v41 }
 0xfd2   :  { %v3746_v39 = vmul.f32 -1.442695, %v2528_v42 }
 0xfd3   :  { %4885 = vpow2.f32 %v3745_v35 }
 0xfd4   :  { %4887 = vpow2.f32 %v3746_v39 }
 0xfdd   :  { %v4886_v3 = vpop.eup %4885 }
 0xfde   :  { %v2522_v4 = vadd.f32 1.0, %v4886_v3  ;;  %v4888_v22 = vpop.eup %4887 }
 0xfdf   :  { %v2532_v55 = vadd.f32 1.0, %v4888_v22 }
 0xfe0   :  { %4889 = vrcp.f32 %v2522_v4 }
 0xfe1   :  { %4891 = vrcp.f32 %v2532_v55 }
 0xfea   :  { %v4890_v57 = vpop.eup %4889 }
 0xfeb   :  { %v2535_v63 = vmul.f32 %v4890_v57, %v2513_v56  ;;  %v4892_v17 = vpop.eup %4891  ;;  %v2679_v56 = vrot.slane %v3749_v38, 4 }
 0xfec   :  { %v2540_v43 = vsub.f32 1.0, %v4892_v17  ;;  %v2542_v51 = vmul.f32 %v4892_v17, %v6449_v24  ;;  %v4975_v24 = vld [vmem:[%s6899_s9 + $0x78] ss:$12 sps:$4 sm:$0xff]   ;;  %v3750_v17 = vld [vmem:[%s6897_s7 + $0xc] sm:$0x3] }
 0xfed   :  { %v2538_v16 = vadd.f32 %v2536_v8, %v2535_v63 }
 0xfef   :  { %4893 = vtanh.f32 %v2538_v16 }
 0xff9   :  { %v4894_v27 = vpop.eup %4893 }
 0xffa   :  { %v2541_v2 = vmul.f32 %v4894_v27, %v2540_v43 }
 0xffc   :  { %v2543_v31 = vadd.f32 %v2542_v51, %v2541_v2  ;;  %v2688_v2 = vsub.f32 1.0, %v3750_v17 }
 0xffe   :  { %v2544_v47 = vmul.f32 %v3744_v58, %v2543_v31 }
0x1000   :  { %v6537_v32 = vadd.f32 %v2546_v45, %v2544_v47  ;;  %v2555_v15 = vrot.slane %v2544_v47, %v5752_v5  ;;  %v2864_v45 = vld [vmem:[%s6901_s11 + $0x10] sm:$0xff] }
0x1002   :  { %v2556_v46 = vcombine.high %v2555_v15, %v2555_v15  ;;  %3747 = vst.sshfl [vmem:[#allocation3 + $0x5] sm:$0x1 pattern:$0x73625140] %v2555_v15  ;;  %v2579_v37 = vpack.c.bf16 %v6537_v32, %v6537_v32  ;;  %v2689_v47 = vmul.f32 %v2688_v2, %v6537_v32  ;;  %v2865_v15 = vld [vmem:[%s6901_s11 + $0x18] sm:$0xff] }
0x1004   :  { %3748 = vst.sshfl [vmem:[#allocation3 + $0xd] sm:$0x1 pattern:$0x73625140] %v2556_v46  ;;  %2613 = vmatmul.mubr.bf16.vlgmr.msra.gmra.mrb[56].mxu1 %v2579_v37  ;;  %4338 = vmatmul.mubr.bf16.vlgmr.msra.gmra.mrb[60].mxu0 %v2579_v37 }
0x1005   :  { %2724 = vmatpush1.bf16.msra.mxu1 %v6457_v53  ;;  %4342 = vmatpush3.bf16.msra.mxu0 %v4967_v19  ;;  %v4979_v53 = vld [vmem:[%s6899_s9 + $0x98] ss:$12 sps:$4 sm:$0xff]  }
0x1006   :  { %2725 = vmatprep.subr.bf16.mxu1 %v6464_v40  ;;  %4343 = vmatprep.subr.bf16.mxu0 %v5152_v0  ;;  %v4980_v40 = vld [vmem:[%s6899_s9 + $0xac] ss:$12 sps:$4 sm:$0xff]  }
0x1007   :  { %2755 = vmatprep.mubr.bf16.mxu1 %v5153_v1  ;;  %4357 = vmatprep.mubr.msk.bf16.mxu0 %vm5154_vm0, %v5152_v0  ;;  %v4969_v1 = vld [vmem:[%s6899_s9 + $0x38] ss:$12 sps:$4 sm:$0xff]  }
0x1009   :  { %2726 = vmatpush1.bf16.msra.mxu1 %v6474_v54  ;;  %4344 = vmatpush3.bf16.msra.mxu0 %v4968_v28  ;;  %v4981_v54 = vld [vmem:[%s6899_s9 + $0xa8] ss:$12 sps:$4 sm:$0xff]  }
0x100a   :  { %2727 = vmatprep.subr.bf16.mxu1 %v6481_v48  ;;  %4345 = vmatprep.subr.bf16.mxu0 %v5152_v0  ;;  %v4982_v48 = vld [vmem:[%s6899_s9 + $0xb0] ss:$12 sps:$4 sm:$0xff]  }
0x100d   :  { %2728 = vmatpush1.bf16.msra.mxu1 %v6488_v34  ;;  %4346 = vmatpush3.bf16.msra.mxu0 %v4969_v1  ;;  %v2862_v34 = vld [vmem:[%s6901_s11] sm:$0xff]  ;;  %v4549_v1 = vpack.c.bf16 %v2865_v15, %v2864_v45 }
0x100e   :  { %2729 = vmatprep.subr.bf16.mxu1 %v6495_v33  ;;  %4347 = vmatprep.subr.bf16.mxu0 %v5152_v0  ;;  %v2863_v33 = vld [vmem:[%s6901_s11 + $0x8] sm:$0xff] }
0x1011   :  { %2730 = vmatpush1.bf16.msra.mxu1 %v6502_v29  ;;  %4348 = vmatpush3.bf16.msra.mxu0 %v4970_v20  ;;  %v4545_v29 = vpack.c.bf16 %v2863_v33, %v2862_v34  ;;  %v2867_v20 = vld [vmem:[%s6901_s11 + $0x28] sm:$0xff] }
0x1012   :  { %2731 = vmatprep.subr.bf16.mxu1 %v4971_v21  ;;  %4349 = vmatprep.subr.bf16.mxu0 %v5152_v0  ;;  %v6642_v21 = vld [vmem:[#allocation2] sm:$0xff]  ;;  %v2875_v34 = vld [vmem:[%s6901_s11 + $0x68] sm:$0xff] }
0x1015   :  { %2732 = vmatpush1.bf16.msra.mxu1 %v4972_v12  ;;  %4350 = vmatpush3.bf16.msra.mxu0 %v4973_v30  ;;  %v2868_v30 = vld [vmem:[%s6901_s11 + $0x30] sm:$0xff] }
0x1016   :  { %2733 = vmatprep.subr.bf16.mxu1 %v4974_v23  ;;  %4351 = vmatprep.subr.bf16.mxu0 %v5152_v0  ;;  %v2869_v23 = vld [vmem:[%s6901_s11 + $0x38] sm:$0xff] }
0x1019   :  { %2734 = vmatpush1.bf16.msra.mxu1 %v4975_v24  ;;  %4352 = vmatpush3.bf16.msra.mxu0 %v4976_v25  ;;  %v4557_v24 = vpack.c.bf16 %v2869_v23, %v2868_v30  ;;  %v2870_v25 = vld [vmem:[%s6901_s11 + $0x40] sm:$0xff] }
0x101a   :  { %2735 = vmatprep.subr.bf16.mxu1 %v4977_v18  ;;  %4353 = vmatprep.subr.bf16.mxu0 %v5152_v0  ;;  %v2871_v18 = vld [vmem:[%s6901_s11 + $0x48] sm:$0xff] }
0x101d   :  { %2736 = vmatpush1.bf16.msra.mxu1 %v4978_v52  ;;  %4354 = vmatpush3.bf16.msra.mxu0 %v4979_v53  ;;  %v4561_v52 = vpack.c.bf16 %v2871_v18, %v2870_v25  ;;  %v2872_v53 = vld [vmem:[%s6901_s11 + $0x50] sm:$0xff] }
0x101e   :  { %2737 = vmatprep.subr.bf16.mxu1 %v4980_v40  ;;  %4355 = vmatprep.subr.bf16.mxu0 %v5152_v0  ;;  %v2873_v40 = vld [vmem:[%s6901_s11 + $0x58] sm:$0xff] }
0x1021   :  { %2738 = vmatpush1.bf16.msra.mxu1 %v4981_v54  ;;  %4356 = vmatpush3.bf16.msra.mxu0 %v4982_v48  ;;  %v4565_v54 = vpack.c.bf16 %v2873_v40, %v2872_v53  ;;  %v2874_v48 = vld [vmem:[%s6901_s11 + $0x60] sm:$0xff] }
0x1022   :  { %4396 = vmatprep.subr.mxu0 %v5152_v0  ;;  %4546 = vmatprep.subr.bf16.mxu1 %v4545_v29  ;;  %v4569_v33 = vpack.c.bf16 %v2875_v34, %v2874_v48 }
0x10d7   :  { %v2614_v36 = vpop.f32.mrb[56].mxu1  ;;  %v2655_v59 = vpop.f32.mrb[60].mxu0 }
0x10d8   :  { %v2615_v60 = vadd.f32 %v2614_v36, %v6224_v44  ;;  %v2616_v62 = vpop.f32.mrb[57].mxu1  ;;  %v4339_v6 = vpop.f32.mrb[61].mxu0  ;;  %v2656_v55 = vadd.f32 %v2655_v59, %v6237_v49  ;;  %v6677_v59 = vld [vmem:[#allocation2 + $0x8] sm:$0xff] }
0x10d9   :  { %v2617_v7 = vadd.f32 %v2616_v62, %v6228_v13  ;;  %v2618_v10 = vpop.f32.mrb[58].mxu1  ;;  %v2658_v11 = vpop.f32.mrb[62].mxu0  ;;  %v3287_v62 = vld [vmem:[%s6903_s13 + $0x8] sm:$0xff] }
0x10da   :  { %v2661_v50 = vadd.f32 %v3749_v38, %v2615_v60  ;;  %v2619_v41 = vpop.f32.mrb[59].mxu1  ;;  %v4340_v61 = vpop.f32.mrb[63].mxu0  ;;  %v2877_v38 = vld [vmem:[%s6901_s11 + $0x78] sm:$0xff]  ;;  %v3286_v60 = vld [vmem:[%s6903_s13] sm:$0xff] }
0x10db   :  { %v2671_v35 = vadd.f32 %v2669_v26, %v2617_v7  ;;  %v4577_v6 = vpack.c.bf16 %v3287_v62, %v3286_v60  ;;  %v3288_v7 = vld [vmem:[%s6903_s13 + $0x10] sm:$0xff]  ;;  %v3289_v26 = vld [vmem:[%s6903_s13 + $0x18] sm:$0xff]  ;;  %v3290_v11 = vld [vmem:[%s6903_s13 + $0x20] sm:$0xff] }
0x10dc   :  { %v3751_v14 = vmul.f32 -1.442695, %v2661_v50  ;;  %v4581_v10 = vpack.c.bf16 %v3289_v26, %v3288_v7  ;;  %v3291_v50 = vld [vmem:[%s6903_s13 + $0x28] sm:$0xff]  ;;  %v3292_v61 = vld [vmem:[%s6903_s13 + $0x30] sm:$0xff] }
0x10dd   :  { %v3752_v42 = vmul.f32 -1.442695, %v2671_v35  ;;  %v4585_v41 = vpack.c.bf16 %v3291_v50, %v3290_v11 }
0x10de   :  { %4895 = vpow2.f32 %v3751_v14  ;;  %v3293_v14 = vld [vmem:[%s6903_s13 + $0x38] sm:$0xff] }
0x10df   :  { %4897 = vpow2.f32 %v3752_v42  ;;  %v4589_v35 = vpack.c.bf16 %v3293_v14, %v3292_v61  ;;  %v3294_v42 = vld [vmem:[%s6903_s13 + $0x40] sm:$0xff] }
0x10e8   :  { %v4896_v39 = vpop.eup %4895 }
0x10e9   :  { %v2665_v3 = vadd.f32 1.0, %v4896_v39  ;;  %v4898_v4 = vpop.eup %4897  ;;  %v3295_v39 = vld [vmem:[%s6903_s13 + $0x48] sm:$0xff] }
0x10ea   :  { %v2675_v22 = vadd.f32 1.0, %v4898_v4  ;;  %v3296_v4 = vld [vmem:[%s6903_s13 + $0x50] sm:$0xff] }
0x10eb   :  { %4899 = vrcp.f32 %v2665_v3  ;;  %v4593_v3 = vpack.c.bf16 %v3295_v39, %v3294_v42 }
0x10ec   :  { %4901 = vrcp.f32 %v2675_v22  ;;  %v3297_v22 = vld [vmem:[%s6903_s13 + $0x58] sm:$0xff] }
0x10f5   :  { %v4900_v8 = vpop.eup %4899 }
0x10f6   :  { %v2678_v57 = vmul.f32 %v4900_v8, %v2656_v55  ;;  %v4902_v16 = vpop.eup %4901  ;;  %v4597_v55 = vpack.c.bf16 %v3297_v22, %v3296_v4  ;;  %v3299_v8 = vld [vmem:[%s6903_s13 + $0x68] sm:$0xff] }
0x10f7   :  { %v2683_v58 = vsub.f32 1.0, %v4902_v16  ;;  %v2685_v51 = vmul.f32 %v4902_v16, %v6537_v32  ;;  %v2866_v32 = vld [vmem:[%s6901_s11 + $0x20] sm:$0xff]  ;;  %v3301_v16 = vld [vmem:[%s6903_s13 + $0x78] sm:$0xff] }
0x10f8   :  { %v2681_v63 = vadd.f32 %v2679_v56, %v2678_v57  ;;  %v4553_v12 = vpack.c.bf16 %v2867_v20, %v2866_v32  ;;  %v3298_v56 = vld [vmem:[%s6903_s13 + $0x60] sm:$0xff] }
0x10f9   :  { %v4601_v57 = vpack.c.bf16 %v3299_v8, %v3298_v56 }
0x10fa   :  { %4903 = vtanh.f32 %v2681_v63  ;;  %v3300_v63 = vld [vmem:[%s6903_s13 + $0x70] sm:$0xff] }
0x1104   :  { %v4904_v43 = vpop.eup %4903 }
0x1105   :  { %v2684_v27 = vmul.f32 %v4904_v43, %v2683_v58  ;;  %v3755_v58 = vld [vmem:[%s6896_s6 + $0x2a] sm:$0x3f] }
0x1106   :  { %v2822_v25 = vrot.slane %v3755_v58, 4 }
0x1107   :  { %v2686_v9 = vadd.f32 %v2685_v51, %v2684_v27 }
0x1109   :  { %v2687_v31 = vmul.f32 %v3750_v17, %v2686_v9  ;;  %v4605_v17 = vpack.c.bf16 %v3301_v16, %v3300_v63  ;;  %v3270_v63 = vld [vmem:[%s6902_s12] sm:$0xff]  ;;  %v3271_v16 = vld [vmem:[%s6902_s12 + $0x8] sm:$0xff] }
0x110b   :  { %v6631_v46 = vadd.f32 %v2689_v47, %v2687_v31  ;;  %v2698_v37 = vrot.slane %v2687_v31, %v5752_v5  ;;  %v2812_v47 = vrot.slane %v3755_v58, 2 }
0x110d   :  { %v2699_v19 = vcombine.high %v2698_v37, %v2698_v37  ;;  %3753 = vst.sshfl [vmem:[#allocation3 + $0x6] sm:$0x1 pattern:$0x73625140] %v2698_v37  ;;  %v2722_v28 = vpack.c.bf16 %v6631_v46, %v6631_v46 }
0x110f   :  { %3754 = vst.sshfl [vmem:[#allocation3 + $0xe] sm:$0x1 pattern:$0x73625140] %v2699_v19  ;;  %2756 = vmatmul.mubr.bf16.vlgmr.msra.gmra.mrb[60].mxu1 %v2722_v28  ;;  %4358 = vmatmul.mubr.bf16.vlgmr.msra.gmra.mrb[64].mxu0 %v2722_v28 }
0x1110   :  { %4548 = vmatpush3.bf16.msra.mxu1 %v4545_v29  ;;  %4393 = vmatprep.mubr.f32.mxu1 %v6642_v21  ;;  %v2876_v29 = vld [vmem:[%s6901_s11 + $0x70] sm:$0xff] }
0x1111   :  { %4550 = vmatprep.subr.bf16.mxu1 %v4549_v1  ;;  %4398 = vmatprep.mubr.msk.f32.mxu0 %vm5154_vm0, %v5152_v0  ;;  %v4573_v36 = vpack.c.bf16 %v2877_v38, %v2876_v29 }
0x1114   :  { %4552 = vmatpush3.bf16.msra.mxu1 %v4549_v1 }
0x1115   :  { %4554 = vmatprep.subr.bf16.mxu1 %v4553_v12 }
0x1118   :  { %4556 = vmatpush3.bf16.msra.mxu1 %v4553_v12 }
0x1119   :  { %4558 = vmatprep.subr.bf16.mxu1 %v4557_v24 }
0x111c   :  { %4560 = vmatpush3.bf16.msra.mxu1 %v4557_v24 }
0x111d   :  { %4562 = vmatprep.subr.bf16.mxu1 %v4561_v52 }
0x1120   :  { %4564 = vmatpush3.bf16.msra.mxu1 %v4561_v52 }
0x1121   :  { %4566 = vmatprep.subr.bf16.mxu1 %v4565_v54 }
0x1124   :  { %4568 = vmatpush3.bf16.msra.mxu1 %v4565_v54 }
0x1125   :  { %4570 = vmatprep.subr.bf16.mxu1 %v4569_v33 }
0x1128   :  { %4572 = vmatpush3.bf16.msra.mxu1 %v4569_v33 }
0x1129   :  { %4574 = vmatprep.subr.bf16.mxu1 %v4573_v36 }
0x112c   :  { %4576 = vmatpush3.bf16.msra.mxu1 %v4573_v36 }
0x112d   :  { %4578 = vmatprep.subr.bf16.mxu1 %v4577_v6 }
0x112f   :  { %4394 = vmatmul.mubr.f32.vlgmr.msra.gmra.mrb[64].mxu1 %v6677_v59 }
0x1130   :  { %4580 = vmatpush3.bf16.msra.mxu1 %v4577_v6 }
0x1131   :  { %4582 = vmatprep.subr.bf16.mxu1 %v4581_v10 }
0x1134   :  { %4584 = vmatpush3.bf16.msra.mxu1 %v4581_v10 }
0x1135   :  { %4586 = vmatprep.subr.bf16.mxu1 %v4585_v41 }
0x1138   :  { %4588 = vmatpush3.bf16.msra.mxu1 %v4585_v41 }
0x1139   :  { %4590 = vmatprep.subr.bf16.mxu1 %v4589_v35 }
0x113c   :  { %4592 = vmatpush3.bf16.msra.mxu1 %v4589_v35 }
0x113d   :  { %4594 = vmatprep.subr.bf16.mxu1 %v4593_v3 }
0x1140   :  { %4596 = vmatpush3.bf16.msra.mxu1 %v4593_v3 }
0x1141   :  { %4598 = vmatprep.subr.bf16.mxu1 %v4597_v55 }
0x1144   :  { %4600 = vmatpush3.bf16.msra.mxu1 %v4597_v55 }
0x1145   :  { %4602 = vmatprep.subr.bf16.mxu1 %v4601_v57 }
0x1148   :  { %4604 = vmatpush3.bf16.msra.mxu1 %v4601_v57 }
0x1149   :  { %4606 = vmatprep.subr.bf16.mxu1 %v4605_v17 }
0x114c   :  { %4608 = vmatpush3.bf16.msra.mxu1 %v4605_v17  ;;  %v3272_v17 = vld [vmem:[%s6902_s12 + $0x10] sm:$0xff] }
0x11e2   :  { %v2757_v43 = vpop.f32.mrb[60].mxu1  ;;  %v2798_v27 = vpop.f32.mrb[64].mxu0 }
0x11e3   :  { %v2758_v51 = vadd.f32 %v2757_v43, %v6224_v44  ;;  %v2759_v2 = vpop.f32.mrb[61].mxu1  ;;  %v4359_v9 = vpop.f32.mrb[65].mxu0  ;;  %v2799_v24 = vadd.f32 %v2798_v27, %v6237_v49  ;;  %v3756_v49 = vld [vmem:[%s6897_s7 + $0xe] sm:$0x3]  ;;  %v3273_v43 = vld [vmem:[%s6902_s12 + $0x18] sm:$0xff] }
0x11e4   :  { %v2760_v31 = vadd.f32 %v2759_v2, %v6228_v13  ;;  %v2761_v45 = vpop.f32.mrb[62].mxu1  ;;  %v2801_v15 = vpop.f32.mrb[66].mxu0  ;;  %v4613_v27 = vpack.c.bf16 %v3273_v43, %v3272_v17  ;;  %v3275_v2 = vld [vmem:[%s6902_s12 + $0x28] sm:$0xff] }
0x11e5   :  { %v2804_v37 = vadd.f32 %v3755_v58, %v2758_v51  ;;  %v2762_v19 = vpop.f32.mrb[63].mxu1  ;;  %v4360_v28 = vpop.f32.mrb[67].mxu0  ;;  %v4609_v58 = vpack.c.bf16 %v3271_v16, %v3270_v63  ;;  %v3274_v51 = vld [vmem:[%s6902_s12 + $0x20] sm:$0xff]  ;;  %v3764_v16 = vld [vmem:[#allocation12] ss:$0 sm:$0xff] }
0x11e6   :  { %v2814_v32 = vadd.f32 %v2812_v47, %v2760_v31  ;;  %v4617_v9 = vpack.c.bf16 %v3275_v2, %v3274_v51  ;;  %v3276_v31 = vld [vmem:[%s6902_s12 + $0x30] sm:$0xff]  ;;  %v3277_v47 = vld [vmem:[%s6902_s12 + $0x38] sm:$0xff]  ;;  %v3278_v15 = vld [vmem:[%s6902_s12 + $0x40] sm:$0xff] }
0x11e7   :  { %v3757_v1 = vmul.f32 -1.442695, %v2804_v37  ;;  %4610 = vmatprep.subr.bf16.mxu1 %v4609_v58  ;;  %v4621_v45 = vpack.c.bf16 %v3277_v47, %v3276_v31  ;;  %v3279_v37 = vld [vmem:[%s6902_s12 + $0x48] sm:$0xff]  ;;  %v3280_v28 = vld [vmem:[%s6902_s12 + $0x50] sm:$0xff] }
0x11e8   :  { %v3758_v20 = vmul.f32 -1.442695, %v2814_v32  ;;  %v4625_v19 = vpack.c.bf16 %v3279_v37, %v3278_v15 }
0x11e9   :  { %4905 = vpow2.f32 %v3757_v1  ;;  %v3281_v1 = vld [vmem:[%s6902_s12 + $0x58] sm:$0xff] }
0x11ea   :  { %4907 = vpow2.f32 %v3758_v20  ;;  %v4629_v32 = vpack.c.bf16 %v3281_v1, %v3280_v28  ;;  %v3282_v20 = vld [vmem:[%s6902_s12 + $0x60] sm:$0xff] }
0x11f3   :  { %v4906_v12 = vpop.eup %4905 }
0x11f4   :  { %v2808_v30 = vadd.f32 1.0, %v4906_v12  ;;  %v4908_v23 = vpop.eup %4907  ;;  %v3283_v12 = vld [vmem:[%s6902_s12 + $0x68] sm:$0xff] }
0x11f5   :  { %v2818_v44 = vadd.f32 1.0, %v4908_v23 }
0x11f6   :  { %4909 = vrcp.f32 %v2808_v30  ;;  %v4633_v30 = vpack.c.bf16 %v3283_v12, %v3282_v20 }
0x11f7   :  { %4911 = vrcp.f32 %v2818_v44 }
0x1200   :  { %v4910_v13 = vpop.eup %4909 }
0x1201   :  { %v2821_v18 = vmul.f32 %v4910_v13, %v2799_v24  ;;  %v4912_v54 = vpop.eup %4911 }
0x1202   :  { %v4395_v52 = vpop.f32.mrb[64].mxu1  ;;  %v2826_v48 = vsub.f32 1.0, %v4912_v54  ;;  %v2828_v29 = vmul.f32 %v4912_v54, %v6631_v46  ;;  %v3094_v46 = vld [vmem:[%s6898_s8 + $0x8] sm:$0xff]  ;;  %v3465_v54 = vld [vmem:[%s6905_s15 + $0x10] sm:$0xff] }
0x1203   :  { %v2824_v53 = vadd.f32 %v2822_v25, %v2821_v18  ;;  %v2944_v40 = vpop.f32.mrb[65].mxu1  ;;  %vm3096_vm4 = vcmp.gt.f32.partialorder %v3094_v46, 0.5 }
0x1204   :  { %4397 = vmatpush3.xpose.msra.mxu0 %v2944_v40 }
0x1205   :  { %4913 = vtanh.f32 %v2824_v53  ;;  %4401 = vmatprep.subr.mxu0 %v5152_v0  ;;  %v3285_v53 = vld [vmem:[%s6902_s12 + $0x78] sm:$0xff] }
0x120f   :  { %v4914_v34 = vpop.eup %4913 }
0x1210   :  { %v2827_v33 = vmul.f32 %v4914_v34, %v2826_v48  ;;  %v3466_v34 = vld [vmem:[%s6905_s15 + $0x18] sm:$0xff] }
0x1212   :  { %v2829_v38 = vadd.f32 %v2828_v29, %v2827_v33  ;;  %v4645_v33 = vpack.c.bf16 %v3466_v34, %v3465_v54  ;;  %v3467_v29 = vld [vmem:[%s6905_s15 + $0x20] sm:$0xff] }
0x1214   :  { %v2830_v36 = vmul.f32 %v3756_v49, %v2829_v38  ;;  %v3468_v49 = vld [vmem:[%s6905_s15 + $0x28] sm:$0xff] }
0x1215   :  { %v4649_v38 = vpack.c.bf16 %v3468_v49, %v3467_v29 }
0x1216   :  { %v2838_v60 = vrot.slane %v2830_v36, %v5752_v5  ;;  %v3093_v5 = vld [vmem:[%s6898_s8] sm:$0xff]  ;;  %v3469_v36 = vld [vmem:[%s6905_s15 + $0x30] sm:$0xff] }
0x1217   :  { %vm3095_vm2 = vcmp.gt.f32.partialorder %v3093_v5, 0.5 }
0x1218   :  { %v2839_v62 = vcombine.high %v2838_v60, %v2838_v60  ;;  %3759 = vst.sshfl [vmem:[#allocation3 + $0x7] sm:$0x1 pattern:$0x73625140] %v2838_v60  ;;  %v3470_v60 = vld [vmem:[%s6905_s15 + $0x38] sm:$0xff] }
0x121a   :  { %3760 = vst.sshfl [vmem:[#allocation3 + $0xf] sm:$0x1 pattern:$0x73625140] %v2839_v62  ;;  %v4653_v62 = vpack.c.bf16 %v3470_v60, %v3469_v36 }
0x121f   :  { %v2858_v6 = vld [vmem:[#allocation3] sm:$0xff] }
0x1220   :  { %4399 = vmatmul.mubr.f32.vlgmr.msra.gmra.mrb[34].mxu0 %v2858_v6  ;;  %4448 = vmatprep.mubr.f32.mxu1 %v2858_v6 }
0x1221   :  { %4402 = vmatpush3.xpose.msra.mxu0 %v4395_v52  ;;  %v2859_v7 = vld [vmem:[#allocation3 + $0x8] sm:$0xff]  ;;  %4403 = vmatprep.mubr.msk.f32.mxu0 %vm5154_vm0, %v5152_v0  ;;  %v3284_v52 = vld [vmem:[%s6902_s12 + $0x70] sm:$0xff] }
0x1222   :  { %4449 = vmatmul.mubr.f32.vlgmr.msra.gmra.mrb[66].mxu1 %v2859_v7  ;;  %4406 = vmatprep.subr.mxu0 %v5152_v0  ;;  %v4637_v40 = vpack.c.bf16 %v3285_v53, %v3284_v52 }
0x1223   :  { %4612 = vmatpush3.bf16.msra.mxu1 %v4609_v58 }
0x1224   :  { %4404 = vmatmul.mubr.f32.vlgmr.msra.gmra.mrb[68].mxu0 %v2859_v7  ;;  %4614 = vmatprep.subr.bf16.mxu1 %v4613_v27 }
0x1225   :  { %4407 = vmatpush3.msra.mxu0 %v6642_v21  ;;  %4408 = vmatprep.mubr.msk.f32.mxu0 %vm5154_vm0, %v5152_v0 }
0x1226   :  { %4411 = vmatprep.subr.mxu0 %v5152_v0 }
0x1227   :  { %4616 = vmatpush3.bf16.msra.mxu1 %v4613_v27 }
0x1228   :  { %4618 = vmatprep.subr.bf16.mxu1 %v4617_v9 }
0x122b   :  { %4620 = vmatpush3.bf16.msra.mxu1 %v4617_v9 }
0x122c   :  { %4622 = vmatprep.subr.bf16.mxu1 %v4621_v45 }
0x122f   :  { %4624 = vmatpush3.bf16.msra.mxu1 %v4621_v45 }
0x1230   :  { %4626 = vmatprep.subr.bf16.mxu1 %v4625_v19 }
0x1233   :  { %4628 = vmatpush3.bf16.msra.mxu1 %v4625_v19 }
0x1234   :  { %4630 = vmatprep.subr.bf16.mxu1 %v4629_v32 }
0x1237   :  { %4632 = vmatpush3.bf16.msra.mxu1 %v4629_v32 }
0x1238   :  { %4634 = vmatprep.subr.bf16.mxu1 %v4633_v30 }
0x123b   :  { %4636 = vmatpush3.bf16.msra.mxu1 %v4633_v30 }
0x123c   :  { %4638 = vmatprep.subr.bf16.mxu1 %v4637_v40 }
0x123f   :  { %4640 = vmatpush3.bf16.msra.mxu1 %v4637_v40 }
0x12f3   :  { %v3019_v26 = vpop.f32.mrb[34].mxu0 }
0x12f4   :  { %v3097_v10 = vsel %vm3095_vm2, %v3019_v26, -1000000.0  ;;  %v4400_v11 = vpop.f32.mrb[35].mxu0  ;;  %v3471_v26 = vld [vmem:[%s6905_s15 + $0x40] sm:$0xff] }
0x12f5   :  { %v3100_v21 = vsel %vm3099_vm3, %v3097_v10, -inf }
0x12f6   :  { %3101 = vmax.xlane.f32.xlu0 %v3100_v21  ;;  %v3473_v21 = vld [vmem:[%s6905_s15 + $0x50] sm:$0xff] }
0x12f7   :  { %v3089_v50 = vpop.f32.mrb[68].mxu0 }
0x12f8   :  { %v3098_v41 = vsel %vm3096_vm4, %v3089_v50, -1000000.0  ;;  %v4405_v61 = vpop.f32.mrb[69].mxu0  ;;  %v3474_v50 = vld [vmem:[%s6905_s15 + $0x58] sm:$0xff] }
0x12f9   :  { %v3103_v14 = vsel %vm3099_vm3, %v3098_v41, -inf  ;;  %v3475_v61 = vld [vmem:[%s6905_s15 + $0x60] sm:$0xff] }
0x12fa   :  { %3104 = vmax.xlane.f32.xlu0 %v3103_v14  ;;  %v3476_v14 = vld [vmem:[%s6905_s15 + $0x68] sm:$0xff] }
0x1383   :  { %v3102_v35 = vpop.xlane.xlu0 %3101 }
0x1384   :  { %v3106_v42 = vsub.f32 %v3097_v10, %v3102_v35  ;;  %v3472_v10 = vld [vmem:[%s6905_s15 + $0x48] sm:$0xff]  ;;  %v3477_v35 = vld [vmem:[%s6905_s15 + $0x70] sm:$0xff] }
0x1385   :  { %v4657_v11 = vpack.c.bf16 %v3472_v10, %v3471_v26 }
0x1386   :  { %v3108_v39 = vmul.f32 1.442695, %v3106_v42  ;;  %v4665_v42 = vpack.c.bf16 %v3476_v14, %v3475_v61 }
0x1387   :  { %v3105_v3 = vpop.xlane.xlu0 %3104 }
0x1388   :  { %4915 = vpow2.f32 %v3108_v39  ;;  %v3107_v4 = vsub.f32 %v3098_v41, %v3105_v3  ;;  %v4661_v41 = vpack.c.bf16 %v3474_v50, %v3473_v21  ;;  %v3478_v39 = vld [vmem:[%s6905_s15 + $0x78] sm:$0xff] }
0x1389   :  { %v4669_v3 = vpack.c.bf16 %v3478_v39, %v3477_v35 }
0x138a   :  { %v3110_v22 = vmul.f32 1.442695, %v3107_v4  ;;  %v3763_v4 = vld [vmem:[#allocation10] ss:$0 sm:$0xff] }
0x138c   :  { %4917 = vpow2.f32 %v3110_v22 }
0x1392   :  { %v4916_v55 = vpop.eup %4915 }
0x1393   :  { %v3112_v56 = vsel %vm3099_vm3, %v4916_v55, 0.0 }
0x1394   :  { %3113 = vadd.xlane.f32.xlu1 %v3112_v56 }
0x1396   :  { %v4918_v8 = vpop.eup %4917 }
0x1397   :  { %v3115_v57 = vsel %vm3099_vm3, %v4918_v8, 0.0 }
0x1398   :  { %3116 = vadd.xlane.f32.xlu1 %v3115_v57 }
0x1421   :  { %v3114_v23 = vpop.xlane.xlu1 %3113 }
0x1422   :  { %4919 = vrcp.f32 %v3114_v23 }
0x1425   :  { %v3117_v44 = vpop.xlane.xlu1 %3116 }
0x1426   :  { %4921 = vrcp.f32 %v3117_v44 }
0x142c   :  { %v4920_v24 = vpop.eup %4919 }
0x142d   :  { %v3119_v25 = vmul.f32 %v4920_v24, %v4916_v55 }
0x142f   :  { %3122 = vst.msk [vmem:[#allocation14] sm:$0xff] %vm3099_vm3, %v3119_v25  ;;  %4409 = vmatmul.mubr.msk.f32.vlgmr.msra.gmra.mrb[70].mxu0 %vm3099_vm3, %v3119_v25 }
0x1430   :  { %v4922_v13 = vpop.eup %4921  ;;  %4412 = vmatpush3.msra.mxu0 %v6677_v59  ;;  %4413 = vmatprep.mubr.msk.f32.mxu0 %vm5154_vm0, %v5152_v0  ;;  %v3463_v0 = vld [vmem:[%s6905_s15] sm:$0xff]  ;;  %v3464_v59 = vld [vmem:[%s6905_s15 + $0x8] sm:$0xff]  ;;  %s5157_s15 = smov [#allocation14]  }
0x1431   :  { %v3121_v18 = vmul.f32 %v4922_v13, %v4918_v8  ;;  %v4641_v48 = vpack.c.bf16 %v3464_v59, %v3463_v0  ;;  %s3602_s24 = sshll.u32 %s5157_s15, 4  ;;  %s3603_s24 = int_to_ptr.vmem [resolvable:$true] %s3602_s24 }
0x1432   :  { %s5093_s20 = scalar_lea.vmem %s3603_s24, 256  ;;  %p5098_p13 = scmp.lt.s32.totalorder %s3603_s24, %s3603_s24 }
0x1433   :  { %3123 = vst.msk [vmem:[#allocation14 + $0x8] sm:$0xff] %vm3099_vm3, %v3121_v18  ;;  %4414 = vmatmul.mubr.msk.f32.vlgmr.msra.gmra.mrb[72].mxu0 %vm3099_vm3, %v3121_v18  ;;  %4642 = vmatprep.subr.bf16.mxu0 %v4641_v48  ;;  %p5094_p12 = scmp.ne.s32.totalorder %s3603_s24, %s5093_s20  ;;  %p5099_p0 = scmp.lt.s32.totalorder %s5093_s20, %s5093_s20 }
0x1434   :  { %4644 = vmatpush3.bf16.msra.mxu0 %v4641_v48 }
0x1435   :  { %4646 = vmatprep.subr.bf16.mxu0 %v4645_v33  ;;  %p5100_p1 = por %p5099_p0, %p5098_p13 }
0x1437   :  { %p5101_p2 = pnand %p5100_p1, %p5094_p12 }
0x1438   :  { %4648 = vmatpush3.bf16.msra.mxu0 %v4645_v33 }
0x1439   :  { %4650 = vmatprep.subr.bf16.mxu0 %v4649_v38 }
0x143c   :  { %4652 = vmatpush3.bf16.msra.mxu0 %v4649_v38 }
0x143d   :  { %4654 = vmatprep.subr.bf16.mxu0 %v4653_v62 }
0x1440   :  { %4656 = vmatpush3.bf16.msra.mxu0 %v4653_v62 }
0x1441   :  { %4658 = vmatprep.subr.bf16.mxu0 %v4657_v11 }
0x1444   :  { %4660 = vmatpush3.bf16.msra.mxu0 %v4657_v11 }
0x1445   :  { %4662 = vmatprep.subr.bf16.mxu0 %v4661_v41 }
0x1448   :  { %4664 = vmatpush3.bf16.msra.mxu0 %v4661_v41 }
0x1449   :  { %4666 = vmatprep.subr.bf16.mxu0 %v4665_v42 }
0x144c   :  { %4668 = vmatpush3.bf16.msra.mxu0 %v4665_v42 }
0x144d   :  { %4670 = vmatprep.subr.bf16.mxu0 %v4669_v3 }
0x1450   :  { %4672 = vmatpush3.bf16.msra.mxu0 %v4669_v3 }
0x1502   :  { %v3193_v6 = vpop.f32.mrb[70].mxu0 }
0x1503   :  { %v4410_v7 = vpop.f32.mrb[71].mxu0  ;;  %4483 = vmatprep.mubr.f32.mxu1 %v3193_v6 }
0x1506   :  { %v3266_v5 = vpop.f32.mrb[72].mxu0 }
0x1507   :  { %v4415_v46 = vpop.f32.mrb[73].mxu0  ;;  %4484 = vmatmul.mubr.f32.vlgmr.msra.gmra.mrb[66].mxu1 %v3266_v5 }
0x15da   :  { %v4485_v22 = vpop.f32.mrb[66].mxu1 }
0x15db   :  { %v3460_v55 = vadd.f32 %v4485_v22, %v3763_v4  ;;  %v3443_v56 = vpop.f32.mrb[67].mxu1 }
0x15dc   :  { %v3459_v8 = vadd.f32 %v3763_v4, %v3443_v56 }
0x15de   :  { %4923 = vtanh.f32 %v3459_v8 }
0x15df   :  { %4925 = vtanh.f32 %v3460_v55 }
0x15e8   :  { %v4924_v57 = vpop.eup %4923 }
0x15e9   :  { %v4926_v63 = vpop.eup %4925  ;;  %4518 = vmatprep.mubr.f32.mxu0 %v4924_v57 }
0x15ea   :  { %4519 = vmatmul.mubr.f32.vlgmr.msra.gmra.mrb[74].mxu0 %v4926_v63 }
0x16bd   :  { %v4520_v17 = vpop.f32.mrb[74].mxu0 }
0x16be   :  { %v3558_v58 = vadd.f32 %v4520_v17, %v3764_v16  ;;  %v3552_v43 = vpop.f32.mrb[75].mxu0 }
0x16bf   :  { %v3553_v27 = vadd.f32 %v3764_v16, %v3552_v43 }
0x16c0   :  { %3563 = vmax.xlane.f32.xlu1 %v3558_v58 }
0x16c1   :  { %3561 = vmax.xlane.f32.xlu0 %v3553_v27 }
0x174d   :  { %v3564_v51 = vpop.xlane.xlu1 %3563 }
0x174e   :  { %v3566_v2 = vsub.f32 %v3558_v58, %v3564_v51  ;;  %v3562_v9 = vpop.xlane.xlu0 %3561 }
0x174f   :  { %v3565_v31 = vsub.f32 %v3553_v27, %v3562_v9 }
0x1750   :  { %v3569_v47 = vmul.f32 1.442695, %v3566_v2 }
0x1751   :  { %v3567_v45 = vmul.f32 1.442695, %v3565_v31 }
0x1752   :  { %4927 = vpow2.f32 %v3569_v47 }
0x1753   :  { %4929 = vpow2.f32 %v3567_v45 }
0x175c   :  { %v4928_v15 = vpop.eup %4927 }
0x175d   :  { %v4930_v37 = vpop.eup %4929  ;;  %3573 = vadd.xlane.f32.xlu1 %v4928_v15 }
0x175e   :  { %3571 = vadd.xlane.f32.xlu0 %v4930_v37 }
0x175f   :  { %5104 = shalt.err (!%p5101_p2)
}
0x1760   :  { %s5105_s12 = scalar_lea.hbm %s6908_s18, 256 }
0x1761   :  { %p5106_p3 = scmp.ne.s32.totalorder %s6908_s18, %s5105_s12  ;;  %p5109_p4 = scmp.lt.u32.totalorder %s5105_s12, %s6908_s18 }
0x1763   :  { %p5111_p5 = pnand %p5109_p4, %p5106_p3 }
0x1765   :  { %5114 = shalt.err (!%p5111_p5)
}
0x1766   :  { %s5158_s28 = smov 128   ;;  %s5159_s5 = smov 8  }
0x1767   :  { %3608 = dma.vmem_to_hbm [thread:$0]  %s3603_s24, 256, %s6908_s18, [#allocation15], %s5158_s28, %s5158_s28, %s5159_s5  }
0x1768   :  { %s5160_s6 = smov [#allocation13]  }
0x1769   :  { %s3590_s13 = sshll.u32 %s5160_s6, 4  ;;  %s3591_s13 = int_to_ptr.vmem [resolvable:$true] %s3590_s13 }
0x176a   :  { %s5115_s7 = scalar_lea.vmem %s3591_s13, 256  ;;  %p5120_p7 = scmp.lt.s32.totalorder %s3591_s13, %s3591_s13 }
0x176b   :  { %p5116_p6 = scmp.ne.s32.totalorder %s3591_s13, %s5115_s7  ;;  %p5121_p8 = scmp.lt.s32.totalorder %s5115_s7, %s5115_s7 }
0x176d   :  { %p5122_p9 = por %p5121_p8, %p5120_p7 }
0x176f   :  { %p5123_p10 = pnand %p5122_p9, %p5116_p6 }
0x17ea   :  { %v3574_v19 = vpop.xlane.xlu1 %3573 }
0x17eb   :  { %4931 = vlog2.f32 %v3574_v19  ;;  %v3572_v28 = vpop.xlane.xlu0 %3571 }
0x17ec   :  { %4933 = vlog2.f32 %v3572_v28 }
0x17f5   :  { %v4932_v1 = vpop.eup %4931 }
0x17f6   :  { %v4934_v32 = vpop.eup %4933  ;;  %v3578_v20 = vmul.f32 0.6931472, %v4932_v1 }
0x17f7   :  { %v3576_v12 = vmul.f32 0.6931472, %v4934_v32 }
0x17f8   :  { %v3580_v30 = vadd.f32 %v3578_v20, %v3564_v51 }
0x17f9   :  { %v3579_v23 = vadd.f32 %v3576_v12, %v3562_v9 }
0x17fa   :  { %v3582_v44 = vsub.f32 %v3558_v58, %v3580_v30 }
0x17fb   :  { %v3581_v24 = vsub.f32 %v3553_v27, %v3579_v23 }
0x17fc   :  { %3584 = vst [vmem:[#allocation13 + $0x8] sm:$0xff] %v3582_v44 }
0x17fd   :  { %3583 = vst [vmem:[#allocation13] sm:$0xff] %v3581_v24 }
0x17fe   :  { %5126 = shalt.err (!%p5123_p10)
}
0x17ff   :  { %s5127_s25 = scalar_lea.hbm %s6907_s17, 256 }
0x1800   :  { %p5128_p11 = scmp.ne.s32.totalorder %s6907_s17, %s5127_s25  ;;  %p5131_p12 = scmp.lt.u32.totalorder %s5127_s25, %s6907_s17 }
0x1802   :  { %p5133_p13 = pnand %p5131_p12, %p5128_p11 }
0x1804   :  { %5136 = shalt.err (!%p5133_p13)
}
0x1805   :  { %3596 = dma.vmem_to_hbm [thread:$0]  %s3591_s13, 256, %s6907_s17, [#allocation6], %s5158_s28, %s5158_s28, %s5159_s5  }
0x1806   :  { %5143 = dma.done.wait [#allocation6], 256  }
0x1807   :  { %5144 = vsyncadd [#allocation6], 4294967040 }
0x1808   :  { %5145 = dma.done.wait [#allocation15], 256  }
0x1809   :  { %5146 = vsyncadd [#allocation15], 4294967040 }
0x180a   :  { %3615 = vsyncpa [#allocation5], 1 }
0x180b   :  { %3616 = vsyncpa [#allocation8], 1 }
0x180c   :  { %3617 = vsyncpa [#allocation11], 1 }
0x180d   :  { %3618 = vsyncpa [#allocation6], 1 }
0x180e   :  { %3619 = vsyncpa [#allocation15], 1 }

</bundles_post_ra>
